<compile_context>
chip_gen: v6e
topology: v6e:2x2x1
jax: 0.10.0
libtpu: 0.0.40
codegen_flags: <defaults>
</compile_context>

<pallas_src>
import functools

import jax
import jax.numpy as jnp
from jax.experimental import pallas as pl
from jax.experimental.pallas import tpu as pltpu


# Scoped VMEM limit: worst-case footprint of the fused fc kernel is ~14 MiB
# (tm=1024, tk=1024), so 32 MiB is safe on v5e/v6e (128 MiB) and v7x (64 MiB).
_VMEM_LIMIT = 32 * 1024 * 1024


# ----------------------------------------------------------------------------
# Tiling / padding helpers.
# ----------------------------------------------------------------------------
def _round_up(x, m):
    return ((x + m - 1) // m) * m


def _padded_n(N):
    return _round_up(N, 128)


def _pick_m_tiling(M):
    """(M_pad, tm). Single full-extent tile whenever possible (no activation
    pad copy, no fc weight re-streaming); otherwise a tile with <=25% waste."""
    if M <= 1024:
        return M, M
    M8 = _round_up(M, 8)
    for tm in (512, 256, 128, 64):
        M_pad = _round_up(M8, tm)
        if (M_pad - M) * 4 <= M:
            return M_pad, tm
    return M8, 8


def _pick_k_tiling(K):
    """(K_pad, tk): K_pad multiple of 128, tk <= 1024 and divides K_pad."""
    K_pad = _round_up(K, 128)
    if K_pad <= 1024:
        return K_pad, K_pad
    for tk in (1024, 512, 256, 128):
        if K_pad % tk == 0:
            return K_pad, tk
    return K_pad, 128  # unreachable


def _pack_weight(w_out_k, N_pad, K_pad=None):
    """(Cout, K) PyTorch-flattened weight -> (K_pad, N_pad) bf16, zero padded.
    K_pad defaults to the natural K (no contraction padding)."""
    Cout, K = w_out_k.shape
    if K_pad is None:
        K_pad = K
    wt = w_out_k.T.astype(jnp.bfloat16)
    return jnp.pad(wt, ((0, K_pad - K), (0, N_pad - Cout)))


def _pack_bias(b, N_pad):
    return jnp.pad(b.astype(jnp.float32), (0, N_pad - b.shape[0])).reshape(1, N_pad)


# ----------------------------------------------------------------------------
# Pallas kernels.
# ----------------------------------------------------------------------------
def _mm_bias_single_kernel(x_ref, w_ref, b_ref, o_ref, *, relu):
    # Single K tile: dot (bf16 x bf16 -> f32) + bias (+ relu) -> o_ref (bf16).
    y = jnp.dot(x_ref[...], w_ref[...], preferred_element_type=jnp.float32)
    y = y + b_ref[...]
    if relu:
        y = jnp.maximum(y, 0.0)
    o_ref[...] = y.astype(o_ref.dtype)


def _fused_fc_kernel(x_ref, w1_ref, b1_ref, w2_ref, b2_ref, o_ref, acc_ref):
    # fc1: K-tiled accumulate into VMEM; epilogue: bias+ReLU then fc2 matmul.
    k = pl.program_id(1)

    @pl.when(k == 0)
    def _():
        acc_ref[...] = jnp.zeros_like(acc_ref)

    acc_ref[...] += jnp.dot(x_ref[...], w1_ref[...],
                            preferred_element_type=jnp.float32)

    @pl.when(k == pl.num_programs(1) - 1)
    def _():
        h = jnp.maximum(acc_ref[...] + b1_ref[...], 0.0)
        y = jnp.dot(h.astype(jnp.bfloat16), w2_ref[...],
                    preferred_element_type=jnp.float32) + b2_ref[...]
        o_ref[...] = y.astype(o_ref.dtype)


# ----------------------------------------------------------------------------
# Pallas wrappers.
# ----------------------------------------------------------------------------
def matmul_bias(x, w_packed, b_packed, *, relu, out_dtype=jnp.bfloat16):
    """x: (M, K) bf16 at natural K; w_packed: (K, N_pad) bf16; b: (1, N_pad) f32.
    Returns (M, N_pad) out_dtype."""
    M, K = x.shape
    Kw, N_pad = w_packed.shape
    assert Kw == K, (Kw, K)
    M_pad, tm = _pick_m_tiling(M)
    if M_pad != M:
        x = jnp.pad(x, ((0, M_pad - M), (0, 0)))

    out = pl.pallas_call(
        functools.partial(_mm_bias_single_kernel, relu=relu),
        out_shape=jax.ShapeDtypeStruct((M_pad, N_pad), out_dtype),
        grid_spec=pltpu.PrefetchScalarGridSpec(
            num_scalar_prefetch=0,
            grid=(M_pad // tm,),
            in_specs=[
                pl.BlockSpec((tm, K), lambda m: (m, 0)),
                pl.BlockSpec((K, N_pad), lambda m: (0, 0)),
                pl.BlockSpec((1, N_pad), lambda m: (0, 0)),
            ],
            out_specs=pl.BlockSpec((tm, N_pad), lambda m: (m, 0)),
        ),
        compiler_params=pltpu.CompilerParams(
            dimension_semantics=("parallel",),
            vmem_limit_bytes=_VMEM_LIMIT,
        ),
    )(x, w_packed, b_packed)
    return out if M_pad == M else out[:M]


def fused_fc(x, w1p, b1p, w2p, b2p):
    """Fused fc1(+ReLU)+fc2.  x: (M, K) bf16; w1p: (K_pad, 1024) bf16;
    w2p: (1024, N_pad) bf16; biases f32.  Returns (M, N_pad) f32."""
    M, K = x.shape
    K_pad, H = w1p.shape
    _, N_pad = w2p.shape
    M_pad, tm = _pick_m_tiling(M)
    K_pad2, tk = _pick_k_tiling(K)
    assert K_pad2 == K_pad, (K_pad2, K_pad)
    if (M_pad, K_pad) != (M, K):
        x = jnp.pad(x, ((0, M_pad - M), (0, K_pad - K)))

    out = pl.pallas_call(
        _fused_fc_kernel,
        out_shape=jax.ShapeDtypeStruct((M_pad, N_pad), jnp.float32),
        grid_spec=pltpu.PrefetchScalarGridSpec(
            num_scalar_prefetch=0,
            grid=(M_pad // tm, K_pad // tk),
            in_specs=[
                pl.BlockSpec((tm, tk), lambda m, k: (m, k)),
                pl.BlockSpec((tk, H), lambda m, k: (k, 0)),
                pl.BlockSpec((1, H), lambda m, k: (0, 0)),
                pl.BlockSpec((H, N_pad), lambda m, k: (0, 0)),
                pl.BlockSpec((1, N_pad), lambda m, k: (0, 0)),
            ],
            out_specs=pl.BlockSpec((tm, N_pad), lambda m, k: (m, 0)),
            scratch_shapes=[pltpu.VMEM((tm, H), jnp.float32)],
        ),
        compiler_params=pltpu.CompilerParams(
            dimension_semantics=("parallel", "arbitrary"),
            vmem_limit_bytes=_VMEM_LIMIT,
        ),
    )(x, w1p, b1p, w2p, b2p)
    return out if M_pad == M else out[:M]


# ----------------------------------------------------------------------------
# Patch extraction (plain-JAX glue; exact, single gather, PyTorch flatten order).
# ----------------------------------------------------------------------------
def _extract_patches_3d(x, kd, kh, kw, sd, sh, sw):
    # x: (N, C, D, H, W) -> (N, Do, Ho, Wo, C*kd*kh*kw)
    N, C, D, H, W = x.shape
    Do = (D - kd) // sd + 1
    Ho = (H - kh) // sh + 1
    Wo = (W - kw) // sw + 1
    d_idx = (jnp.arange(Do) * sd)[:, None] + jnp.arange(kd)[None, :]
    h_idx = (jnp.arange(Ho) * sh)[:, None] + jnp.arange(kh)[None, :]
    w_idx = (jnp.arange(Wo) * sw)[:, None] + jnp.arange(kw)[None, :]
    p = x[:, :,
          d_idx[:, :, None, None, None, None],
          h_idx[None, None, :, :, None, None],
          w_idx[None, None, None, None, :, :]]          # (N,C,Do,kd,Ho,kh,Wo,kw)
    p = p.transpose(0, 2, 4, 6, 1, 3, 5, 7)             # (N,Do,Ho,Wo,C,kd,kh,kw)
    return p.reshape(N, Do, Ho, Wo, C * kd * kh * kw), (Do, Ho, Wo)


def _conv2_cols_from_conv1(y1_nat, n_planes, P1):
    """y1_nat: (N, P1, C_pad) conv1 kernel output in natural (position, channel)
    layout (only channels < 90 are real).  Returns the conv2 im2col matrix
    (N, H2o, W2o, 9) matching PyTorch's
    relu(conv1(x)).view(N, 1, -1, n_planes) -> Conv2d(1, 64, (3,3)) with
    (kh, kw) weight-flatten order -- the NCDHW transpose + view are folded
    into the gather indices, never materialized."""
    flat1 = 90 * P1
    H2 = flat1 // n_planes
    W2 = n_planes
    H2o, W2o = H2 - 2, W2 - 2
    f = ((jnp.arange(H2o)[:, None, None, None] + jnp.arange(3)[None, :, None, None]) * W2
         + (jnp.arange(W2o)[None, None, :, None] + jnp.arange(3)[None, None, None, :]))
    f = f.transpose(0, 2, 1, 3).reshape(H2o, W2o, 9)     # last dim ordered i*3+j
    p1_idx = f % P1                                       # position within (Do,Ho,Wo)
    ch_idx = f // P1                                      # conv1 output channel (<90)
    cols = y1_nat[:, p1_idx, ch_idx]                      # (N, H2o, W2o, 9)
    return cols, (H2o, W2o)


# ----------------------------------------------------------------------------
# Model: parameter init, packing, forward.
# ----------------------------------------------------------------------------
def compute_feature_dims(n_bands, patch_size, n_planes):
    Do = (n_bands - 24) // 9 + 1
    Ho = Wo = patch_size - 2
    flat1 = 90 * Do * Ho * Wo
    assert flat1 % n_planes == 0, "conv1 output must be divisible by n_planes"
    H2 = flat1 // n_planes
    return 64 * (H2 - 2) * (n_planes - 2)


def _kaiming_uniform(key, shape, fan_in):
    bound = (6.0 / fan_in) ** 0.5
    return jax.random.uniform(key, shape, jnp.float32, -bound, bound)


def init_params(key, n_bands, n_classes, patch_size, n_planes):
    """PyTorch-layout float32 parameters (matches HSICNN.weight_init)."""
    features_size = compute_feature_dims(n_bands, patch_size, n_planes)
    k1, k2, k3, k4 = jax.random.split(key, 4)
    params = {
        # Conv3d(1, 90, (24, 3, 3), stride=(9, 1, 1))
        "conv1_w": _kaiming_uniform(k1, (90, 1, 24, 3, 3), 1 * 24 * 3 * 3),
        "conv1_b": jnp.zeros((90,), jnp.float32),
        # Conv2d(1, 64, (3, 3))
        "conv2_w": _kaiming_uniform(k2, (64, 1, 3, 3), 1 * 3 * 3),
        "conv2_b": jnp.zeros((64,), jnp.float32),
        # Linear(features_size, 1024)
        "fc1_w": _kaiming_uniform(k3, (1024, features_size), features_size),
        "fc1_b": jnp.zeros((1024,), jnp.float32),
        # Linear(1024, n_classes)
        "fc2_w": _kaiming_uniform(k4, (n_classes, 1024), 1024),
        "fc2_b": jnp.zeros((n_classes,), jnp.float32),
    }
    return params, features_size


def pack_params(params):
    """Pre-transpose / pad / cast weights ONCE (outside the forward pass).

    fc1's input dim is additionally permuted from PyTorch's channel-major
    feature order (c*P2 + p) to the kernel's natural position-major conv2
    output order (p*64 + c), removing the runtime NCHW transpose."""
    features_size = params["fc1_w"].shape[1]
    n_classes = params["fc2_w"].shape[0]
    P2 = features_size // 64
    fc1_w_perm = (params["fc1_w"].reshape(1024, 64, P2)
                  .transpose(0, 2, 1).reshape(1024, features_size))
    K_fc, _ = _pick_k_tiling(features_size)
    packed = {
        "conv1_w": _pack_weight(params["conv1_w"].reshape(90, -1), _padded_n(90)),
        "conv1_b": _pack_bias(params["conv1_b"], _padded_n(90)),
        "conv2_w": _pack_weight(params["conv2_w"].reshape(64, -1), _padded_n(64)),
        "conv2_b": _pack_bias(params["conv2_b"], _padded_n(64)),
        "fc1_w": _pack_weight(fc1_w_perm, 1024, K_pad=K_fc),
        "fc1_b": _pack_bias(params["fc1_b"], 1024),
        "fc2_w": _pack_weight(params["fc2_w"], _padded_n(n_classes)),
        "fc2_b": _pack_bias(params["fc2_b"], _padded_n(n_classes)),
    }
    return packed


def hsicnn_forward(packed, x, *, n_planes, n_classes):
    N = x.shape[0]

    # ---- conv1 (Conv3d, stride (9,1,1)) + ReLU: im2col gather + matmul ----
    cols1, (Do, Ho, Wo) = _extract_patches_3d(x, 24, 3, 3, 9, 1, 1)
    P1 = Do * Ho * Wo
    cols1 = cols1.reshape(N * P1, -1).astype(jnp.bfloat16)   # convert fuses into gather
    y1 = matmul_bias(cols1, packed["conv1_w"], packed["conv1_b"], relu=True)
    y1 = y1.reshape(N, P1, -1)       # natural (position, channel) layout, bf16

    # ---- conv2 (Conv2d 3x3) + ReLU: gather straight from natural layout ----
    cols2, (H2o, W2o) = _conv2_cols_from_conv1(y1, n_planes, P1)
    P2 = H2o * W2o
    y2 = matmul_bias(cols2.reshape(N * P2, 9),
                     packed["conv2_w"], packed["conv2_b"], relu=True)
    feat = y2[:, :64].reshape(N, P2 * 64)   # fc1 weight pre-permuted to this layout

    # ---- fused fc1 (+ReLU) + fc2 ----
    out = fused_fc(feat, packed["fc1_w"], packed["fc1_b"],
                   packed["fc2_w"], packed["fc2_b"])
    return out[:, :n_classes]


if __name__ == "__main__":
    # n_bands=33 -> conv1 depth-out 2; patch_size=3 -> 1x1 spatial out;
    # conv1 flat = 180, n_planes=6 -> conv2 image (30, 6);
    # conv2 out (64, 28, 4) -> features_size = 7168.
    n_bands, n_classes, patch_size, n_planes = 33, 10, 3, 6
    batch = 2

    key = jax.random.PRNGKey(0)
    k_param, k_x = jax.random.split(key)
    params, features_size = init_params(
        k_param, n_bands, n_classes, patch_size, n_planes
    )
    packed = pack_params(params)
    x = jax.random.normal(
        k_x, (batch, 1, n_bands, patch_size, patch_size), jnp.float32
    )

    fwd = jax.jit(functools.partial(
        hsicnn_forward, n_planes=n_planes, n_classes=n_classes
    ))
    out = jax.block_until_ready(fwd(packed, x))
    assert out.shape == (batch, n_classes), out.shape
    assert out.dtype == jnp.float32
    print("KERNEL_OK")
</pallas_src>

<mosaic_0001>
module attributes {stable_mosaic.version = 11 : i64} {
  func.func @_mm_bias_single_kernel(%arg0: i32, %arg1: memref<4x216xbf16, #tpu.memory_space<vmem>>, %arg2: memref<216x128xbf16, #tpu.memory_space<vmem>>, %arg3: memref<1x128xf32, #tpu.memory_space<vmem>>, %arg4: memref<4x128xbf16, #tpu.memory_space<vmem>>) attributes {dimension_semantics = [#tpu.dimension_semantics<parallel>], iteration_bounds = array<i64: 1>, scalar_prefetch = 0 : i64, scratch_operands = 0 : i64, tpu.core_type = #tpu.core_type<tc>, window_params = [{transform_indices = @transform_0, window_bounds = array<i64: 4, 216>}, {pipeline_mode = #tpu.pipeline_mode<synchronous>, transform_indices = @transform_1, window_bounds = array<i64: 216, 128>}, {pipeline_mode = #tpu.pipeline_mode<synchronous>, transform_indices = @transform_2, window_bounds = array<i64: 1, 128>}, {transform_indices = @transform_3, window_bounds = array<i64: 4, 128>}]} {
    %c0 = arith.constant 0 : index
    %c0_0 = arith.constant 0 : index
    %0 = vector.load %arg1[%c0, %c0_0] : memref<4x216xbf16, #tpu.memory_space<vmem>>, vector<4x216xbf16>
    %c0_1 = arith.constant 0 : index
    %c0_2 = arith.constant 0 : index
    %1 = vector.load %arg2[%c0_1, %c0_2] : memref<216x128xbf16, #tpu.memory_space<vmem>>, vector<216x128xbf16>
    %cst = arith.constant dense<0.000000e+00> : vector<4x128xf32>
    %2 = tpu.matmul %0, %1, %cst {dimension_numbers = #tpu.dot_dimension_numbers<[1], [0], [0], [1], [0, 0, 1, 1], [], []>} : vector<4x216xbf16>, vector<216x128xbf16>, vector<4x128xf32> -> vector<4x128xf32>
    %c0_3 = arith.constant 0 : index
    %c0_4 = arith.constant 0 : index
    %3 = vector.load %arg3[%c0_3, %c0_4] : memref<1x128xf32, #tpu.memory_space<vmem>>, vector<1x128xf32>
    %4 = vector.broadcast %3 : vector<1x128xf32> to vector<4x128xf32>
    %5 = arith.addf %2, %4 : vector<4x128xf32>
    %cst_5 = arith.constant 0.000000e+00 : f32
    %6 = vector.broadcast %cst_5 : f32 to vector<4x128xf32>
    %7 = arith.maximumf %5, %6 : vector<4x128xf32>
    %8 = arith.truncf %7 : vector<4x128xf32> to vector<4x128xbf16>
    %c0_6 = arith.constant 0 : index
    %c0_7 = arith.constant 0 : index
    %9 = vector.load %arg4[%c0_6, %c0_7] : memref<4x128xbf16, #tpu.memory_space<vmem>>, vector<4x128xbf16>
    tpu.vector_store %arg4[%c0_6, %c0_7], %8 {strides = array<i32>} : memref<4x128xbf16, #tpu.memory_space<vmem>>, vector<4x128xbf16>,
    return
  }
  func.func @transform_0(%arg0: i32) -> (i32, i32) {
    %c0_i32 = arith.constant 0 : i32
    %c0_i32_0 = arith.constant 0 : i32
    return %arg0, %c0_i32 : i32, i32
  }
  func.func @transform_1(%arg0: i32) -> (i32, i32) {
    %c0_i32 = arith.constant 0 : i32
    %c0_i32_0 = arith.constant 0 : i32
    %c0_i32_1 = arith.constant 0 : i32
    return %c0_i32, %c0_i32_0 : i32, i32
  }
  func.func @transform_2(%arg0: i32) -> (i32, i32) {
    %c0_i32 = arith.constant 0 : i32
    %c0_i32_0 = arith.constant 0 : i32
    %c0_i32_1 = arith.constant 0 : i32
    return %c0_i32, %c0_i32_0 : i32, i32
  }
  func.func @transform_3(%arg0: i32) -> (i32, i32) {
    %c0_i32 = arith.constant 0 : i32
    %c0_i32_0 = arith.constant 0 : i32
    return %arg0, %c0_i32 : i32, i32
  }
}

module attributes {stable_mosaic.version = 11 : i64} {
  func.func @_mm_bias_single_kernel(%arg0: i32, %arg1: memref<224x9xbf16, #tpu.memory_space<vmem>>, %arg2: memref<9x128xbf16, #tpu.memory_space<vmem>>, %arg3: memref<1x128xf32, #tpu.memory_space<vmem>>, %arg4: memref<224x128xbf16, #tpu.memory_space<vmem>>) attributes {dimension_semantics = [#tpu.dimension_semantics<parallel>], iteration_bounds = array<i64: 1>, scalar_prefetch = 0 : i64, scratch_operands = 0 : i64, tpu.core_type = #tpu.core_type<tc>, window_params = [{transform_indices = @transform_0, window_bounds = array<i64: 224, 9>}, {pipeline_mode = #tpu.pipeline_mode<synchronous>, transform_indices = @transform_1, window_bounds = array<i64: 9, 128>}, {pipeline_mode = #tpu.pipeline_mode<synchronous>, transform_indices = @transform_2, window_bounds = array<i64: 1, 128>}, {transform_indices = @transform_3, window_bounds = array<i64: 224, 128>}]} {
    %c0 = arith.constant 0 : index
    %c0_0 = arith.constant 0 : index
    %0 = vector.load %arg1[%c0, %c0_0] : memref<224x9xbf16, #tpu.memory_space<vmem>>, vector<224x9xbf16>
    %c0_1 = arith.constant 0 : index
    %c0_2 = arith.constant 0 : index
    %1 = vector.load %arg2[%c0_1, %c0_2] : memref<9x128xbf16, #tpu.memory_space<vmem>>, vector<9x128xbf16>
    %cst = arith.constant dense<0.000000e+00> : vector<224x128xf32>
    %2 = tpu.matmul %0, %1, %cst {dimension_numbers = #tpu.dot_dimension_numbers<[1], [0], [0], [1], [0, 0, 1, 1], [], []>} : vector<224x9xbf16>, vector<9x128xbf16>, vector<224x128xf32> -> vector<224x128xf32>
    %c0_3 = arith.constant 0 : index
    %c0_4 = arith.constant 0 : index
    %3 = vector.load %arg3[%c0_3, %c0_4] : memref<1x128xf32, #tpu.memory_space<vmem>>, vector<1x128xf32>
    %4 = vector.broadcast %3 : vector<1x128xf32> to vector<224x128xf32>
    %5 = arith.addf %2, %4 : vector<224x128xf32>
    %cst_5 = arith.constant 0.000000e+00 : f32
    %6 = vector.broadcast %cst_5 : f32 to vector<224x128xf32>
    %7 = arith.maximumf %5, %6 : vector<224x128xf32>
    %8 = arith.truncf %7 : vector<224x128xf32> to vector<224x128xbf16>
    %c0_6 = arith.constant 0 : index
    %c0_7 = arith.constant 0 : index
    %9 = vector.load %arg4[%c0_6, %c0_7] : memref<224x128xbf16, #tpu.memory_space<vmem>>, vector<224x128xbf16>
    tpu.vector_store %arg4[%c0_6, %c0_7], %8 {strides = array<i32>} : memref<224x128xbf16, #tpu.memory_space<vmem>>, vector<224x128xbf16>,
    return
  }
  func.func @transform_0(%arg0: i32) -> (i32, i32) {
    %c0_i32 = arith.constant 0 : i32
    %c0_i32_0 = arith.constant 0 : i32
    return %arg0, %c0_i32 : i32, i32
  }
  func.func @transform_1(%arg0: i32) -> (i32, i32) {
    %c0_i32 = arith.constant 0 : i32
    %c0_i32_0 = arith.constant 0 : i32
    %c0_i32_1 = arith.constant 0 : i32
    return %c0_i32, %c0_i32_0 : i32, i32
  }
  func.func @transform_2(%arg0: i32) -> (i32, i32) {
    %c0_i32 = arith.constant 0 : i32
    %c0_i32_0 = arith.constant 0 : i32
    %c0_i32_1 = arith.constant 0 : i32
    return %c0_i32, %c0_i32_0 : i32, i32
  }
  func.func @transform_3(%arg0: i32) -> (i32, i32) {
    %c0_i32 = arith.constant 0 : i32
    %c0_i32_0 = arith.constant 0 : i32
    return %arg0, %c0_i32 : i32, i32
  }
}

module attributes {stable_mosaic.version = 11 : i64} {
  func.func @_fused_fc_kernel(%arg0: i32, %arg1: i32, %arg2: memref<2x1024xbf16, #tpu.memory_space<vmem>>, %arg3: memref<1024x1024xbf16, #tpu.memory_space<vmem>>, %arg4: memref<1x1024xf32, #tpu.memory_space<vmem>>, %arg5: memref<1024x128xbf16, #tpu.memory_space<vmem>>, %arg6: memref<1x128xf32, #tpu.memory_space<vmem>>, %arg7: memref<2x128xf32, #tpu.memory_space<vmem>>, %arg8: memref<2x1024xf32, #tpu.memory_space<vmem>>) attributes {dimension_semantics = [#tpu.dimension_semantics<parallel>, #tpu.dimension_semantics<arbitrary>], iteration_bounds = array<i64: 1, 7>, scalar_prefetch = 0 : i64, scratch_operands = 1 : i64, tpu.core_type = #tpu.core_type<tc>, window_params = [{transform_indices = @transform_0, window_bounds = array<i64: 2, 1024>}, {transform_indices = @transform_1, window_bounds = array<i64: 1024, 1024>}, {pipeline_mode = #tpu.pipeline_mode<synchronous>, transform_indices = @transform_2, window_bounds = array<i64: 1, 1024>}, {pipeline_mode = #tpu.pipeline_mode<synchronous>, transform_indices = @transform_3, window_bounds = array<i64: 1024, 128>}, {pipeline_mode = #tpu.pipeline_mode<synchronous>, transform_indices = @transform_4, window_bounds = array<i64: 1, 128>}, {transform_indices = @transform_5, window_bounds = array<i64: 2, 128>}]} {
    %c0_i32 = arith.constant 0 : i32
    %0 = arith.cmpi eq, %arg1, %c0_i32 : i32
    %1 = arith.extui %0 : i1 to i32
    %c0_i32_0 = arith.constant 0 : i32
    %2 = arith.cmpi ne, %1, %c0_i32_0 : i32
    scf.if %2 {
      %cst_9 = arith.constant 0.000000e+00 : f32
      %12 = vector.broadcast %cst_9 : f32 to vector<2x1024xf32>
      %c0_10 = arith.constant 0 : index
      %c0_11 = arith.constant 0 : index
      %13 = vector.load %arg8[%c0_10, %c0_11] : memref<2x1024xf32, #tpu.memory_space<vmem>>, vector<2x1024xf32>
      tpu.vector_store %arg8[%c0_10, %c0_11], %12 {strides = array<i32>} : memref<2x1024xf32, #tpu.memory_space<vmem>>, vector<2x1024xf32>,
    } else {
    }
    %c0 = arith.constant 0 : index
    %c0_1 = arith.constant 0 : index
    %3 = vector.load %arg8[%c0, %c0_1] : memref<2x1024xf32, #tpu.memory_space<vmem>>, vector<2x1024xf32>
    %c0_2 = arith.constant 0 : index
    %c0_3 = arith.constant 0 : index
    %4 = vector.load %arg2[%c0_2, %c0_3] : memref<2x1024xbf16, #tpu.memory_space<vmem>>, vector<2x1024xbf16>
    %c0_4 = arith.constant 0 : index
    %c0_5 = arith.constant 0 : index
    %5 = vector.load %arg3[%c0_4, %c0_5] : memref<1024x1024xbf16, #tpu.memory_space<vmem>>, vector<1024x1024xbf16>
    %cst = arith.constant dense<0.000000e+00> : vector<2x1024xf32>
    %6 = tpu.matmul %4, %5, %cst {dimension_numbers = #tpu.dot_dimension_numbers<[1], [0], [0], [1], [0, 0, 1, 1], [], []>} : vector<2x1024xbf16>, vector<1024x1024xbf16>, vector<2x1024xf32> -> vector<2x1024xf32>
    %7 = arith.addf %3, %6 : vector<2x1024xf32>
    %c0_6 = arith.constant 0 : index
    %c0_7 = arith.constant 0 : index
    %8 = vector.load %arg8[%c0_6, %c0_7] : memref<2x1024xf32, #tpu.memory_space<vmem>>, vector<2x1024xf32>
    tpu.vector_store %arg8[%c0_6, %c0_7], %7 {strides = array<i32>} : memref<2x1024xf32, #tpu.memory_space<vmem>>, vector<2x1024xf32>,
    %c6_i32 = arith.constant 6 : i32
    %9 = arith.cmpi eq, %arg1, %c6_i32 : i32
    %10 = arith.extui %9 : i1 to i32
    %c0_i32_8 = arith.constant 0 : i32
    %11 = arith.cmpi ne, %10, %c0_i32_8 : i32
    scf.if %11 {
      %c0_9 = arith.constant 0 : index
      %c0_10 = arith.constant 0 : index
      %12 = vector.load %arg8[%c0_9, %c0_10] : memref<2x1024xf32, #tpu.memory_space<vmem>>, vector<2x1024xf32>
      %c0_11 = arith.constant 0 : index
      %c0_12 = arith.constant 0 : index
      %13 = vector.load %arg4[%c0_11, %c0_12] : memref<1x1024xf32, #tpu.memory_space<vmem>>, vector<1x1024xf32>
      %14 = vector.broadcast %13 : vector<1x1024xf32> to vector<2x1024xf32>
      %15 = arith.addf %12, %14 : vector<2x1024xf32>
      %cst_13 = arith.constant 0.000000e+00 : f32
      %16 = vector.broadcast %cst_13 : f32 to vector<2x1024xf32>
      %17 = arith.maximumf %15, %16 : vector<2x1024xf32>
      %18 = arith.truncf %17 : vector<2x1024xf32> to vector<2x1024xbf16>
      %c0_14 = arith.constant 0 : index
      %c0_15 = arith.constant 0 : index
      %19 = vector.load %arg5[%c0_14, %c0_15] : memref<1024x128xbf16, #tpu.memory_space<vmem>>, vector<1024x128xbf16>
      %cst_16 = arith.constant dense<0.000000e+00> : vector<2x128xf32>
      %20 = tpu.matmul %18, %19, %cst_16 {dimension_numbers = #tpu.dot_dimension_numbers<[1], [0], [0], [1], [0, 0, 1, 1], [], []>} : vector<2x1024xbf16>, vector<1024x128xbf16>, vector<2x128xf32> -> vector<2x128xf32>
      %c0_17 = arith.constant 0 : index
      %c0_18 = arith.constant 0 : index
      %21 = vector.load %arg6[%c0_17, %c0_18] : memref<1x128xf32, #tpu.memory_space<vmem>>, vector<1x128xf32>
      %22 = vector.broadcast %21 : vector<1x128xf32> to vector<2x128xf32>
      %23 = arith.addf %20, %22 : vector<2x128xf32>
      %c0_19 = arith.constant 0 : index
      %c0_20 = arith.constant 0 : index
      %24 = vector.load %arg7[%c0_19, %c0_20] : memref<2x128xf32, #tpu.memory_space<vmem>>, vector<2x128xf32>
      tpu.vector_store %arg7[%c0_19, %c0_20], %23 {strides = array<i32>} : memref<2x128xf32, #tpu.memory_space<vmem>>, vector<2x128xf32>,
    } else {
    }
    return
  }
  func.func @transform_0(%arg0: i32, %arg1: i32) -> (i32, i32) {
    %c0_i32 = arith.constant 0 : i32
    return %arg0, %arg1 : i32, i32
  }
  func.func @transform_1(%arg0: i32, %arg1: i32) -> (i32, i32) {
    %c0_i32 = arith.constant 0 : i32
    %c0_i32_0 = arith.constant 0 : i32
    return %arg1, %c0_i32 : i32, i32
  }
  func.func @transform_2(%arg0: i32, %arg1: i32) -> (i32, i32) {
    %c0_i32 = arith.constant 0 : i32
    %c0_i32_0 = arith.constant 0 : i32
    %c0_i32_1 = arith.constant 0 : i32
    return %c0_i32, %c0_i32_0 : i32, i32
  }
  func.func @transform_3(%arg0: i32, %arg1: i32) -> (i32, i32) {
    %c0_i32 = arith.constant 0 : i32
    %c0_i32_0 = arith.constant 0 : i32
    %c0_i32_1 = arith.constant 0 : i32
    return %c0_i32, %c0_i32_0 : i32, i32
  }
  func.func @transform_4(%arg0: i32, %arg1: i32) -> (i32, i32) {
    %c0_i32 = arith.constant 0 : i32
    %c0_i32_0 = arith.constant 0 : i32
    %c0_i32_1 = arith.constant 0 : i32
    return %c0_i32, %c0_i32_0 : i32, i32
  }
  func.func @transform_5(%arg0: i32, %arg1: i32) -> (i32, i32) {
    %c0_i32 = arith.constant 0 : i32
    %c0_i32_0 = arith.constant 0 : i32
    return %arg0, %c0_i32 : i32, i32
  }
}

</mosaic_0001>

<bundles_post_ra>
// kernel: hsicnn_forward.3
= control target key start
LH: loop header
LB: loop body
LE: loop exit
PB: predicated region body
PF: predicated region fallthrough
CT: control target
= control target key end

     0   :  { %8 = vsyncpa [#allocation3], 0  ;;  %s341_s0 = inlined_call_operand.vmem [shape: bf16[4,216], index: 0, kind: input, shape index: {}]   ;;  %s342_s1 = inlined_call_operand.hbm [shape: bf16[216,128], index: 1, kind: input, shape index: {}]   ;;  %s343_s2 = inlined_call_operand.hbm [shape: f32[1,128], index: 2, kind: input, shape index: {}]   ;;  %s344_s3 = inlined_call_operand.vmem [shape: bf16[4,128], index: 3, kind: output, shape index: {}]  }
   0x1   :  { %9 = vsyncpa [#allocation5], 0  ;;  %s304_s12 = smov [#allocation2]  }
   0x2   :  { %s17_s13 = sshll.u32 %s304_s12, 4  ;;  %s18_s13 = int_to_ptr.vmem [resolvable:$true] %s17_s13 }
   0x3   :  { %s268_s14 = scalar_lea.vmem %s18_s13, 1728  ;;  %p273_p1 = scmp.lt.s32.totalorder %s18_s13, %s18_s13 }
   0x4   :  { %p269_p0 = scmp.ne.s32.totalorder %s18_s13, %s268_s14  ;;  %p274_p2 = scmp.lt.s32.totalorder %s268_s14, %s268_s14 }
   0x6   :  { %p275_p3 = por %p274_p2, %p273_p1 }
   0x8   :  { %p276_p4 = pnand %p275_p3, %p269_p0 }
   0xa   :  { %279 = shalt.err (!%p276_p4)
}
   0xb   :  { %s305_s15 = smov 64   ;;  %s306_s16 = smov 4  }
   0xc   :  { %23 = dma.hbm_to_vmem [thread:$0]  %s342_s1, 1728, %s18_s13, [#allocation3], %s305_s15, %s305_s15, %s306_s16  }
   0xd   :  { %s307_s19 = smov [#allocation4]  }
   0xe   :  { %s30_s20 = sshll.u32 %s307_s19, 4  ;;  %s31_s20 = int_to_ptr.vmem [resolvable:$true] %s30_s20 }
   0xf   :  { %s288_s21 = scalar_lea.vmem %s31_s20, 16  ;;  %s292_s22 = scalar_lea.vmem %s31_s20, 32 }
  0x10   :  { %p289_p5 = scmp.ne.s32.totalorder %s31_s20, %s288_s21  ;;  %p293_p6 = scmp.lt.s32.totalorder %s31_s20, %s31_s20 }
  0x11   :  { %p294_p7 = scmp.lt.s32.totalorder %s292_s22, %s288_s21 }
  0x13   :  { %p295_p8 = por %p294_p7, %p293_p6 }
  0x15   :  { %p296_p9 = pnand %p295_p8, %p289_p5 }
  0x17   :  { %299 = shalt.err (!%p296_p9)
}
  0x18   :  { %33 = dma.hbm_to_vmem [thread:$0]  %s343_s2, 16, %s31_s20, [#allocation5]  }
  0x19   :  { %300 = dma.done.wait [#allocation3], 1728  }
  0x1a   :  { %301 = vsyncadd [#allocation3], 4294965568 }
  0x1b   :  { %302 = dma.done.wait [#allocation5], 16  }
  0x1c   :  { %303 = vsyncadd [#allocation5], 4294967280  ;;  %v308_v0 = vmov 0   ;;  %v246_v1 = vld [vmem:[#allocation2 + $0x38] sm:$0xff]   ;;  %v247_v2 = vld [vmem:[#allocation2 + $0x30] sm:$0xff]   ;;  %vm167_vm0 = vcmask 719872  }
  0x1d   :  { %175 = vmatprep.subr.bf16.mxu0 %v308_v0  ;;  %v248_v3 = vld [vmem:[#allocation2 + $0x28] sm:$0xff]   ;;  %v249_v4 = vld [vmem:[#allocation2 + $0x20] sm:$0xff]   ;;  %v250_v5 = vld [vmem:[#allocation2 + $0x18] sm:$0xff]   ;;  %vm171_vm1 = vcmask 1043456  }
  0x1e   :  { %176 = vmatpush1.bf16.msra.mxu0 %v246_v1  ;;  %v225_v6 = vld.sshfl [vmem:[%s341_s0] sm:$0x33 pattern:$0x76325410]  ;;  %v251_v8 = vld [vmem:[#allocation2 + $0x10] sm:$0xff]   ;;  %v252_v9 = vld [vmem:[#allocation2 + $0x8] sm:$0xff]  }
  0x1f   :  { %177 = vmatprep.subr.bf16.mxu0 %v308_v0  ;;  %v84_v7 = vcombine.high %v225_v6, %v225_v6  ;;  %v253_v10 = vld [vmem:[#allocation2] sm:$0xff]   ;;  %v254_v11 = vld [vmem:[#allocation2 + $0x68] ss:$0 sps:$4 sm:$0xff]   ;;  %v256_v14 = vld [vmem:[#allocation2 + $0x58] sm:$0xff]  }
  0x20   :  { %v173_v12 = vsel %vm171_vm1, %v254_v11, 0  ;;  %v255_v13 = vld [vmem:[#allocation2 + $0x60] sm:$0xff]   ;;  %v257_v15 = vld [vmem:[#allocation2 + $0x50] sm:$0xff]   ;;  %v258_v16 = vld [vmem:[#allocation2 + $0x48] sm:$0xff]  }
  0x21   :  { %240 = vmatprep.mubr.msk.bf16.mxu0 %vm167_vm0, %v84_v7  ;;  %v259_v17 = vld [vmem:[#allocation2 + $0x40] sm:$0xff]   ;;  %v224_v18 = vld [vmem:[#allocation4] ss:$0 sm:$0xff] }
  0x22   :  { %178 = vmatpush1.bf16.msra.mxu0 %v247_v2 }
  0x23   :  { %179 = vmatprep.subr.bf16.mxu0 %v308_v0 }
  0x26   :  { %180 = vmatpush1.bf16.msra.mxu0 %v248_v3 }
  0x27   :  { %181 = vmatprep.subr.bf16.mxu0 %v308_v0 }
  0x2a   :  { %182 = vmatpush1.bf16.msra.mxu0 %v249_v4 }
  0x2b   :  { %183 = vmatprep.subr.bf16.mxu0 %v308_v0 }
  0x2e   :  { %184 = vmatpush1.bf16.msra.mxu0 %v250_v5 }
  0x2f   :  { %185 = vmatprep.subr.bf16.mxu0 %v308_v0 }
  0x32   :  { %186 = vmatpush1.bf16.msra.mxu0 %v251_v8 }
  0x33   :  { %187 = vmatprep.subr.bf16.mxu0 %v308_v0 }
  0x36   :  { %188 = vmatpush1.bf16.msra.mxu0 %v252_v9 }
  0x37   :  { %189 = vmatprep.subr.bf16.mxu0 %v308_v0 }
  0x3a   :  { %190 = vmatpush1.bf16.msra.mxu0 %v253_v10 }
  0x3b   :  { %195 = vmatprep.subr.bf16.mxu0 %v308_v0 }
  0x3e   :  { %196 = vmatpush2.bf16.msra.mxu0 %v173_v12 }
  0x3f   :  { %197 = vmatprep.subr.bf16.mxu0 %v308_v0 }
  0x42   :  { %198 = vmatpush2.bf16.msra.mxu0 %v255_v13 }
  0x43   :  { %199 = vmatprep.subr.bf16.mxu0 %v308_v0 }
  0x46   :  { %200 = vmatpush2.bf16.msra.mxu0 %v256_v14 }
  0x47   :  { %201 = vmatprep.subr.bf16.mxu0 %v308_v0 }
  0x4a   :  { %202 = vmatpush2.bf16.msra.mxu0 %v257_v15 }
  0x4b   :  { %203 = vmatprep.subr.bf16.mxu0 %v308_v0 }
  0x4e   :  { %204 = vmatpush2.bf16.msra.mxu0 %v258_v16 }
  0x4f   :  { %205 = vmatprep.subr.bf16.mxu0 %v308_v0 }
  0x52   :  { %206 = vmatpush2.bf16.msra.mxu0 %v259_v17 }
  0x55   :  { %208 = vmatmul.mubr.bf16.vlgmr.msra.gmra.mxu0 %v225_v6 }
 0x115   :  { %v209_v19 = vpop.f32.mrf.mxu0 }
 0x116   :  { %v210_v20 = vadd.f32 %v224_v18, %v209_v19 }
 0x117   :  { %v211_v21 = vpop.f32.mrf.mxu0 }
 0x118   :  { %v215_v22 = vmax.f32 %v210_v20, 0.0 }
 0x119   :  { %v212_v23 = vpop.f32.mrf.mxu0 }
 0x11a   :  { %v216_v24 = vpack.c.bf16 %v215_v22, %v215_v22 }
 0x11b   :  { %v213_v25 = vpop.f32.mrf.mxu0 }
 0x11c   :  { %217 = vst [vmem:[%s344_s3] sm:$0x3] %v216_v24 }
 0x11d   :  { %222 = vsyncpa [#allocation3], 1 }
 0x11e   :  { %223 = vsyncpa [#allocation5], 1 }

// kernel: hsicnn_forward.4
= control target key start
LH: loop header
LB: loop body
LE: loop exit
PB: predicated region body
PF: predicated region fallthrough
CT: control target
= control target key end

     0   :  { %8 = vsyncpa [#allocation3], 0  ;;  %s961_s0 = inlined_call_operand.vmem [shape: bf16[224,9], index: 0, kind: input, shape index: {}]   ;;  %s962_s1 = inlined_call_operand.hbm [shape: bf16[9,128], index: 1, kind: input, shape index: {}]   ;;  %s963_s2 = inlined_call_operand.hbm [shape: f32[1,128], index: 2, kind: input, shape index: {}]   ;;  %s964_s3 = inlined_call_operand.vmem [shape: bf16[224,128], index: 3, kind: output, shape index: {}]  }
   0x1   :  { %9 = vsyncpa [#allocation5], 0  ;;  %s802_s12 = smov [#allocation2]  }
   0x2   :  { %s17_s13 = sshll.u32 %s802_s12, 4  ;;  %s18_s13 = int_to_ptr.vmem [resolvable:$true] %s17_s13 }
   0x3   :  { %s766_s14 = scalar_lea.vmem %s18_s13, 128  ;;  %p771_p1 = scmp.lt.s32.totalorder %s18_s13, %s18_s13 }
   0x4   :  { %p767_p0 = scmp.ne.s32.totalorder %s18_s13, %s766_s14  ;;  %p772_p2 = scmp.lt.s32.totalorder %s766_s14, %s766_s14 }
   0x6   :  { %p773_p3 = por %p772_p2, %p771_p1 }
   0x8   :  { %p774_p4 = pnand %p773_p3, %p767_p0 }
   0xa   :  { %777 = shalt.err (!%p774_p4)
}
   0xb   :  { %s803_s15 = smov 64   ;;  %s804_s16 = smov 4  }
   0xc   :  { %23 = dma.hbm_to_vmem [thread:$0]  %s962_s1, 128, %s18_s13, [#allocation3], %s803_s15, %s803_s15, %s804_s16  }
   0xd   :  { %s805_s19 = smov [#allocation4]  }
   0xe   :  { %s30_s20 = sshll.u32 %s805_s19, 4  ;;  %s31_s20 = int_to_ptr.vmem [resolvable:$true] %s30_s20 }
   0xf   :  { %s786_s21 = scalar_lea.vmem %s31_s20, 16  ;;  %s790_s22 = scalar_lea.vmem %s31_s20, 32 }
  0x10   :  { %p787_p5 = scmp.ne.s32.totalorder %s31_s20, %s786_s21  ;;  %p791_p6 = scmp.lt.s32.totalorder %s31_s20, %s31_s20 }
  0x11   :  { %p792_p7 = scmp.lt.s32.totalorder %s790_s22, %s786_s21 }
  0x13   :  { %p793_p8 = por %p792_p7, %p791_p6 }
  0x15   :  { %p794_p9 = pnand %p793_p8, %p787_p5 }
  0x17   :  { %797 = shalt.err (!%p794_p9)
}
  0x18   :  { %33 = dma.hbm_to_vmem [thread:$0]  %s963_s2, 16, %s31_s20, [#allocation5]  }
  0x19   :  { %798 = dma.done.wait [#allocation3], 128  }
  0x1a   :  { %799 = vsyncadd [#allocation3], 4294967168 }
  0x1b   :  { %800 = dma.done.wait [#allocation5], 16  }
  0x1c   :  { %801 = vsyncadd [#allocation5], 4294967280  ;;  %vm196_vm0 = vcmask 1043456   ;;  %vm197_vm1 = vcmask 1044480   ;;  %v806_v0 = vmov 65535   ;;  %vm153_vm2 = vcmask 72704  }
  0x1d   :  { %v198_v1 = vsel %vm196_vm0, 4294967295, %v806_v0  ;;  %v743_v3 = vld [vmem:[#allocation2] sm:$0x1f]   ;;  %v745_v6 = vld [vmem:[%s961_s0 + $0x8] sm:$0xff]   ;;  %v748_v9 = vld [vmem:[%s961_s0 + $0x10] sm:$0xff]  }
  0x1e   :  { %v199_v2 = vsel %vm197_vm1, %v198_v1, 0  ;;  %v744_v4 = vld [vmem:[%s961_s0] sm:$0xff]   ;;  %v747_v8 = vld [vmem:[%s961_s0 + $0x48] sm:$0xff]   ;;  %v750_v10 = vld [vmem:[%s961_s0 + $0x50] sm:$0xff]  }
  0x1f   :  { %v201_v5 = vand.u32 %v743_v3, %v199_v2  ;;  %708 = vmatprep.mubr.msk.bf16.mxu0 %vm153_vm2, %v744_v4  ;;  %v746_v7 = vld [vmem:[%s961_s0 + $0x40] sm:$0xff]   ;;  %v749_v11 = vld [vmem:[%s961_s0 + $0x18] sm:$0xff]   ;;  %v753_v15 = vld [vmem:[%s961_s0 + $0x28] sm:$0xff]  }
  0x20   :  { %724 = vmatprep.mubr.msk.bf16.mxu1 %vm153_vm2, %v746_v7  ;;  %v751_v12 = vld [vmem:[%s961_s0 + $0x58] sm:$0xff]   ;;  %v752_v13 = vld [vmem:[%s961_s0 + $0x20] sm:$0xff]   ;;  %v755_v16 = vld [vmem:[%s961_s0 + $0x68] sm:$0xff]  }
  0x21   :  { %706 = vmatprep.subr.bf16.mxu0 %v201_v5  ;;  %736 = vmatprep.subr.bf16.mxu1 %v201_v5  ;;  %v754_v14 = vld [vmem:[%s961_s0 + $0x60] sm:$0xff]   ;;  %v756_v17 = vld [vmem:[%s961_s0 + $0x30] sm:$0xff]   ;;  %v757_v18 = vld [vmem:[%s961_s0 + $0x38] sm:$0xff]  }
  0x22   :  { %707 = vmatpush3.bf16.msra.mxu0 %v201_v5  ;;  %737 = vmatpush3.bf16.msra.mxu1 %v201_v5  ;;  %v889_v19 = vld [vmem:[#allocation4] ss:$0 sm:$0xff] }
  0x25   :  { %709 = vmatmul.mubr.msk.bf16.vlgmr.msra.gmra.mxu0 %vm153_vm2, %v745_v6  ;;  %725 = vmatmul.mubr.msk.bf16.vlgmr.msra.gmra.mxu1 %vm153_vm2, %v747_v8 }
  0x26   :  { %712 = vmatprep.mubr.msk.bf16.mxu0 %vm153_vm2, %v748_v9  ;;  %728 = vmatprep.mubr.msk.bf16.mxu1 %vm153_vm2, %v750_v10 }
  0x2d   :  { %713 = vmatmul.mubr.msk.bf16.gmra.mxu0 %vm153_vm2, %v749_v11  ;;  %729 = vmatmul.mubr.msk.bf16.gmra.mxu1 %vm153_vm2, %v751_v12 }
  0x2e   :  { %716 = vmatprep.mubr.msk.bf16.mxu0 %vm153_vm2, %v752_v13  ;;  %732 = vmatprep.mubr.msk.bf16.mxu1 %vm153_vm2, %v754_v14 }
  0x35   :  { %717 = vmatmul.mubr.msk.bf16.gmra.mxu0 %vm153_vm2, %v753_v15  ;;  %733 = vmatmul.mubr.msk.bf16.gmra.mxu1 %vm153_vm2, %v755_v16 }
  0x36   :  { %720 = vmatprep.mubr.msk.bf16.mxu0 %vm153_vm2, %v756_v17 }
  0x3d   :  { %721 = vmatmul.mubr.msk.bf16.gmra.mxu0 %vm153_vm2, %v757_v18 }
  0xe5   :  { %v710_v20 = vpop.f32.mrf.mxu0  ;;  %v726_v21 = vpop.f32.mrf.mxu1 }
  0xe6   :  { %v310_v22 = vadd.f32 %v726_v21, %v889_v19  ;;  %v246_v23 = vadd.f32 %v710_v20, %v889_v19 }
  0xe7   :  { %v237_v24 = vpop.f32.mrf.mxu0  ;;  %v301_v25 = vpop.f32.mrf.mxu1 }
  0xe8   :  { %v302_v27 = vadd.f32 %v889_v19, %v301_v25  ;;  %v238_v29 = vadd.f32 %v889_v19, %v237_v24  ;;  %v366_v30 = vmax.f32 %v310_v22, 0.0  ;;  %v350_v33 = vmax.f32 %v246_v23, 0.0 }
  0xe9   :  { %v711_v26 = vpop.f32.mrf.mxu0  ;;  %v727_v28 = vpop.f32.mrf.mxu1 }
  0xea   :  { %v249_v31 = vadd.f32 %v711_v26, %v889_v19  ;;  %v313_v32 = vadd.f32 %v727_v28, %v889_v19  ;;  %v364_v40 = vmax.f32 %v302_v27, 0.0  ;;  %v348_v43 = vmax.f32 %v238_v29, 0.0 }
  0xeb   :  { %v240_v34 = vpop.f32.mrf.mxu0  ;;  %v304_v35 = vpop.f32.mrf.mxu1 }
  0xec   :  { %v351_v36 = vmax.f32 %v249_v31, 0.0  ;;  %v241_v37 = vadd.f32 %v889_v19, %v240_v34  ;;  %v367_v38 = vmax.f32 %v313_v32, 0.0  ;;  %v305_v39 = vadd.f32 %v889_v19, %v304_v35 }
  0xed   :  { %v714_v41 = vpop.f32.mrf.mxu0  ;;  %v730_v42 = vpop.f32.mrf.mxu1 }
  0xee   :  { %v616_v44 = vpack.c.bf16 %v351_v36, %v350_v33  ;;  %v349_v45 = vmax.f32 %v241_v37, 0.0  ;;  %v656_v46 = vpack.c.bf16 %v367_v38, %v366_v30  ;;  %v262_v47 = vadd.f32 %v714_v41, %v889_v19 }
  0xef   :  { %v365_v48 = vmax.f32 %v305_v39, 0.0  ;;  %v253_v49 = vpop.f32.mrf.mxu0  ;;  %v326_v50 = vadd.f32 %v730_v42, %v889_v19  ;;  %v317_v51 = vpop.f32.mrf.mxu1 }
  0xf0   :  { %678 = vst [vmem:[%s964_s3 + $0x8] sm:$0xff] %v616_v44   ;;  %v611_v52 = vpack.c.bf16 %v349_v45, %v348_v43  ;;  %686 = vst [vmem:[%s964_s3 + $0x48] sm:$0xff] %v656_v46   ;;  %v318_v55 = vadd.f32 %v889_v19, %v317_v51  ;;  %v254_v57 = vadd.f32 %v889_v19, %v253_v49  ;;  %v354_v61 = vmax.f32 %v262_v47, 0.0 }
  0xf1   :  { %v651_v53 = vpack.c.bf16 %v365_v48, %v364_v40  ;;  %v715_v54 = vpop.f32.mrf.mxu0  ;;  %v731_v56 = vpop.f32.mrf.mxu1  ;;  %v370_v58 = vmax.f32 %v326_v50, 0.0 }
  0xf2   :  { %612 = vst [vmem:[%s964_s3] sm:$0xff] %v611_v52   ;;  %v265_v59 = vadd.f32 %v715_v54, %v889_v19  ;;  %v329_v60 = vadd.f32 %v731_v56, %v889_v19  ;;  %v368_v4 = vmax.f32 %v318_v55, 0.0  ;;  %v352_v7 = vmax.f32 %v254_v57, 0.0 }
  0xf3   :  { %685 = vst [vmem:[%s964_s3 + $0x40] sm:$0xff] %v651_v53   ;;  %v256_v62 = vpop.f32.mrf.mxu0  ;;  %v320_v63 = vpop.f32.mrf.mxu1 }
  0xf4   :  { %v355_v0 = vmax.f32 %v265_v59, 0.0  ;;  %v257_v1 = vadd.f32 %v889_v19, %v256_v62  ;;  %v371_v2 = vmax.f32 %v329_v60, 0.0  ;;  %v321_v3 = vadd.f32 %v889_v19, %v320_v63 }
  0xf5   :  { %v718_v5 = vpop.f32.mrf.mxu0  ;;  %v734_v6 = vpop.f32.mrf.mxu1 }
  0xf6   :  { %v626_v8 = vpack.c.bf16 %v355_v0, %v354_v61  ;;  %v353_v9 = vmax.f32 %v257_v1, 0.0  ;;  %v666_v10 = vpack.c.bf16 %v371_v2, %v370_v58  ;;  %v278_v11 = vadd.f32 %v718_v5, %v889_v19 }
  0xf7   :  { %v369_v12 = vmax.f32 %v321_v3, 0.0  ;;  %v269_v13 = vpop.f32.mrf.mxu0  ;;  %v342_v14 = vadd.f32 %v734_v6, %v889_v19  ;;  %v333_v15 = vpop.f32.mrf.mxu1 }
  0xf8   :  { %680 = vst [vmem:[%s964_s3 + $0x18] sm:$0xff] %v626_v8   ;;  %v621_v16 = vpack.c.bf16 %v353_v9, %v352_v7  ;;  %688 = vst [vmem:[%s964_s3 + $0x58] sm:$0xff] %v666_v10   ;;  %v334_v20 = vadd.f32 %v889_v19, %v333_v15  ;;  %v270_v22 = vadd.f32 %v889_v19, %v269_v13  ;;  %v358_v26 = vmax.f32 %v278_v11, 0.0 }
  0xf9   :  { %v661_v17 = vpack.c.bf16 %v369_v12, %v368_v4  ;;  %v719_v18 = vpop.f32.mrf.mxu0  ;;  %v735_v21 = vpop.f32.mrf.mxu1  ;;  %v374_v23 = vmax.f32 %v342_v14, 0.0 }
  0xfa   :  { %679 = vst [vmem:[%s964_s3 + $0x10] sm:$0xff] %v621_v16   ;;  %v281_v24 = vadd.f32 %v719_v18, %v889_v19  ;;  %v345_v25 = vadd.f32 %v735_v21, %v889_v19  ;;  %v372_v33 = vmax.f32 %v334_v20, 0.0  ;;  %v356_v35 = vmax.f32 %v270_v22, 0.0 }
  0xfb   :  { %687 = vst [vmem:[%s964_s3 + $0x50] sm:$0xff] %v661_v17   ;;  %v272_v27 = vpop.f32.mrf.mxu0  ;;  %v336_v28 = vpop.f32.mrf.mxu1 }
  0xfc   :  { %v359_v29 = vmax.f32 %v281_v24, 0.0  ;;  %v273_v30 = vadd.f32 %v889_v19, %v272_v27  ;;  %v375_v31 = vmax.f32 %v345_v25, 0.0  ;;  %v337_v32 = vadd.f32 %v889_v19, %v336_v28 }
  0xfd   :  { %v722_v34 = vpop.f32.mrf.mxu0 }
  0xfe   :  { %v636_v36 = vpack.c.bf16 %v359_v29, %v358_v26  ;;  %v357_v37 = vmax.f32 %v273_v30, 0.0  ;;  %v676_v38 = vpack.c.bf16 %v375_v31, %v374_v23  ;;  %v373_v39 = vmax.f32 %v337_v32, 0.0 }
  0xff   :  { %v285_v40 = vpop.f32.mrf.mxu0  ;;  %v294_v42 = vadd.f32 %v722_v34, %v889_v19 }
 0x100   :  { %682 = vst [vmem:[%s964_s3 + $0x28] sm:$0xff] %v636_v36   ;;  %v631_v41 = vpack.c.bf16 %v357_v37, %v356_v35  ;;  %690 = vst [vmem:[%s964_s3 + $0x68] sm:$0xff] %v676_v38   ;;  %v671_v43 = vpack.c.bf16 %v373_v39, %v372_v33  ;;  %v286_v45 = vadd.f32 %v889_v19, %v285_v40 }
 0x101   :  { %v723_v44 = vpop.f32.mrf.mxu0  ;;  %v362_v48 = vmax.f32 %v294_v42, 0.0 }
 0x102   :  { %681 = vst [vmem:[%s964_s3 + $0x20] sm:$0xff] %v631_v41   ;;  %v297_v46 = vadd.f32 %v723_v44, %v889_v19  ;;  %689 = vst [vmem:[%s964_s3 + $0x60] sm:$0xff] %v671_v43   ;;  %v360_v51 = vmax.f32 %v286_v45, 0.0 }
 0x103   :  { %v288_v47 = vpop.f32.mrf.mxu0 }
 0x104   :  { %v363_v49 = vmax.f32 %v297_v46, 0.0  ;;  %v289_v50 = vadd.f32 %v889_v19, %v288_v47 }
 0x106   :  { %v646_v52 = vpack.c.bf16 %v363_v49, %v362_v48  ;;  %v361_v53 = vmax.f32 %v289_v50, 0.0 }
 0x108   :  { %684 = vst [vmem:[%s964_s3 + $0x38] sm:$0xff] %v646_v52   ;;  %v641_v54 = vpack.c.bf16 %v361_v53, %v360_v51 }
 0x10a   :  { %683 = vst [vmem:[%s964_s3 + $0x30] sm:$0xff] %v641_v54  }
 0x10b   :  { %520 = vsyncpa [#allocation3], 1 }
 0x10c   :  { %521 = vsyncpa [#allocation5], 1 }

// kernel: hsicnn_forward.5
= control target key start
LH: loop header
LB: loop body
LE: loop exit
PB: predicated region body
PF: predicated region fallthrough
CT: control target
= control target key end

     0   :  { %10 = vsyncpa [#allocation4], 0  ;;  %s6998_s0 = inlined_call_operand.vmem [shape: bf16[2,7168], index: 0, kind: input, shape index: {}]   ;;  %s6999_s1 = inlined_call_operand.hbm [shape: bf16[7168,1024], index: 1, kind: input, shape index: {}]   ;;  %s7000_s2 = inlined_call_operand.hbm [shape: f32[1,1024], index: 2, kind: input, shape index: {}]   ;;  %s7001_s3 = inlined_call_operand.hbm [shape: bf16[1024,128], index: 3, kind: input, shape index: {}]   ;;  %s7002_s4 = inlined_call_operand.hbm [shape: f32[1,128], index: 4, kind: input, shape index: {}]   ;;  %s7003_s5 = inlined_call_operand.hbm [shape: f32[2,128], index: 5, kind: output, shape index: {}]  }
   0x1   :  { %12 = vsyncpa [#allocation4 + $0x1], 0 }
   0x2   :  { %13 = vsyncpa [#allocation7], 0 }
   0x3   :  { %14 = vsyncpa [#allocation10], 0 }
   0x4   :  { %15 = vsyncpa [#allocation5], 0  ;;  %s6183_s18 = smov 0   ;;  %s6185_s19 = smov 0  }
   0x5   :  { %s6187_s20 = smov 0   ;;  %s6189_s21 = smov 0  }
   0x6   :  { %s6191_s22 = smov 0   ;;  %s6193_s23 = smov 0  }
   0x7 LB: > { %s5093_s24 = sadd.s32 4294967295, %s6139_s23   ;;  %p81_p0 = scmp.ne.s32.totalorder %s6123_s19, %s6119_s18  ;;  %s6139_s23 = sphi %s6193_s23, %s21_s23   ;;  %s6135_s22 = sphi %s6191_s22, %s7021_s22   ;;  %s6131_s21 = sphi %s6189_s21, %s7020_s21   ;;  %s6127_s20 = sphi %s6187_s20, %s7019_s20   ;;  %s6123_s19 = sphi %s6185_s19, %s7018_s19   ;;  %s6119_s18 = sphi %s6183_s18, %s7017_s18  }
   0x8   : > { %p6215_p1 = scmp.eq.s32.totalorder %s5093_s24, 0  ;;  %p5094_p2 = scmp.ge.s32.totalorder %s6139_s23, 1 }
   0x9   : > { %p181_p3 = scmp.lt.s32.totalorder %s6139_s23, 8  ;;  %s6141_s28 = smov [#allocation6]  }
   0xa   : > { %s7008_s25 = scalar_select %p6215_p1, 1, 0 }
   0xb   : > { %p6223_p4 = por %p6215_p1, %p81_p0  ;;  %p6227_p5 = pnand %p5094_p2, %p181_p3 }
   0xc   : > { %s194_s29 = sshll.u32 %s6141_s28, 4  ;;  %s6142_s30 = smov [#allocation8]   ;;  %s195_s29 = int_to_ptr.vmem [resolvable:$true] %s194_s29 }
   0xd   : > { %s7009_s26 = scalar_select %p6223_p4, 1, 0 }
   0xe   : > { %s7010_s27 = scalar_select %p6227_p5, 1, 0 }
   0xf   : > { %p5800_p6 = pneg %p6227_p5  ;;  %s204_s6 = sshll.u32 %s6142_s30, 4  ;;  %s205_s6 = int_to_ptr.vmem [resolvable:$true] %s204_s6 }
  0x10   : > { %s6143_s8 = smov [#allocation9]   ;;  %s5958_s10 = scalar_lea.vmem %s195_s29, 128 }
  0x11   : > { %p6235_p7 = pnand %p5800_p6, %p6215_p1  ;;  %s218_s9 = sshll.u32 %s6143_s8, 4  ;;  %s219_s9 = int_to_ptr.vmem [resolvable:$true] %s218_s9 }
  0x12   : > { %p5959_p9 = scmp.ne.s32.totalorder %s195_s29, %s5958_s10  ;;  %p5966_p12 = scmp.lt.s32.totalorder %s195_s29, %s195_s29 }
  0x13   : > { %p5949_p8 = pneg %p6235_p7  ;;  %p5967_p13 = scmp.lt.s32.totalorder %s5958_s10, %s5958_s10 }
  0x15   : > { %p5961_p10 = pnand %p5959_p9, %p5949_p8  ;;  %p5968_p0 = por %p5967_p13, %p5966_p12 }
  0x17   : > { %p5962_p11 = pneg %p5961_p10 }
  0x19   : > { %p5969_p2 = pnand %p5968_p0, %p5962_p11 }
  0x1b   : > { %5972 = shalt.err (!%p5969_p2)
}
  0x1c   : > { %5803 = dma.hbm_to_vmem [thread:$0]  (!%p6235_p7), %s7000_s2, 128, %s195_s29, [#allocation7]  }
  0x1d   : > { %s5984_s13 = scalar_lea.vmem %s205_s6, 8192  ;;  %p5992_p9 = scmp.lt.s32.totalorder %s205_s6, %s205_s6 }
  0x1e   : > { %p5985_p3 = scmp.ne.s32.totalorder %s205_s6, %s5984_s13  ;;  %p5993_p10 = scmp.lt.s32.totalorder %s5984_s13, %s5984_s13 }
  0x20   : > { %p5987_p6 = pnand %p5985_p3, %p5949_p8  ;;  %p5994_p4 = por %p5993_p10, %p5992_p9 }
  0x22   : > { %p5988_p1 = pneg %p5987_p6 }
  0x24   : > { %p5995_p5 = pnand %p5994_p4, %p5988_p1 }
  0x26   : > { %5998 = shalt.err (!%p5995_p5)
}
  0x27   : > { %s6144_s14 = smov 64   ;;  %s6145_s15 = smov 4  }
  0x28   : > { %5806 = dma.hbm_to_vmem [thread:$0]  (!%p6235_p7), %s7001_s3, 8192, %s205_s6, [#allocation7], %s6144_s14, %s6144_s14, %s6145_s15  }
  0x29   : > { %s6010_s18 = scalar_lea.vmem %s219_s9, 16  ;;  %s6017_s28 = scalar_lea.vmem %s219_s9, 32 }
  0x2a   : > { %p6011_p11 = scmp.ne.s32.totalorder %s219_s9, %s6010_s18  ;;  %p6018_p0 = scmp.lt.s32.totalorder %s219_s9, %s219_s9 }
  0x2b   : > { %p6019_p1 = scmp.lt.s32.totalorder %s6017_s28, %s6010_s18 }
  0x2c   : > { %p6013_p12 = pnand %p6011_p11, %p5949_p8 }
  0x2d   : > { %p6020_p4 = por %p6019_p1, %p6018_p0 }
  0x2e   : > { %p6014_p13 = pneg %p6013_p12 }
  0x30   : > { %p6021_p5 = pnand %p6020_p4, %p6014_p13 }
  0x32   : > { %6024 = shalt.err (!%p6021_p5)
}
  0x33   : > { %5809 = dma.hbm_to_vmem [thread:$0]  (!%p6235_p7), %s7002_s4, 16, %s219_s9, [#allocation10]  }
  0x34   : > { %s68_s6 = sadd.s32 1, %s6127_s20  ;;  %s30_s8 = sadd.s32 1, %s6135_s22 }
  0x35   : > { %p75_p8 = scmp.ne.s32.totalorder %s6127_s20, %s6123_s19  ;;  %p31_p2 = scmp.ge.s32.totalorder %s30_s8, 7 }
  0x36   : > { %p76_p3 = scmp.eq.s32.totalorder %s6139_s23, 0  ;;  %p5817_p6 = scmp.lt.s32.totalorder %s6139_s23, 7 }
  0x37   : > { %s241_s7 = sand.u32 1, %s6127_s20   ;;  %s7023_s8 = smov (%p31_p2, %s30_s8), 0 }
  0x38   : > { %p77_p9 = por %p76_p3, %p75_p8  ;;  %s65_s10 = ssub.s32 %s6135_s22, %s7023_s8 }
  0x39   : > { %s5099_s11 = sshll.u32 %s241_s7, 12  ;;  %p66_p10 = scmp.eq.s32.totalorder %s65_s10, 0 }
  0x3a   : > { %s5693_s12 = sshll.u32 %s6135_s22, 16  ;;  %s245_s13 = scalar_lea.vmem [#allocation3], %s5099_s11 }
  0x3b   : > { %s253_s14 = sshll.u32 %s245_s13, 4  ;;  %s252_s17 = scalar_lea.hbm %s6999_s1, %s5693_s12  ;;  %s254_s14 = int_to_ptr.vmem [resolvable:$true] %s253_s14 }
  0x3c   : > { %s6278_s9 = scalar_select %p66_p10, %s6127_s20, %s68_s6  }
  0x3d   : > { %p6285_p7 = pnand %p5817_p6, %p77_p9  ;;  %s242_s28 = scalar_lea.sflag [#allocation4], %s241_s7 }
  0x3e   : > { %s6038_s29 = scalar_lea.vmem %s254_s14, 65536  ;;  %s6146_s30 = smov [#allocation3]  }
  0x3f   : > { %p6027_p11 = pneg %p6285_p7  ;;  %p6039_p12 = scmp.ne.s32.totalorder %s254_s14, %s6038_s29 }
  0x40   : > { %s6043_s6 = sshll.u32 %s6146_s30, 4  ;;  %s6044_s6 = int_to_ptr.vmem [resolvable:$false] %s6043_s6 }
  0x41   : > { %p6041_p13 = pnand %p6039_p12, %p6027_p11  ;;  %s6045_s10 = scalar_lea.vmem %s6044_s6, 131072 }
  0x42   : > { %p6046_p1 = scmp.lt.s32.totalorder %s254_s14, %s6044_s6  ;;  %p6047_p4 = scmp.lt.s32.totalorder %s6045_s10, %s6038_s29 }
  0x43   : > { %p6042_p0 = pneg %p6041_p13 }
  0x44   : > { %p6048_p5 = por %p6047_p4, %p6046_p1 }
  0x46   : > { %p6049_p8 = pnand %p6048_p5, %p6042_p0 }
  0x48   : > { %6052 = shalt.err (!%p6049_p8)
}
  0x49   : > { %s6147_s11 = smov 512   ;;  %s6148_s12 = smov 32  }
  0x4a   : > { %5813 = dma.hbm_to_vmem [thread:$0]  (!%p6285_p7), %s252_s17, 65536, %s254_s14, %s242_s28, %s6147_s11, %s6147_s11, %s6148_s12  }
  0x4b   : > { %p7013_p2 = scmp.ne.s32.totalorder %s7010_s27, 0 }
  0x4c   : > { %s267_s7 = sand.u32 (!%p7013_p2), 1, %s6123_s19   ;;  %p7014_p3 = scmp.ne.s32.totalorder (!%p7013_p2), %s7009_s26, 0 }
  0x4d   : > { %265 = sbr.rel (%p7013_p2) target bundleno = 1104 (0x450), region = 40  ;;  %s5104_s13 = sshll.u32 (!%p7013_p2), %s267_s7, 12 }
  0x4e   : > { %s268_s15 = scalar_lea.sflag (!%p7013_p2), [#allocation4], %s267_s7  ;;  %s6296_s16 = scalar_lea.vmem (!%p7013_p2), [#allocation3], %s5104_s13 }
  0x52   : > { %6102 = dma.done.wait (%p7014_p3), %s268_s15, 65536  }
  0x53   : > { %6104 = vsyncadd (%p7014_p3), %s268_s15, 4294901760  ;;  %p7015_p6 = scmp.ne.s32.totalorder %s7008_s25, 0 }
  0x55   : > { %6106 = dma.done.wait (%p7015_p6), [#allocation7], 8320  }
  0x56   : > { %6108 = vsyncadd (%p7015_p6), [#allocation7], 4294958976 }
  0x57   : > { %6110 = dma.done.wait (%p7015_p6), [#allocation10], 16  }
  0x58   : > { %6112 = vsyncadd (%p7015_p6), [#allocation10], 4294967280  ;;  %s5108_s27 = sshll.u32 %s6131_s21, 3  ;;  %p5109_p10 = scmp.ne.s32.totalorder %s6131_s21, 0 }
  0x59   : > { %p316_p9 = scmp.lt.s32.totalorder %s5108_s27, 55 }
  0x5a   : > { %327 = sbr.rel (%p5109_p10) target bundleno = 97 (0x61), region = 60 }
  0x5b   : > { %s7025_s27 = smov (!%p316_p9, %s5108_s27), 55 }
  0x5c   : > { %s320_s17 = scalar_lea.vmem %s6998_s0, %s7025_s27 }
  0x5f   : > { %v6149_v0 = vmov 0.0  }
  0x60   : > { %328 = vst [vmem:[#allocation2] sm:$0xff] %v6149_v0  ;;  %329 = vst [vmem:[#allocation2 + $0x8] sm:$0xff] %v6149_v0 }
  0x61 PF: > { %v389_v1 = vld [vmem:[%s6296_s16 + $0x1c0] sm:$0xff]  ;;  %v6150_v33 = vmov 1966171168   ;;  %v850_v35 = vlaneseq  ;;  %v332_v60 = vld [vmem:[%s320_s17] sm:$0xff]  ;;  %p5622_p7 = scmp.ne.s32.totalorder %s6131_s21, 6 }
  0x62   : > { %v393_v2 = vld [vmem:[%s6296_s16 + $0x1e0] sm:$0xff]  ;;  %v848_v34 = vunpack.c.l.s4 %v6150_v33 }
  0x63   : > { %v517_v3 = vld [vmem:[%s6296_s16 + $0x5c0] sm:$0xff]  ;;  %v5167_v4 = vcombine.high %v389_v1, %v393_v2  ;;  %v5166_v6 = vcombine.low %v389_v1, %v393_v2  ;;  %v6340_v45 = vshrl.u32 %v850_v35, 7 }
  0x64   : > { %v521_v5 = vld [vmem:[%s6296_s16 + $0x5e0] sm:$0xff]  ;;  %v849_v44 = vunpack.c.0.s8 %v848_v34 }
  0x65   : > { %v381_v7 = vld [vmem:[%s6296_s16 + $0x180] sm:$0xff]  ;;  %v5295_v9 = vcombine.high %v517_v3, %v521_v5  ;;  %v5294_v10 = vcombine.low %v517_v3, %v521_v5  ;;  %3463 = vmatprep.subr.bf16.mxu0 %v5167_v4 }
  0x66   : > { %v385_v8 = vld [vmem:[%s6296_s16 + $0x1a0] sm:$0xff]  ;;  %3464 = vmatpush1.bf16.msra.mxu0 %v5166_v6  ;;  %v6347_v54 = vsub.s32 %v849_v44, %v6340_v45 }
  0x67   : > { %v5159_v11 = vcombine.high %v381_v7, %v385_v8  ;;  %v509_v12 = vld [vmem:[%s6296_s16 + $0x580] sm:$0xff]  ;;  %3504 = vmatprep.subr.bf16.mxu1 %v5295_v9  ;;  %v5158_v19 = vcombine.low %v381_v7, %v385_v8 }
  0x68   : > { %v513_v13 = vld [vmem:[%s6296_s16 + $0x5a0] sm:$0xff]  ;;  %3505 = vmatpush1.bf16.msra.mxu1 %v5294_v10  ;;  %v6359_v0 = vrot.slane %v332_v60, %v6347_v54 }
  0x69   : > { %v373_v14 = vld [vmem:[%s6296_s16 + $0x140] sm:$0xff]  ;;  %v5287_v15 = vcombine.high %v509_v12, %v513_v13  ;;  %3465 = vmatprep.subr.bf16.mxu0 %v5159_v11  ;;  %v5286_v20 = vcombine.low %v509_v12, %v513_v13 }
  0x6a   : > { %v377_v16 = vld [vmem:[%s6296_s16 + $0x160] sm:$0xff]  ;;  %3466 = vmatpush1.bf16.msra.mxu0 %v5158_v19  ;;  %v861_v4 = vcombine.high %v6359_v0, %v6359_v0 }
  0x6b   : > { %v501_v17 = vld [vmem:[%s6296_s16 + $0x540] sm:$0xff]  ;;  %v5151_v21 = vcombine.high %v373_v14, %v377_v16  ;;  %3506 = vmatprep.subr.bf16.mxu1 %v5287_v15  ;;  %v5150_v27 = vcombine.low %v373_v14, %v377_v16 }
  0x6c   : > { %v505_v18 = vld [vmem:[%s6296_s16 + $0x560] sm:$0xff]  ;;  %3507 = vmatpush1.bf16.msra.mxu1 %v5286_v20  ;;  %v6368_v10 = vrot.slane %v861_v4, %v6347_v54  ;;  %v846_v20 = vcombine.high %v332_v60, %v332_v60 }
  0x6d   : > { %v5279_v22 = vcombine.high %v501_v17, %v505_v18  ;;  %v365_v23 = vld [vmem:[%s6296_s16 + $0x100] sm:$0xff]  ;;  %3467 = vmatprep.subr.bf16.mxu0 %v5151_v21  ;;  %v5278_v28 = vcombine.low %v501_v17, %v505_v18 }
  0x6e   : > { %v369_v24 = vld [vmem:[%s6296_s16 + $0x120] sm:$0xff]  ;;  %3468 = vmatpush1.bf16.msra.mxu0 %v5150_v27  ;;  %3495 = vmatprep.mubr.bf16.mxu0 %v6368_v10  ;;  %v6375_v14 = vcombine.high %v6368_v10, %v6368_v10 }
  0x6f   : > { %v493_v25 = vld [vmem:[%s6296_s16 + $0x500] sm:$0xff]  ;;  %v5143_v29 = vcombine.high %v365_v23, %v369_v24  ;;  %3508 = vmatprep.subr.bf16.mxu1 %v5279_v22  ;;  %v5142_v38 = vcombine.low %v365_v23, %v369_v24 }
  0x70   : > { %v497_v26 = vld [vmem:[%s6296_s16 + $0x520] sm:$0xff]  ;;  %3509 = vmatpush1.bf16.msra.mxu1 %v5278_v28  ;;  %3536 = vmatprep.mubr.bf16.mxu1 %v6375_v14 }
  0x71   : > { %v5271_v30 = vcombine.high %v493_v25, %v497_v26  ;;  %v357_v31 = vld [vmem:[%s6296_s16 + $0xc0] sm:$0xff]  ;;  %3469 = vmatprep.subr.bf16.mxu0 %v5143_v29  ;;  %v5270_v39 = vcombine.low %v493_v25, %v497_v26  ;;  %v6385_v29 = vrot.slane %v846_v20, %v6347_v54 }
  0x72   : > { %v361_v32 = vld [vmem:[%s6296_s16 + $0xe0] sm:$0xff]  ;;  %3470 = vmatpush1.bf16.msra.mxu0 %v5142_v38 }
  0x73   : > { %v485_v36 = vld [vmem:[%s6296_s16 + $0x4c0] sm:$0xff]  ;;  %v5135_v40 = vcombine.high %v357_v31, %v361_v32  ;;  %3510 = vmatprep.subr.bf16.mxu1 %v5271_v30  ;;  %v5134_v48 = vcombine.low %v357_v31, %v361_v32  ;;  %v6391_v33 = vrot.slane %v6385_v29, %v6347_v54 }
  0x74   : > { %v489_v37 = vld [vmem:[%s6296_s16 + $0x4e0] sm:$0xff]  ;;  %3511 = vmatpush1.bf16.msra.mxu1 %v5270_v39 }
  0x75   : > { %v5263_v41 = vcombine.high %v485_v36, %v489_v37  ;;  %v349_v42 = vld [vmem:[%s6296_s16 + $0x80] sm:$0xff]  ;;  %3471 = vmatprep.subr.bf16.mxu0 %v5135_v40  ;;  %v5262_v49 = vcombine.low %v485_v36, %v489_v37 }
  0x76   : > { %v353_v43 = vld [vmem:[%s6296_s16 + $0xa0] sm:$0xff]  ;;  %3472 = vmatpush1.bf16.msra.mxu0 %v5134_v48 }
  0x77   : > { %v477_v46 = vld [vmem:[%s6296_s16 + $0x480] sm:$0xff]  ;;  %v5127_v50 = vcombine.high %v349_v42, %v353_v43  ;;  %3512 = vmatprep.subr.bf16.mxu1 %v5263_v41  ;;  %v5126_v57 = vcombine.low %v349_v42, %v353_v43 }
  0x78   : > { %v481_v47 = vld [vmem:[%s6296_s16 + $0x4a0] sm:$0xff]  ;;  %3513 = vmatpush1.bf16.msra.mxu1 %v5262_v49 }
  0x79   : > { %v5255_v51 = vcombine.high %v477_v46, %v481_v47  ;;  %v341_v52 = vld [vmem:[%s6296_s16 + $0x40] sm:$0xff]  ;;  %3473 = vmatprep.subr.bf16.mxu0 %v5127_v50  ;;  %v5254_v58 = vcombine.low %v477_v46, %v481_v47 }
  0x7a   : > { %v345_v53 = vld [vmem:[%s6296_s16 + $0x60] sm:$0xff]  ;;  %3474 = vmatpush1.bf16.msra.mxu0 %v5126_v57 }
  0x7b   : > { %v469_v55 = vld [vmem:[%s6296_s16 + $0x440] sm:$0xff]  ;;  %v5119_v59 = vcombine.high %v341_v52, %v345_v53  ;;  %3514 = vmatprep.subr.bf16.mxu1 %v5255_v51  ;;  %v5118_v3 = vcombine.low %v341_v52, %v345_v53 }
  0x7c   : > { %v473_v56 = vld [vmem:[%s6296_s16 + $0x460] sm:$0xff]  ;;  %3515 = vmatpush1.bf16.msra.mxu1 %v5254_v58 }
  0x7d   : > { %v5247_v61 = vcombine.high %v469_v55, %v473_v56  ;;  %v333_v62 = vld [vmem:[%s6296_s16] sm:$0xff]  ;;  %3475 = vmatprep.subr.bf16.mxu0 %v5119_v59  ;;  %v5246_v5 = vcombine.low %v469_v55, %v473_v56 }
  0x7e   : > { %v337_v63 = vld [vmem:[%s6296_s16 + $0x20] sm:$0xff]  ;;  %3476 = vmatpush1.bf16.msra.mxu0 %v5118_v3 }
  0x7f   : > { %v461_v1 = vld [vmem:[%s6296_s16 + $0x400] sm:$0xff]  ;;  %v5111_v6 = vcombine.high %v333_v62, %v337_v63  ;;  %3516 = vmatprep.subr.bf16.mxu1 %v5247_v61  ;;  %v5110_v13 = vcombine.low %v333_v62, %v337_v63 }
  0x80   : > { %v465_v2 = vld [vmem:[%s6296_s16 + $0x420] sm:$0xff]  ;;  %3517 = vmatpush1.bf16.msra.mxu1 %v5246_v5 }
  0x81   : > { %v5239_v7 = vcombine.high %v461_v1, %v465_v2  ;;  %v453_v8 = vld [vmem:[%s6296_s16 + $0x3c0] sm:$0xff]  ;;  %3477 = vmatprep.subr.bf16.mxu0 %v5111_v6  ;;  %v5238_v15 = vcombine.low %v461_v1, %v465_v2 }
  0x82   : > { %v457_v9 = vld [vmem:[%s6296_s16 + $0x3e0] sm:$0xff]  ;;  %3478 = vmatpush1.bf16.msra.mxu0 %v5110_v13 }
  0x83   : > { %v581_v11 = vld [vmem:[%s6296_s16 + $0x7c0] sm:$0xff]  ;;  %v5231_v16 = vcombine.high %v453_v8, %v457_v9  ;;  %3518 = vmatprep.subr.bf16.mxu1 %v5239_v7  ;;  %v5230_v23 = vcombine.low %v453_v8, %v457_v9 }
  0x84   : > { %v585_v12 = vld [vmem:[%s6296_s16 + $0x7e0] sm:$0xff]  ;;  %3519 = vmatpush1.bf16.msra.mxu1 %v5238_v15 }
  0x85   : > { %v5359_v17 = vcombine.high %v581_v11, %v585_v12  ;;  %v445_v18 = vld [vmem:[%s6296_s16 + $0x380] sm:$0xff]  ;;  %3479 = vmatprep.subr.bf16.mxu0 %v5231_v16  ;;  %v5358_v24 = vcombine.low %v581_v11, %v585_v12 }
  0x86   : > { %v449_v19 = vld [vmem:[%s6296_s16 + $0x3a0] sm:$0xff]  ;;  %3480 = vmatpush2.bf16.msra.mxu0 %v5230_v23 }
  0x87   : > { %v573_v21 = vld [vmem:[%s6296_s16 + $0x780] sm:$0xff]  ;;  %v5223_v25 = vcombine.high %v445_v18, %v449_v19  ;;  %3520 = vmatprep.subr.bf16.mxu1 %v5359_v17  ;;  %v5222_v32 = vcombine.low %v445_v18, %v449_v19 }
  0x88   : > { %v577_v22 = vld [vmem:[%s6296_s16 + $0x7a0] sm:$0xff]  ;;  %3521 = vmatpush2.bf16.msra.mxu1 %v5358_v24  ;;  %v6421_v24 = vrot.slane %v6359_v0, %v6347_v54 }
  0x89   : > { %v5351_v26 = vcombine.high %v573_v21, %v577_v22  ;;  %v437_v27 = vld [vmem:[%s6296_s16 + $0x340] sm:$0xff]  ;;  %3481 = vmatprep.subr.bf16.mxu0 %v5223_v25  ;;  %v5350_v34 = vcombine.low %v573_v21, %v577_v22  ;;  %v862_v22 = vcombine.high %v6385_v29, %v6385_v29 }
  0x8a   : > { %v441_v28 = vld [vmem:[%s6296_s16 + $0x360] sm:$0xff]  ;;  %3482 = vmatpush2.bf16.msra.mxu0 %v5222_v32  ;;  %v6432_v0 = vcombine.high %v6421_v24, %v6421_v24 }
  0x8b   : > { %v565_v30 = vld [vmem:[%s6296_s16 + $0x740] sm:$0xff]  ;;  %v5215_v35 = vcombine.high %v437_v27, %v441_v28  ;;  %3522 = vmatprep.subr.bf16.mxu1 %v5351_v26  ;;  %v5214_v41 = vcombine.low %v437_v27, %v441_v28  ;;  %v6428_v32 = vrot.slane %v862_v22, %v6347_v54 }
  0x8c   : > { %v569_v31 = vld [vmem:[%s6296_s16 + $0x760] sm:$0xff]  ;;  %3523 = vmatpush2.bf16.msra.mxu1 %v5350_v34 }
  0x8d   : > { %v5343_v36 = vcombine.high %v565_v30, %v569_v31  ;;  %v429_v37 = vld [vmem:[%s6296_s16 + $0x300] sm:$0xff]  ;;  %3483 = vmatprep.subr.bf16.mxu0 %v5215_v35  ;;  %v5342_v42 = vcombine.low %v565_v30, %v569_v31 }
  0x8e   : > { %v433_v38 = vld [vmem:[%s6296_s16 + $0x320] sm:$0xff]  ;;  %3484 = vmatpush2.bf16.msra.mxu0 %v5214_v41  ;;  %v6441_v41 = vcombine.high %v6428_v32, %v6428_v32 }
  0x8f   : > { %v557_v39 = vld [vmem:[%s6296_s16 + $0x700] sm:$0xff]  ;;  %v5207_v43 = vcombine.high %v429_v37, %v433_v38  ;;  %3524 = vmatprep.subr.bf16.mxu1 %v5343_v36  ;;  %v5206_v50 = vcombine.low %v429_v37, %v433_v38 }
  0x90   : > { %v561_v40 = vld [vmem:[%s6296_s16 + $0x720] sm:$0xff]  ;;  %3525 = vmatpush2.bf16.msra.mxu1 %v5342_v42 }
  0x91   : > { %v5335_v44 = vcombine.high %v557_v39, %v561_v40  ;;  %v421_v46 = vld [vmem:[%s6296_s16 + $0x2c0] sm:$0xff]  ;;  %3485 = vmatprep.subr.bf16.mxu0 %v5207_v43  ;;  %v5334_v51 = vcombine.low %v557_v39, %v561_v40 }
  0x92   : > { %v425_v47 = vld [vmem:[%s6296_s16 + $0x2e0] sm:$0xff]  ;;  %3486 = vmatpush2.bf16.msra.mxu0 %v5206_v50 }
  0x93   : > { %v549_v48 = vld [vmem:[%s6296_s16 + $0x6c0] sm:$0xff]  ;;  %v5199_v52 = vcombine.high %v421_v46, %v425_v47  ;;  %3526 = vmatprep.subr.bf16.mxu1 %v5335_v44  ;;  %v5198_v59 = vcombine.low %v421_v46, %v425_v47 }
  0x94   : > { %v553_v49 = vld [vmem:[%s6296_s16 + $0x6e0] sm:$0xff]  ;;  %3527 = vmatpush2.bf16.msra.mxu1 %v5334_v51 }
  0x95   : > { %v5327_v53 = vcombine.high %v549_v48, %v553_v49  ;;  %v413_v55 = vld [vmem:[%s6296_s16 + $0x280] sm:$0xff]  ;;  %3487 = vmatprep.subr.bf16.mxu0 %v5199_v52  ;;  %v5326_v60 = vcombine.low %v549_v48, %v553_v49 }
  0x96   : > { %v417_v56 = vld [vmem:[%s6296_s16 + $0x2a0] sm:$0xff]  ;;  %3488 = vmatpush2.bf16.msra.mxu0 %v5198_v59 }
  0x97   : > { %v541_v57 = vld [vmem:[%s6296_s16 + $0x680] sm:$0xff]  ;;  %v5191_v61 = vcombine.high %v413_v55, %v417_v56  ;;  %3528 = vmatprep.subr.bf16.mxu1 %v5327_v53  ;;  %v5190_v4 = vcombine.low %v413_v55, %v417_v56 }
  0x98   : > { %v545_v58 = vld [vmem:[%s6296_s16 + $0x6a0] sm:$0xff]  ;;  %3529 = vmatpush2.bf16.msra.mxu1 %v5326_v60 }
  0x99   : > { %v5319_v62 = vcombine.high %v541_v57, %v545_v58  ;;  %v405_v63 = vld [vmem:[%s6296_s16 + $0x240] sm:$0xff]  ;;  %3489 = vmatprep.subr.bf16.mxu0 %v5191_v61  ;;  %v5318_v5 = vcombine.low %v541_v57, %v545_v58 }
  0x9a   : > { %v409_v1 = vld [vmem:[%s6296_s16 + $0x260] sm:$0xff]  ;;  %3490 = vmatpush2.bf16.msra.mxu0 %v5190_v4 }
  0x9b   : > { %v533_v2 = vld [vmem:[%s6296_s16 + $0x640] sm:$0xff]  ;;  %v5183_v6 = vcombine.high %v405_v63, %v409_v1  ;;  %3530 = vmatprep.subr.bf16.mxu1 %v5319_v62  ;;  %v5182_v13 = vcombine.low %v405_v63, %v409_v1 }
  0x9c   : > { %v537_v3 = vld [vmem:[%s6296_s16 + $0x660] sm:$0xff]  ;;  %3531 = vmatpush2.bf16.msra.mxu1 %v5318_v5 }
  0x9d   : > { %v5311_v7 = vcombine.high %v533_v2, %v537_v3  ;;  %v397_v8 = vld [vmem:[%s6296_s16 + $0x200] sm:$0xff]  ;;  %3491 = vmatprep.subr.bf16.mxu0 %v5183_v6  ;;  %v5310_v15 = vcombine.low %v533_v2, %v537_v3 }
  0x9e   : > { %v401_v9 = vld [vmem:[%s6296_s16 + $0x220] sm:$0xff]  ;;  %3492 = vmatpush2.bf16.msra.mxu0 %v5182_v13 }
  0x9f   : > { %v525_v11 = vld [vmem:[%s6296_s16 + $0x600] sm:$0xff]  ;;  %v5175_v16 = vcombine.high %v397_v8, %v401_v9  ;;  %3532 = vmatprep.subr.bf16.mxu1 %v5311_v7  ;;  %v5174_v23 = vcombine.low %v397_v8, %v401_v9 }
  0xa0   : > { %v529_v12 = vld [vmem:[%s6296_s16 + $0x620] sm:$0xff]  ;;  %3533 = vmatpush2.bf16.msra.mxu1 %v5310_v15 }
  0xa1   : > { %v5303_v17 = vcombine.high %v525_v11, %v529_v12  ;;  %v645_v18 = vld [vmem:[%s6296_s16 + $0x9c0] sm:$0xff]  ;;  %3493 = vmatprep.subr.bf16.mxu0 %v5175_v16  ;;  %v5302_v25 = vcombine.low %v525_v11, %v529_v12 }
  0xa2   : > { %v649_v19 = vld [vmem:[%s6296_s16 + $0x9e0] sm:$0xff]  ;;  %3494 = vmatpush2.bf16.msra.mxu0 %v5174_v23 }
  0xa3   : > { %v773_v20 = vld [vmem:[%s6296_s16 + $0xdc0] sm:$0xff]  ;;  %v5423_v26 = vcombine.high %v645_v18, %v649_v19  ;;  %3534 = vmatprep.subr.bf16.mxu1 %v5303_v17  ;;  %v5422_v34 = vcombine.low %v645_v18, %v649_v19 }
  0xa4   : > { %v777_v21 = vld [vmem:[%s6296_s16 + $0xde0] sm:$0xff]  ;;  %3535 = vmatpush2.bf16.msra.mxu1 %v5302_v25 }
  0xa5   : > { %v5551_v27 = vcombine.high %v773_v20, %v777_v21  ;;  %v637_v28 = vld [vmem:[%s6296_s16 + $0x980] sm:$0xff]  ;;  %3545 = vmatprep.subr.bf16.mxu0 %v5423_v26  ;;  %v5550_v35 = vcombine.low %v773_v20, %v777_v21  ;;  %3496 = vmatmul.mubr.bf16.vlgmr.msra.gmra.mxu0 %v6421_v24 }
  0xa6   : > { %v641_v30 = vld [vmem:[%s6296_s16 + $0x9a0] sm:$0xff]  ;;  %3546 = vmatpush1.bf16.msra.mxu0 %v5422_v34  ;;  %3577 = vmatprep.mubr.bf16.mxu0 %v6428_v32 }
  0xa7   : > { %v765_v31 = vld [vmem:[%s6296_s16 + $0xd80] sm:$0xff]  ;;  %v5415_v36 = vcombine.high %v637_v28, %v641_v30  ;;  %3586 = vmatprep.subr.bf16.mxu1 %v5551_v27  ;;  %3537 = vmatmul.mubr.bf16.vlgmr.msra.gmra.mxu1 %v6432_v0  ;;  %v5414_v42 = vcombine.low %v637_v28, %v641_v30 }
  0xa8   : > { %v769_v29 = vld [vmem:[%s6296_s16 + $0xda0] sm:$0xff]  ;;  %3587 = vmatpush1.bf16.msra.mxu1 %v5550_v35  ;;  %3618 = vmatprep.mubr.bf16.mxu1 %v6441_v41 }
  0xa9   : > { %v5543_v37 = vcombine.high %v765_v31, %v769_v29  ;;  %v629_v38 = vld [vmem:[%s6296_s16 + $0x940] sm:$0xff]  ;;  %3547 = vmatprep.subr.bf16.mxu0 %v5415_v36  ;;  %v5542_v43 = vcombine.low %v765_v31, %v769_v29 }
  0xaa   : > { %v633_v39 = vld [vmem:[%s6296_s16 + $0x960] sm:$0xff]  ;;  %3548 = vmatpush1.bf16.msra.mxu0 %v5414_v42 }
  0xab   : > { %v757_v54 = vld [vmem:[%s6296_s16 + $0xd40] sm:$0xff]  ;;  %v5407_v44 = vcombine.high %v629_v38, %v633_v39  ;;  %3588 = vmatprep.subr.bf16.mxu1 %v5543_v37  ;;  %v5406_v51 = vcombine.low %v629_v38, %v633_v39 }
  0xac   : > { %v761_v40 = vld [vmem:[%s6296_s16 + $0xd60] sm:$0xff]  ;;  %3589 = vmatpush1.bf16.msra.mxu1 %v5542_v43 }
  0xad   : > { %v5535_v46 = vcombine.high %v757_v54, %v761_v40  ;;  %v621_v47 = vld [vmem:[%s6296_s16 + $0x900] sm:$0xff]  ;;  %3549 = vmatprep.subr.bf16.mxu0 %v5407_v44  ;;  %v5534_v52 = vcombine.low %v757_v54, %v761_v40 }
  0xae   : > { %v625_v48 = vld [vmem:[%s6296_s16 + $0x920] sm:$0xff]  ;;  %3550 = vmatpush1.bf16.msra.mxu0 %v5406_v51 }
  0xaf   : > { %v749_v49 = vld [vmem:[%s6296_s16 + $0xd00] sm:$0xff]  ;;  %v5399_v53 = vcombine.high %v621_v47, %v625_v48  ;;  %3590 = vmatprep.subr.bf16.mxu1 %v5535_v46  ;;  %v5398_v60 = vcombine.low %v621_v47, %v625_v48 }
  0xb0   : > { %v753_v50 = vld [vmem:[%s6296_s16 + $0xd20] sm:$0xff]  ;;  %3591 = vmatpush1.bf16.msra.mxu1 %v5534_v52 }
  0xb1   : > { %v5527_v55 = vcombine.high %v749_v49, %v753_v50  ;;  %v613_v56 = vld [vmem:[%s6296_s16 + $0x8c0] sm:$0xff]  ;;  %3551 = vmatprep.subr.bf16.mxu0 %v5399_v53  ;;  %v5526_v61 = vcombine.low %v749_v49, %v753_v50 }
  0xb2   : > { %v617_v57 = vld [vmem:[%s6296_s16 + $0x8e0] sm:$0xff]  ;;  %3552 = vmatpush1.bf16.msra.mxu0 %v5398_v60 }
  0xb3   : > { %v741_v58 = vld [vmem:[%s6296_s16 + $0xcc0] sm:$0xff]  ;;  %v5391_v62 = vcombine.high %v613_v56, %v617_v57  ;;  %3592 = vmatprep.subr.bf16.mxu1 %v5527_v55  ;;  %v5390_v5 = vcombine.low %v613_v56, %v617_v57 }
  0xb4   : > { %v745_v59 = vld [vmem:[%s6296_s16 + $0xce0] sm:$0xff]  ;;  %3593 = vmatpush1.bf16.msra.mxu1 %v5526_v61 }
  0xb5   : > { %v5519_v63 = vcombine.high %v741_v58, %v745_v59  ;;  %v605_v1 = vld [vmem:[%s6296_s16 + $0x880] sm:$0xff]  ;;  %3553 = vmatprep.subr.bf16.mxu0 %v5391_v62  ;;  %v5518_v6 = vcombine.low %v741_v58, %v745_v59 }
  0xb6   : > { %v609_v2 = vld [vmem:[%s6296_s16 + $0x8a0] sm:$0xff]  ;;  %3554 = vmatpush1.bf16.msra.mxu0 %v5390_v5 }
  0xb7   : > { %v733_v3 = vld [vmem:[%s6296_s16 + $0xc80] sm:$0xff]  ;;  %v5383_v7 = vcombine.high %v605_v1, %v609_v2  ;;  %3594 = vmatprep.subr.bf16.mxu1 %v5519_v63  ;;  %v5382_v15 = vcombine.low %v605_v1, %v609_v2 }
  0xb8   : > { %v737_v4 = vld [vmem:[%s6296_s16 + $0xca0] sm:$0xff]  ;;  %3595 = vmatpush1.bf16.msra.mxu1 %v5518_v6 }
  0xb9   : > { %v5511_v8 = vcombine.high %v733_v3, %v737_v4  ;;  %v597_v9 = vld [vmem:[%s6296_s16 + $0x840] sm:$0xff]  ;;  %3555 = vmatprep.subr.bf16.mxu0 %v5383_v7  ;;  %v5510_v16 = vcombine.low %v733_v3, %v737_v4 }
  0xba   : > { %v601_v11 = vld [vmem:[%s6296_s16 + $0x860] sm:$0xff]  ;;  %3556 = vmatpush1.bf16.msra.mxu0 %v5382_v15 }
  0xbb   : > { %v725_v12 = vld [vmem:[%s6296_s16 + $0xc40] sm:$0xff]  ;;  %v5375_v17 = vcombine.high %v597_v9, %v601_v11  ;;  %3596 = vmatprep.subr.bf16.mxu1 %v5511_v8  ;;  %v5374_v23 = vcombine.low %v597_v9, %v601_v11 }
  0xbc   : > { %v729_v13 = vld [vmem:[%s6296_s16 + $0xc60] sm:$0xff]  ;;  %3597 = vmatpush1.bf16.msra.mxu1 %v5510_v16 }
  0xbd   : > { %v5503_v18 = vcombine.high %v725_v12, %v729_v13  ;;  %v589_v19 = vld [vmem:[%s6296_s16 + $0x800] sm:$0xff]  ;;  %3557 = vmatprep.subr.bf16.mxu0 %v5375_v17  ;;  %v5502_v25 = vcombine.low %v725_v12, %v729_v13 }
  0xbe   : > { %v593_v20 = vld [vmem:[%s6296_s16 + $0x820] sm:$0xff]  ;;  %3558 = vmatpush1.bf16.msra.mxu0 %v5374_v23 }
  0xbf   : > { %v717_v21 = vld [vmem:[%s6296_s16 + $0xc00] sm:$0xff]  ;;  %v5367_v26 = vcombine.high %v589_v19, %v593_v20  ;;  %3598 = vmatprep.subr.bf16.mxu1 %v5503_v18  ;;  %v5366_v34 = vcombine.low %v589_v19, %v593_v20 }
  0xc0   : > { %v721_v22 = vld [vmem:[%s6296_s16 + $0xc20] sm:$0xff]  ;;  %3599 = vmatpush1.bf16.msra.mxu1 %v5502_v25 }
  0xc1   : > { %v5495_v27 = vcombine.high %v717_v21, %v721_v22  ;;  %v709_v28 = vld [vmem:[%s6296_s16 + $0xbc0] sm:$0xff]  ;;  %3559 = vmatprep.subr.bf16.mxu0 %v5367_v26  ;;  %v5494_v35 = vcombine.low %v717_v21, %v721_v22 }
  0xc2   : > { %v713_v30 = vld [vmem:[%s6296_s16 + $0xbe0] sm:$0xff]  ;;  %3560 = vmatpush1.bf16.msra.mxu0 %v5366_v34 }
  0xc3   : > { %v837_v31 = vld [vmem:[%s6296_s16 + $0xfc0] sm:$0xff]  ;;  %v5487_v36 = vcombine.high %v709_v28, %v713_v30  ;;  %3600 = vmatprep.subr.bf16.mxu1 %v5495_v27  ;;  %v5486_v42 = vcombine.low %v709_v28, %v713_v30 }
  0xc4   : > { %v841_v29 = vld [vmem:[%s6296_s16 + $0xfe0] sm:$0xff]  ;;  %3601 = vmatpush1.bf16.msra.mxu1 %v5494_v35 }
  0xc5   : > { %v5615_v37 = vcombine.high %v837_v31, %v841_v29  ;;  %v701_v38 = vld [vmem:[%s6296_s16 + $0xb80] sm:$0xff]  ;;  %3561 = vmatprep.subr.bf16.mxu0 %v5487_v36  ;;  %v5614_v43 = vcombine.low %v837_v31, %v841_v29 }
  0xc6   : > { %v705_v39 = vld [vmem:[%s6296_s16 + $0xba0] sm:$0xff]  ;;  %3562 = vmatpush2.bf16.msra.mxu0 %v5486_v42 }
  0xc7   : > { %v829_v54 = vld [vmem:[%s6296_s16 + $0xf80] sm:$0xff]  ;;  %v5479_v44 = vcombine.high %v701_v38, %v705_v39  ;;  %3602 = vmatprep.subr.bf16.mxu1 %v5615_v37  ;;  %v5478_v51 = vcombine.low %v701_v38, %v705_v39  ;;  %v390_v38 = vld [vmem:[%s6296_s16 + $0x1c8] sm:$0xff] }
  0xc8   : > { %v833_v40 = vld [vmem:[%s6296_s16 + $0xfa0] sm:$0xff]  ;;  %3603 = vmatpush2.bf16.msra.mxu1 %v5614_v43  ;;  %v394_v39 = vld [vmem:[%s6296_s16 + $0x1e8] sm:$0xff] }
  0xc9   : > { %v5607_v46 = vcombine.high %v829_v54, %v833_v40  ;;  %v693_v47 = vld [vmem:[%s6296_s16 + $0xb40] sm:$0xff]  ;;  %3563 = vmatprep.subr.bf16.mxu0 %v5479_v44  ;;  %v5606_v52 = vcombine.low %v829_v54, %v833_v40  ;;  %v518_v54 = vld [vmem:[%s6296_s16 + $0x5c8] sm:$0xff]  ;;  %v5169_v44 = vcombine.high %v390_v38, %v394_v39 }
  0xca   : > { %v697_v48 = vld [vmem:[%s6296_s16 + $0xb60] sm:$0xff]  ;;  %3564 = vmatpush2.bf16.msra.mxu0 %v5478_v51  ;;  %v522_v40 = vld [vmem:[%s6296_s16 + $0x5e8] sm:$0xff]  ;;  %v6508_v51 = vcombine.high %v6391_v33, %v6391_v33 }
  0xcb   : > { %v821_v49 = vld [vmem:[%s6296_s16 + $0xf40] sm:$0xff]  ;;  %v5471_v53 = vcombine.high %v693_v47, %v697_v48  ;;  %3604 = vmatprep.subr.bf16.mxu1 %v5607_v46  ;;  %v5470_v60 = vcombine.low %v693_v47, %v697_v48  ;;  %v5297_v46 = vcombine.high %v518_v54, %v522_v40  ;;  %v382_v47 = vld [vmem:[%s6296_s16 + $0x188] sm:$0xff] }
  0xcc   : > { %v825_v50 = vld [vmem:[%s6296_s16 + $0xf60] sm:$0xff]  ;;  %3605 = vmatpush2.bf16.msra.mxu1 %v5606_v52  ;;  %v386_v48 = vld [vmem:[%s6296_s16 + $0x1a8] sm:$0xff]  ;;  %v5168_v52 = vcombine.low %v390_v38, %v394_v39 }
  0xcd   : > { %v5599_v55 = vcombine.high %v821_v49, %v825_v50  ;;  %v685_v56 = vld [vmem:[%s6296_s16 + $0xb00] sm:$0xff]  ;;  %3565 = vmatprep.subr.bf16.mxu0 %v5471_v53  ;;  %v5598_v61 = vcombine.low %v821_v49, %v825_v50  ;;  %v510_v49 = vld [vmem:[%s6296_s16 + $0x588] sm:$0xff]  ;;  %v5296_v53 = vcombine.low %v518_v54, %v522_v40 }
  0xce   : > { %v689_v57 = vld [vmem:[%s6296_s16 + $0xb20] sm:$0xff]  ;;  %3566 = vmatpush2.bf16.msra.mxu0 %v5470_v60  ;;  %v514_v50 = vld [vmem:[%s6296_s16 + $0x5a8] sm:$0xff] }
  0xcf   : > { %v813_v58 = vld [vmem:[%s6296_s16 + $0xf00] sm:$0xff]  ;;  %v5463_v62 = vcombine.high %v685_v56, %v689_v57  ;;  %3606 = vmatprep.subr.bf16.mxu1 %v5599_v55  ;;  %v5462_v5 = vcombine.low %v685_v56, %v689_v57  ;;  %v5161_v55 = vcombine.high %v382_v47, %v386_v48  ;;  %v5289_v56 = vcombine.high %v510_v49, %v514_v50  ;;  %v374_v57 = vld [vmem:[%s6296_s16 + $0x148] sm:$0xff] }
  0xd0   : > { %v817_v59 = vld [vmem:[%s6296_s16 + $0xf20] sm:$0xff]  ;;  %3607 = vmatpush2.bf16.msra.mxu1 %v5598_v61  ;;  %v506_v60 = vld [vmem:[%s6296_s16 + $0x568] sm:$0xff]  ;;  %v5160_v61 = vcombine.low %v382_v47, %v386_v48 }
  0xd1   : > { %v5591_v63 = vcombine.high %v813_v58, %v817_v59  ;;  %v677_v1 = vld [vmem:[%s6296_s16 + $0xac0] sm:$0xff]  ;;  %3567 = vmatprep.subr.bf16.mxu0 %v5463_v62  ;;  %v5590_v6 = vcombine.low %v813_v58, %v817_v59  ;;  %v378_v58 = vld [vmem:[%s6296_s16 + $0x168] sm:$0xff]  ;;  %v5288_v62 = vcombine.low %v510_v49, %v514_v50 }
  0xd2   : > { %v681_v2 = vld [vmem:[%s6296_s16 + $0xae0] sm:$0xff]  ;;  %3568 = vmatpush2.bf16.msra.mxu0 %v5462_v5  ;;  %v502_v59 = vld [vmem:[%s6296_s16 + $0x548] sm:$0xff] }
  0xd3   : > { %v805_v3 = vld [vmem:[%s6296_s16 + $0xec0] sm:$0xff]  ;;  %v5455_v7 = vcombine.high %v677_v1, %v681_v2  ;;  %3608 = vmatprep.subr.bf16.mxu1 %v5591_v63  ;;  %v5454_v15 = vcombine.low %v677_v1, %v681_v2  ;;  %v5153_v63 = vcombine.high %v374_v57, %v378_v58  ;;  %v5281_v1 = vcombine.high %v502_v59, %v506_v60  ;;  %v366_v2 = vld [vmem:[%s6296_s16 + $0x108] sm:$0xff] }
  0xd4   : > { %v809_v4 = vld [vmem:[%s6296_s16 + $0xee0] sm:$0xff]  ;;  %3609 = vmatpush2.bf16.msra.mxu1 %v5590_v6  ;;  %v498_v5 = vld [vmem:[%s6296_s16 + $0x528] sm:$0xff]  ;;  %v5152_v6 = vcombine.low %v374_v57, %v378_v58 }
  0xd5   : > { %v5583_v8 = vcombine.high %v805_v3, %v809_v4  ;;  %v669_v9 = vld [vmem:[%s6296_s16 + $0xa80] sm:$0xff]  ;;  %3569 = vmatprep.subr.bf16.mxu0 %v5455_v7  ;;  %v5582_v16 = vcombine.low %v805_v3, %v809_v4  ;;  %v370_v3 = vld [vmem:[%s6296_s16 + $0x128] sm:$0xff]  ;;  %v5280_v7 = vcombine.low %v502_v59, %v506_v60 }
  0xd6   : > { %v673_v11 = vld [vmem:[%s6296_s16 + $0xaa0] sm:$0xff]  ;;  %3570 = vmatpush2.bf16.msra.mxu0 %v5454_v15  ;;  %v494_v4 = vld [vmem:[%s6296_s16 + $0x508] sm:$0xff] }
  0xd7   : > { %v797_v12 = vld [vmem:[%s6296_s16 + $0xe80] sm:$0xff]  ;;  %v5447_v17 = vcombine.high %v669_v9, %v673_v11  ;;  %3610 = vmatprep.subr.bf16.mxu1 %v5583_v8  ;;  %v5446_v23 = vcombine.low %v669_v9, %v673_v11  ;;  %v5145_v8 = vcombine.high %v366_v2, %v370_v3  ;;  %v5273_v9 = vcombine.high %v494_v4, %v498_v5  ;;  %v358_v11 = vld [vmem:[%s6296_s16 + $0xc8] sm:$0xff] }
  0xd8   : > { %v801_v13 = vld [vmem:[%s6296_s16 + $0xea0] sm:$0xff]  ;;  %3611 = vmatpush2.bf16.msra.mxu1 %v5582_v16  ;;  %v490_v15 = vld [vmem:[%s6296_s16 + $0x4e8] sm:$0xff]  ;;  %v5144_v16 = vcombine.low %v366_v2, %v370_v3 }
  0xd9   : > { %v5575_v18 = vcombine.high %v797_v12, %v801_v13  ;;  %v661_v19 = vld [vmem:[%s6296_s16 + $0xa40] sm:$0xff]  ;;  %3571 = vmatprep.subr.bf16.mxu0 %v5447_v17  ;;  %v5574_v25 = vcombine.low %v797_v12, %v801_v13  ;;  %v362_v12 = vld [vmem:[%s6296_s16 + $0xe8] sm:$0xff]  ;;  %v5272_v17 = vcombine.low %v494_v4, %v498_v5 }
  0xda   : > { %v665_v20 = vld [vmem:[%s6296_s16 + $0xa60] sm:$0xff]  ;;  %3572 = vmatpush2.bf16.msra.mxu0 %v5446_v23  ;;  %v486_v13 = vld [vmem:[%s6296_s16 + $0x4c8] sm:$0xff] }
  0xdb   : > { %v789_v21 = vld [vmem:[%s6296_s16 + $0xe40] sm:$0xff]  ;;  %v5439_v26 = vcombine.high %v661_v19, %v665_v20  ;;  %3612 = vmatprep.subr.bf16.mxu1 %v5575_v18  ;;  %v5438_v34 = vcombine.low %v661_v19, %v665_v20  ;;  %v5137_v18 = vcombine.high %v358_v11, %v362_v12  ;;  %v5265_v19 = vcombine.high %v486_v13, %v490_v15  ;;  %v350_v20 = vld [vmem:[%s6296_s16 + $0x88] sm:$0xff] }
  0xdc   : > { %v793_v22 = vld [vmem:[%s6296_s16 + $0xe60] sm:$0xff]  ;;  %3613 = vmatpush2.bf16.msra.mxu1 %v5574_v25  ;;  %v482_v23 = vld [vmem:[%s6296_s16 + $0x4a8] sm:$0xff]  ;;  %v5136_v25 = vcombine.low %v358_v11, %v362_v12 }
  0xdd   : > { %v5567_v27 = vcombine.high %v789_v21, %v793_v22  ;;  %v653_v28 = vld [vmem:[%s6296_s16 + $0xa00] sm:$0xff]  ;;  %3573 = vmatprep.subr.bf16.mxu0 %v5439_v26  ;;  %v5566_v35 = vcombine.low %v789_v21, %v793_v22  ;;  %v354_v21 = vld [vmem:[%s6296_s16 + $0xa8] sm:$0xff]  ;;  %v5264_v26 = vcombine.low %v486_v13, %v490_v15 }
  0xde   : > { %v657_v30 = vld [vmem:[%s6296_s16 + $0xa20] sm:$0xff]  ;;  %3574 = vmatpush2.bf16.msra.mxu0 %v5438_v34  ;;  %v478_v22 = vld [vmem:[%s6296_s16 + $0x488] sm:$0xff] }
  0xdf   : > { %v781_v31 = vld [vmem:[%s6296_s16 + $0xe00] sm:$0xff]  ;;  %v5431_v36 = vcombine.high %v653_v28, %v657_v30  ;;  %3614 = vmatprep.subr.bf16.mxu1 %v5567_v27  ;;  %v5430_v42 = vcombine.low %v653_v28, %v657_v30  ;;  %v5129_v27 = vcombine.high %v350_v20, %v354_v21  ;;  %v5257_v28 = vcombine.high %v478_v22, %v482_v23  ;;  %v342_v30 = vld [vmem:[%s6296_s16 + $0x48] sm:$0xff] }
  0xe0   : > { %v785_v29 = vld [vmem:[%s6296_s16 + $0xe20] sm:$0xff]  ;;  %3615 = vmatpush2.bf16.msra.mxu1 %v5566_v35  ;;  %v474_v34 = vld [vmem:[%s6296_s16 + $0x468] sm:$0xff]  ;;  %v5128_v35 = vcombine.low %v350_v20, %v354_v21 }
  0xe1   : > { %v5559_v37 = vcombine.high %v781_v31, %v785_v29  ;;  %3575 = vmatprep.subr.bf16.mxu0 %v5431_v36  ;;  %v5558_v43 = vcombine.low %v781_v31, %v785_v29  ;;  %v346_v31 = vld [vmem:[%s6296_s16 + $0x68] sm:$0xff]  ;;  %v5256_v36 = vcombine.low %v478_v22, %v482_v23 }
  0xe2   : > { %3576 = vmatpush2.bf16.msra.mxu0 %v5430_v42  ;;  %v470_v29 = vld [vmem:[%s6296_s16 + $0x448] sm:$0xff] }
  0xe3   : > { %3616 = vmatprep.subr.bf16.mxu1 %v5559_v37  ;;  %3627 = vmatprep.subr.bf16.mxu0 %v5169_v44  ;;  %v5121_v37 = vcombine.high %v342_v30, %v346_v31  ;;  %v5249_v38 = vcombine.high %v470_v29, %v474_v34  ;;  %v334_v39 = vld [vmem:[%s6296_s16 + $0x8] sm:$0xff]  ;;  %v5248_v44 = vcombine.low %v470_v29, %v474_v34 }
  0xe4   : > { %3617 = vmatpush2.bf16.msra.mxu1 %v5558_v43  ;;  %v338_v54 = vld [vmem:[%s6296_s16 + $0x28] sm:$0xff]  ;;  %v5120_v43 = vcombine.low %v342_v30, %v346_v31 }
  0xe5   : > { %3668 = vmatprep.subr.bf16.mxu1 %v5297_v46  ;;  %3578 = vmatmul.mubr.bf16.vlgmr.msra.gmra.mxu0 %v6391_v33  ;;  %v462_v40 = vld [vmem:[%s6296_s16 + $0x408] sm:$0xff]  ;;  %v5113_v46 = vcombine.high %v334_v39, %v338_v54 }
  0xe6   : > { %3628 = vmatpush1.bf16.msra.mxu0 %v5168_v52  ;;  %3659 = vmatprep.mubr.bf16.mxu0 %v6368_v10  ;;  %v466_v42 = vld [vmem:[%s6296_s16 + $0x428] sm:$0xff] }
  0xe7   : > { %3619 = vmatmul.mubr.bf16.vlgmr.msra.gmra.mxu1 %v6508_v51  ;;  %3629 = vmatprep.subr.bf16.mxu0 %v5161_v55  ;;  %v5241_v47 = vcombine.high %v462_v40, %v466_v42  ;;  %v454_v48 = vld [vmem:[%s6296_s16 + $0x3c8] sm:$0xff]  ;;  %v5240_v55 = vcombine.low %v462_v40, %v466_v42 }
  0xe8   : > { %3669 = vmatpush1.bf16.msra.mxu1 %v5296_v53  ;;  %3700 = vmatprep.mubr.bf16.mxu1 %v6375_v14  ;;  %v458_v49 = vld [vmem:[%s6296_s16 + $0x3e8] sm:$0xff]  ;;  %v5112_v53 = vcombine.low %v334_v39, %v338_v54 }
  0xe9   : > { %3670 = vmatprep.subr.bf16.mxu1 %v5289_v56  ;;  %v582_v50 = vld [vmem:[%s6296_s16 + $0x7c8] sm:$0xff]  ;;  %v5233_v56 = vcombine.high %v454_v48, %v458_v49 }
  0xea   : > { %3630 = vmatpush1.bf16.msra.mxu0 %v5160_v61  ;;  %v586_v52 = vld [vmem:[%s6296_s16 + $0x7e8] sm:$0xff] }
  0xeb   : > { %3631 = vmatprep.subr.bf16.mxu0 %v5153_v63  ;;  %v5361_v57 = vcombine.high %v582_v50, %v586_v52  ;;  %v446_v58 = vld [vmem:[%s6296_s16 + $0x388] sm:$0xff]  ;;  %v5360_v63 = vcombine.low %v582_v50, %v586_v52 }
  0xec   : > { %3671 = vmatpush1.bf16.msra.mxu1 %v5288_v62  ;;  %v450_v59 = vld [vmem:[%s6296_s16 + $0x3a8] sm:$0xff]  ;;  %v5232_v62 = vcombine.low %v454_v48, %v458_v49 }
  0xed   : > { %3672 = vmatprep.subr.bf16.mxu1 %v5281_v1  ;;  %v574_v60 = vld [vmem:[%s6296_s16 + $0x788] sm:$0xff]  ;;  %v5225_v1 = vcombine.high %v446_v58, %v450_v59 }
  0xee   : > { %3632 = vmatpush1.bf16.msra.mxu0 %v5152_v6  ;;  %v578_v61 = vld [vmem:[%s6296_s16 + $0x7a8] sm:$0xff] }
  0xef   : > { %3633 = vmatprep.subr.bf16.mxu0 %v5145_v8  ;;  %v5353_v2 = vcombine.high %v574_v60, %v578_v61  ;;  %v438_v3 = vld [vmem:[%s6296_s16 + $0x348] sm:$0xff]  ;;  %v5352_v8 = vcombine.low %v574_v60, %v578_v61 }
  0xf0   : > { %3673 = vmatpush1.bf16.msra.mxu1 %v5280_v7  ;;  %v442_v4 = vld [vmem:[%s6296_s16 + $0x368] sm:$0xff]  ;;  %v5224_v7 = vcombine.low %v446_v58, %v450_v59 }
  0xf1   : > { %3674 = vmatprep.subr.bf16.mxu1 %v5273_v9  ;;  %v566_v5 = vld [vmem:[%s6296_s16 + $0x748] sm:$0xff]  ;;  %v5217_v9 = vcombine.high %v438_v3, %v442_v4 }
  0xf2   : > { %3634 = vmatpush1.bf16.msra.mxu0 %v5144_v16  ;;  %v570_v6 = vld [vmem:[%s6296_s16 + $0x768] sm:$0xff] }
  0xf3   : > { %3635 = vmatprep.subr.bf16.mxu0 %v5137_v18  ;;  %v5345_v11 = vcombine.high %v566_v5, %v570_v6  ;;  %v430_v12 = vld [vmem:[%s6296_s16 + $0x308] sm:$0xff]  ;;  %v5344_v18 = vcombine.low %v566_v5, %v570_v6 }
  0xf4   : > { %3675 = vmatpush1.bf16.msra.mxu1 %v5272_v17  ;;  %v434_v13 = vld [vmem:[%s6296_s16 + $0x328] sm:$0xff]  ;;  %v5216_v17 = vcombine.low %v438_v3, %v442_v4 }
  0xf5   : > { %3676 = vmatprep.subr.bf16.mxu1 %v5265_v19  ;;  %v558_v15 = vld [vmem:[%s6296_s16 + $0x708] sm:$0xff]  ;;  %v5209_v19 = vcombine.high %v430_v12, %v434_v13 }
  0xf6   : > { %3636 = vmatpush1.bf16.msra.mxu0 %v5136_v25  ;;  %v562_v16 = vld [vmem:[%s6296_s16 + $0x728] sm:$0xff] }
  0xf7   : > { %3637 = vmatprep.subr.bf16.mxu0 %v5129_v27  ;;  %v5337_v20 = vcombine.high %v558_v15, %v562_v16  ;;  %v422_v21 = vld [vmem:[%s6296_s16 + $0x2c8] sm:$0xff]  ;;  %v5336_v27 = vcombine.low %v558_v15, %v562_v16 }
  0xf8   : > { %3677 = vmatpush1.bf16.msra.mxu1 %v5264_v26  ;;  %v426_v22 = vld [vmem:[%s6296_s16 + $0x2e8] sm:$0xff]  ;;  %v5208_v26 = vcombine.low %v430_v12, %v434_v13 }
  0xf9   : > { %3678 = vmatprep.subr.bf16.mxu1 %v5257_v28  ;;  %v550_v23 = vld [vmem:[%s6296_s16 + $0x6c8] sm:$0xff]  ;;  %v5201_v28 = vcombine.high %v422_v21, %v426_v22 }
  0xfa   : > { %3638 = vmatpush1.bf16.msra.mxu0 %v5128_v35  ;;  %v554_v25 = vld [vmem:[%s6296_s16 + $0x6e8] sm:$0xff] }
  0xfb   : > { %3639 = vmatprep.subr.bf16.mxu0 %v5121_v37  ;;  %v5329_v30 = vcombine.high %v550_v23, %v554_v25  ;;  %v414_v31 = vld [vmem:[%s6296_s16 + $0x288] sm:$0xff]  ;;  %v5328_v37 = vcombine.low %v550_v23, %v554_v25 }
  0xfc   : > { %3679 = vmatpush1.bf16.msra.mxu1 %v5256_v36  ;;  %v418_v29 = vld [vmem:[%s6296_s16 + $0x2a8] sm:$0xff]  ;;  %v5200_v36 = vcombine.low %v422_v21, %v426_v22 }
  0xfd   : > { %3680 = vmatprep.subr.bf16.mxu1 %v5249_v38  ;;  %v542_v34 = vld [vmem:[%s6296_s16 + $0x688] sm:$0xff]  ;;  %v5193_v38 = vcombine.high %v414_v31, %v418_v29 }
  0xfe   : > { %3640 = vmatpush1.bf16.msra.mxu0 %v5120_v43  ;;  %v546_v35 = vld [vmem:[%s6296_s16 + $0x6a8] sm:$0xff] }
  0xff   : > { %3641 = vmatprep.subr.bf16.mxu0 %v5113_v46  ;;  %v5321_v39 = vcombine.high %v542_v34, %v546_v35  ;;  %v406_v54 = vld [vmem:[%s6296_s16 + $0x248] sm:$0xff]  ;;  %v5320_v46 = vcombine.low %v542_v34, %v546_v35 }
 0x100   : > { %3681 = vmatpush1.bf16.msra.mxu1 %v5248_v44  ;;  %v410_v40 = vld [vmem:[%s6296_s16 + $0x268] sm:$0xff]  ;;  %v5192_v44 = vcombine.low %v414_v31, %v418_v29 }
 0x101   : > { %3682 = vmatprep.subr.bf16.mxu1 %v5241_v47  ;;  %v534_v42 = vld [vmem:[%s6296_s16 + $0x648] sm:$0xff]  ;;  %v5185_v47 = vcombine.high %v406_v54, %v410_v40 }
 0x102   : > { %3642 = vmatpush1.bf16.msra.mxu0 %v5112_v53  ;;  %v538_v43 = vld [vmem:[%s6296_s16 + $0x668] sm:$0xff] }
 0x103   : > { %3643 = vmatprep.subr.bf16.mxu0 %v5233_v56  ;;  %v5313_v48 = vcombine.high %v534_v42, %v538_v43  ;;  %v398_v49 = vld [vmem:[%s6296_s16 + $0x208] sm:$0xff]  ;;  %v5312_v56 = vcombine.low %v534_v42, %v538_v43 }
 0x104   : > { %3683 = vmatpush1.bf16.msra.mxu1 %v5240_v55  ;;  %v402_v50 = vld [vmem:[%s6296_s16 + $0x228] sm:$0xff]  ;;  %v5184_v55 = vcombine.low %v406_v54, %v410_v40 }
 0x105   : > { %3684 = vmatprep.subr.bf16.mxu1 %v5361_v57  ;;  %v526_v52 = vld [vmem:[%s6296_s16 + $0x608] sm:$0xff]  ;;  %v5177_v57 = vcombine.high %v398_v49, %v402_v50 }
 0x106   : > { %3644 = vmatpush2.bf16.msra.mxu0 %v5232_v62  ;;  %v530_v53 = vld [vmem:[%s6296_s16 + $0x628] sm:$0xff] }
 0x107   : > { %3645 = vmatprep.subr.bf16.mxu0 %v5225_v1  ;;  %v5305_v58 = vcombine.high %v526_v52, %v530_v53  ;;  %v646_v59 = vld [vmem:[%s6296_s16 + $0x9c8] sm:$0xff]  ;;  %v5304_v1 = vcombine.low %v526_v52, %v530_v53 }
 0x108   : > { %3685 = vmatpush2.bf16.msra.mxu1 %v5360_v63  ;;  %v650_v60 = vld [vmem:[%s6296_s16 + $0x9e8] sm:$0xff]  ;;  %v5176_v63 = vcombine.low %v398_v49, %v402_v50 }
 0x109   : > { %3686 = vmatprep.subr.bf16.mxu1 %v5353_v2  ;;  %v774_v61 = vld [vmem:[%s6296_s16 + $0xdc8] sm:$0xff]  ;;  %v5425_v2 = vcombine.high %v646_v59, %v650_v60 }
 0x10a   : > { %3646 = vmatpush2.bf16.msra.mxu0 %v5224_v7  ;;  %v778_v62 = vld [vmem:[%s6296_s16 + $0xde8] sm:$0xff] }
 0x10b   : > { %3647 = vmatprep.subr.bf16.mxu0 %v5217_v9  ;;  %v5553_v3 = vcombine.high %v774_v61, %v778_v62  ;;  %v638_v4 = vld [vmem:[%s6296_s16 + $0x988] sm:$0xff]  ;;  %v5552_v9 = vcombine.low %v774_v61, %v778_v62 }
 0x10c   : > { %3687 = vmatpush2.bf16.msra.mxu1 %v5352_v8  ;;  %v642_v5 = vld [vmem:[%s6296_s16 + $0x9a8] sm:$0xff]  ;;  %v5424_v8 = vcombine.low %v646_v59, %v650_v60 }
 0x10d   : > { %3688 = vmatprep.subr.bf16.mxu1 %v5345_v11  ;;  %v766_v6 = vld [vmem:[%s6296_s16 + $0xd88] sm:$0xff]  ;;  %v5417_v11 = vcombine.high %v638_v4, %v642_v5 }
 0x10e   : > { %3648 = vmatpush2.bf16.msra.mxu0 %v5216_v17  ;;  %v770_v7 = vld [vmem:[%s6296_s16 + $0xda8] sm:$0xff] }
 0x10f   : > { %3649 = vmatprep.subr.bf16.mxu0 %v5209_v19  ;;  %v5545_v12 = vcombine.high %v766_v6, %v770_v7  ;;  %v630_v13 = vld [vmem:[%s6296_s16 + $0x948] sm:$0xff]  ;;  %v5544_v19 = vcombine.low %v766_v6, %v770_v7 }
 0x110   : > { %3689 = vmatpush2.bf16.msra.mxu1 %v5344_v18  ;;  %v634_v15 = vld [vmem:[%s6296_s16 + $0x968] sm:$0xff]  ;;  %v5416_v18 = vcombine.low %v638_v4, %v642_v5 }
 0x111   : > { %3690 = vmatprep.subr.bf16.mxu1 %v5337_v20  ;;  %v758_v16 = vld [vmem:[%s6296_s16 + $0xd48] sm:$0xff]  ;;  %v5409_v20 = vcombine.high %v630_v13, %v634_v15 }
 0x112   : > { %3650 = vmatpush2.bf16.msra.mxu0 %v5208_v26  ;;  %v762_v17 = vld [vmem:[%s6296_s16 + $0xd68] sm:$0xff] }
 0x113   : > { %3651 = vmatprep.subr.bf16.mxu0 %v5201_v28  ;;  %v5537_v21 = vcombine.high %v758_v16, %v762_v17  ;;  %v622_v22 = vld [vmem:[%s6296_s16 + $0x908] sm:$0xff]  ;;  %v5536_v28 = vcombine.low %v758_v16, %v762_v17 }
 0x114   : > { %3691 = vmatpush2.bf16.msra.mxu1 %v5336_v27  ;;  %v626_v23 = vld [vmem:[%s6296_s16 + $0x928] sm:$0xff]  ;;  %v5408_v27 = vcombine.low %v630_v13, %v634_v15 }
 0x115   : > { %3692 = vmatprep.subr.bf16.mxu1 %v5329_v30  ;;  %v750_v25 = vld [vmem:[%s6296_s16 + $0xd08] sm:$0xff]  ;;  %v5401_v30 = vcombine.high %v622_v22, %v626_v23 }
 0x116   : > { %3652 = vmatpush2.bf16.msra.mxu0 %v5200_v36  ;;  %v754_v26 = vld [vmem:[%s6296_s16 + $0xd28] sm:$0xff] }
 0x117   : > { %3653 = vmatprep.subr.bf16.mxu0 %v5193_v38  ;;  %v5529_v31 = vcombine.high %v750_v25, %v754_v26  ;;  %v614_v29 = vld [vmem:[%s6296_s16 + $0x8c8] sm:$0xff]  ;;  %v5528_v38 = vcombine.low %v750_v25, %v754_v26 }
 0x118   : > { %3693 = vmatpush2.bf16.msra.mxu1 %v5328_v37  ;;  %v618_v34 = vld [vmem:[%s6296_s16 + $0x8e8] sm:$0xff]  ;;  %v5400_v37 = vcombine.low %v622_v22, %v626_v23 }
 0x119   : > { %3694 = vmatprep.subr.bf16.mxu1 %v5321_v39  ;;  %v742_v35 = vld [vmem:[%s6296_s16 + $0xcc8] sm:$0xff]  ;;  %v5393_v39 = vcombine.high %v614_v29, %v618_v34 }
 0x11a   : > { %3654 = vmatpush2.bf16.msra.mxu0 %v5192_v44  ;;  %v746_v36 = vld [vmem:[%s6296_s16 + $0xce8] sm:$0xff] }
 0x11b   : > { %3655 = vmatprep.subr.bf16.mxu0 %v5185_v47  ;;  %v5521_v54 = vcombine.high %v742_v35, %v746_v36  ;;  %v606_v40 = vld [vmem:[%s6296_s16 + $0x888] sm:$0xff]  ;;  %v5520_v47 = vcombine.low %v742_v35, %v746_v36 }
 0x11c   : > { %3695 = vmatpush2.bf16.msra.mxu1 %v5320_v46  ;;  %v610_v42 = vld [vmem:[%s6296_s16 + $0x8a8] sm:$0xff]  ;;  %v5392_v46 = vcombine.low %v614_v29, %v618_v34 }
 0x11d   : > { %3696 = vmatprep.subr.bf16.mxu1 %v5313_v48  ;;  %v734_v43 = vld [vmem:[%s6296_s16 + $0xc88] sm:$0xff]  ;;  %v5385_v48 = vcombine.high %v606_v40, %v610_v42 }
 0x11e   : > { %3656 = vmatpush2.bf16.msra.mxu0 %v5184_v55  ;;  %v738_v44 = vld [vmem:[%s6296_s16 + $0xca8] sm:$0xff] }
 0x11f   : > { %3657 = vmatprep.subr.bf16.mxu0 %v5177_v57  ;;  %v5513_v49 = vcombine.high %v734_v43, %v738_v44  ;;  %v598_v50 = vld [vmem:[%s6296_s16 + $0x848] sm:$0xff]  ;;  %v5512_v57 = vcombine.low %v734_v43, %v738_v44 }
 0x120   : > { %3697 = vmatpush2.bf16.msra.mxu1 %v5312_v56  ;;  %v602_v52 = vld [vmem:[%s6296_s16 + $0x868] sm:$0xff]  ;;  %v5384_v56 = vcombine.low %v606_v40, %v610_v42 }
 0x121   : > { %3698 = vmatprep.subr.bf16.mxu1 %v5305_v58  ;;  %v726_v53 = vld [vmem:[%s6296_s16 + $0xc48] sm:$0xff]  ;;  %v5377_v58 = vcombine.high %v598_v50, %v602_v52 }
 0x122   : > { %3658 = vmatpush2.bf16.msra.mxu0 %v5176_v63  ;;  %v730_v55 = vld [vmem:[%s6296_s16 + $0xc68] sm:$0xff] }
 0x123   : > { %3709 = vmatprep.subr.bf16.mxu0 %v5425_v2  ;;  %v5505_v59 = vcombine.high %v726_v53, %v730_v55  ;;  %v590_v60 = vld [vmem:[%s6296_s16 + $0x808] sm:$0xff]  ;;  %v5504_v2 = vcombine.low %v726_v53, %v730_v55 }
 0x124   : > { %3699 = vmatpush2.bf16.msra.mxu1 %v5304_v1  ;;  %v594_v61 = vld [vmem:[%s6296_s16 + $0x828] sm:$0xff]  ;;  %v5376_v1 = vcombine.low %v598_v50, %v602_v52 }
 0x125   : > { %3750 = vmatprep.subr.bf16.mxu1 %v5553_v3  ;;  %3660 = vmatmul.mubr.bf16.vlgmr.msra.gmra.mxu0 %v6421_v24  ;;  %v718_v62 = vld [vmem:[%s6296_s16 + $0xc08] sm:$0xff]  ;;  %v5369_v3 = vcombine.high %v590_v60, %v594_v61 }
 0x126   : > { %3710 = vmatpush1.bf16.msra.mxu0 %v5424_v8  ;;  %3741 = vmatprep.mubr.bf16.mxu0 %v6428_v32  ;;  %v722_v63 = vld [vmem:[%s6296_s16 + $0xc28] sm:$0xff] }
 0x127   : > { %3701 = vmatmul.mubr.bf16.vlgmr.msra.gmra.mxu1 %v6432_v0  ;;  %3711 = vmatprep.subr.bf16.mxu0 %v5417_v11  ;;  %v5497_v4 = vcombine.high %v718_v62, %v722_v63  ;;  %v710_v5 = vld [vmem:[%s6296_s16 + $0xbc8] sm:$0xff]  ;;  %v5496_v11 = vcombine.low %v718_v62, %v722_v63 }
 0x128   : > { %3751 = vmatpush1.bf16.msra.mxu1 %v5552_v9  ;;  %3782 = vmatprep.mubr.bf16.mxu1 %v6441_v41  ;;  %v714_v6 = vld [vmem:[%s6296_s16 + $0xbe8] sm:$0xff]  ;;  %v5368_v9 = vcombine.low %v590_v60, %v594_v61 }
 0x129   : > { %3752 = vmatprep.subr.bf16.mxu1 %v5545_v12  ;;  %v838_v7 = vld [vmem:[%s6296_s16 + $0xfc8] sm:$0xff]  ;;  %v5489_v12 = vcombine.high %v710_v5, %v714_v6 }
 0x12a   : > { %3712 = vmatpush1.bf16.msra.mxu0 %v5416_v18  ;;  %v842_v8 = vld [vmem:[%s6296_s16 + $0xfe8] sm:$0xff] }
 0x12b   : > { %3713 = vmatprep.subr.bf16.mxu0 %v5409_v20  ;;  %v5617_v13 = vcombine.high %v838_v7, %v842_v8  ;;  %v702_v15 = vld [vmem:[%s6296_s16 + $0xb88] sm:$0xff]  ;;  %v5616_v20 = vcombine.low %v838_v7, %v842_v8 }
 0x12c   : > { %3753 = vmatpush1.bf16.msra.mxu1 %v5544_v19  ;;  %v706_v16 = vld [vmem:[%s6296_s16 + $0xba8] sm:$0xff]  ;;  %v5488_v19 = vcombine.low %v710_v5, %v714_v6 }
 0x12d   : > { %3754 = vmatprep.subr.bf16.mxu1 %v5537_v21  ;;  %v830_v17 = vld [vmem:[%s6296_s16 + $0xf88] sm:$0xff]  ;;  %v5481_v21 = vcombine.high %v702_v15, %v706_v16 }
 0x12e   : > { %3714 = vmatpush1.bf16.msra.mxu0 %v5408_v27  ;;  %v834_v18 = vld [vmem:[%s6296_s16 + $0xfa8] sm:$0xff] }
 0x12f   : > { %3715 = vmatprep.subr.bf16.mxu0 %v5401_v30  ;;  %v5609_v22 = vcombine.high %v830_v17, %v834_v18  ;;  %v694_v23 = vld [vmem:[%s6296_s16 + $0xb48] sm:$0xff]  ;;  %v5608_v30 = vcombine.low %v830_v17, %v834_v18  ;;  %v395_v17 = vld [vmem:[%s6296_s16 + $0x1f0] sm:$0xff] }
 0x130   : > { %3755 = vmatpush1.bf16.msra.mxu1 %v5536_v28  ;;  %v698_v25 = vld [vmem:[%s6296_s16 + $0xb68] sm:$0xff]  ;;  %v5480_v28 = vcombine.low %v702_v15, %v706_v16  ;;  %v391_v16 = vld [vmem:[%s6296_s16 + $0x1d0] sm:$0xff] }
 0x131   : > { %3756 = vmatprep.subr.bf16.mxu1 %v5529_v31  ;;  %v822_v26 = vld [vmem:[%s6296_s16 + $0xf48] sm:$0xff]  ;;  %v5473_v31 = vcombine.high %v694_v23, %v698_v25  ;;  %v519_v18 = vld [vmem:[%s6296_s16 + $0x5d0] sm:$0xff] }
 0x132   : > { %3716 = vmatpush1.bf16.msra.mxu0 %v5400_v37  ;;  %v826_v27 = vld [vmem:[%s6296_s16 + $0xf68] sm:$0xff] }
 0x133   : > { %3717 = vmatprep.subr.bf16.mxu0 %v5393_v39  ;;  %v5601_v29 = vcombine.high %v822_v26, %v826_v27  ;;  %v686_v34 = vld [vmem:[%s6296_s16 + $0xb08] sm:$0xff]  ;;  %v5600_v39 = vcombine.low %v822_v26, %v826_v27  ;;  %v387_v26 = vld [vmem:[%s6296_s16 + $0x1b0] sm:$0xff] }
 0x134   : > { %3757 = vmatpush1.bf16.msra.mxu1 %v5528_v38  ;;  %v690_v35 = vld [vmem:[%s6296_s16 + $0xb28] sm:$0xff]  ;;  %v5472_v38 = vcombine.low %v694_v23, %v698_v25  ;;  %v383_v25 = vld [vmem:[%s6296_s16 + $0x190] sm:$0xff] }
 0x135   : > { %3758 = vmatprep.subr.bf16.mxu1 %v5521_v54  ;;  %v814_v36 = vld [vmem:[%s6296_s16 + $0xf08] sm:$0xff]  ;;  %v5465_v54 = vcombine.high %v686_v34, %v690_v35  ;;  %v511_v27 = vld [vmem:[%s6296_s16 + $0x590] sm:$0xff] }
 0x136   : > { %3718 = vmatpush1.bf16.msra.mxu0 %v5392_v46  ;;  %v818_v37 = vld [vmem:[%s6296_s16 + $0xf28] sm:$0xff] }
 0x137   : > { %3719 = vmatprep.subr.bf16.mxu0 %v5385_v48  ;;  %v5593_v40 = vcombine.high %v814_v36, %v818_v37  ;;  %v678_v42 = vld [vmem:[%s6296_s16 + $0xac8] sm:$0xff]  ;;  %v5592_v48 = vcombine.low %v814_v36, %v818_v37  ;;  %v379_v36 = vld [vmem:[%s6296_s16 + $0x170] sm:$0xff] }
 0x138   : > { %3759 = vmatpush1.bf16.msra.mxu1 %v5520_v47  ;;  %v682_v43 = vld [vmem:[%s6296_s16 + $0xae8] sm:$0xff]  ;;  %v5464_v47 = vcombine.low %v686_v34, %v690_v35  ;;  %v375_v35 = vld [vmem:[%s6296_s16 + $0x150] sm:$0xff] }
 0x139   : > { %3760 = vmatprep.subr.bf16.mxu1 %v5513_v49  ;;  %v806_v44 = vld [vmem:[%s6296_s16 + $0xec8] sm:$0xff]  ;;  %v5457_v49 = vcombine.high %v678_v42, %v682_v43 }
 0x13a   : > { %3720 = vmatpush1.bf16.msra.mxu0 %v5384_v56  ;;  %v810_v46 = vld [vmem:[%s6296_s16 + $0xee8] sm:$0xff] }
 0x13b   : > { %3721 = vmatprep.subr.bf16.mxu0 %v5377_v58  ;;  %v5585_v50 = vcombine.high %v806_v44, %v810_v46  ;;  %v670_v52 = vld [vmem:[%s6296_s16 + $0xa88] sm:$0xff]  ;;  %v5584_v58 = vcombine.low %v806_v44, %v810_v46  ;;  %v5155_v46 = vcombine.high %v375_v35, %v379_v36 }
 0x13c   : > { %3761 = vmatpush1.bf16.msra.mxu1 %v5512_v57  ;;  %v674_v53 = vld [vmem:[%s6296_s16 + $0xaa8] sm:$0xff]  ;;  %v5456_v57 = vcombine.low %v678_v42, %v682_v43 }
 0x13d   : > { %3762 = vmatprep.subr.bf16.mxu1 %v5505_v59  ;;  %v798_v55 = vld [vmem:[%s6296_s16 + $0xe88] sm:$0xff]  ;;  %v5449_v59 = vcombine.high %v670_v52, %v674_v53 }
 0x13e   : > { %3722 = vmatpush1.bf16.msra.mxu0 %v5376_v1  ;;  %v802_v56 = vld [vmem:[%s6296_s16 + $0xea8] sm:$0xff] }
 0x13f   : > { %3723 = vmatprep.subr.bf16.mxu0 %v5369_v3  ;;  %v5577_v60 = vcombine.high %v798_v55, %v802_v56  ;;  %v662_v61 = vld [vmem:[%s6296_s16 + $0xa48] sm:$0xff]  ;;  %v5576_v3 = vcombine.low %v798_v55, %v802_v56  ;;  %v495_v55 = vld [vmem:[%s6296_s16 + $0x510] sm:$0xff] }
 0x140   : > { %3763 = vmatpush1.bf16.msra.mxu1 %v5504_v2  ;;  %v666_v62 = vld [vmem:[%s6296_s16 + $0xa68] sm:$0xff]  ;;  %v5448_v2 = vcombine.low %v670_v52, %v674_v53  ;;  %v499_v56 = vld [vmem:[%s6296_s16 + $0x530] sm:$0xff] }
 0x141   : > { %3764 = vmatprep.subr.bf16.mxu1 %v5497_v4  ;;  %v790_v63 = vld [vmem:[%s6296_s16 + $0xe48] sm:$0xff]  ;;  %v5441_v4 = vcombine.high %v662_v61, %v666_v62 }
 0x142   : > { %3724 = vmatpush1.bf16.msra.mxu0 %v5368_v9  ;;  %v794_v1 = vld [vmem:[%s6296_s16 + $0xe68] sm:$0xff] }
 0x143   : > { %3725 = vmatprep.subr.bf16.mxu0 %v5489_v12  ;;  %v5569_v5 = vcombine.high %v790_v63, %v794_v1  ;;  %v654_v6 = vld [vmem:[%s6296_s16 + $0xa08] sm:$0xff]  ;;  %v5568_v12 = vcombine.low %v790_v63, %v794_v1  ;;  %v5275_v63 = vcombine.high %v495_v55, %v499_v56  ;;  %v359_v1 = vld [vmem:[%s6296_s16 + $0xd0] sm:$0xff] }
 0x144   : > { %3765 = vmatpush1.bf16.msra.mxu1 %v5496_v11  ;;  %v658_v7 = vld [vmem:[%s6296_s16 + $0xa28] sm:$0xff]  ;;  %v5440_v11 = vcombine.low %v662_v61, %v666_v62 }
 0x145   : > { %3766 = vmatprep.subr.bf16.mxu1 %v5617_v13  ;;  %v782_v8 = vld [vmem:[%s6296_s16 + $0xe08] sm:$0xff]  ;;  %v5433_v13 = vcombine.high %v654_v6, %v658_v7 }
 0x146   : > { %3726 = vmatpush2.bf16.msra.mxu0 %v5488_v19  ;;  %v786_v9 = vld [vmem:[%s6296_s16 + $0xe28] sm:$0xff]  ;;  %v523_v19 = vld [vmem:[%s6296_s16 + $0x5f0] sm:$0xff] }
 0x147   : > { %3727 = vmatprep.subr.bf16.mxu0 %v5481_v21  ;;  %v5561_v15 = vcombine.high %v782_v8, %v786_v9  ;;  %v5560_v21 = vcombine.low %v782_v8, %v786_v9  ;;  %v5299_v23 = vcombine.high %v519_v18, %v523_v19  ;;  %v351_v9 = vld [vmem:[%s6296_s16 + $0x90] sm:$0xff] }
 0x148   : > { %3767 = vmatpush2.bf16.msra.mxu1 %v5616_v20  ;;  %v5432_v20 = vcombine.low %v654_v6, %v658_v7  ;;  %v5274_v6 = vcombine.low %v495_v55, %v499_v56 }
 0x149   : > { %3768 = vmatprep.subr.bf16.mxu1 %v5609_v22  ;;  %v5171_v22 = vcombine.high %v391_v16, %v395_v17 }
 0x14a   : > { %3728 = vmatpush2.bf16.msra.mxu0 %v5480_v28  ;;  %v515_v28 = vld [vmem:[%s6296_s16 + $0x5b0] sm:$0xff] }
 0x14b   : > { %3729 = vmatprep.subr.bf16.mxu0 %v5473_v31  ;;  %v5298_v31 = vcombine.low %v519_v18, %v523_v19  ;;  %v5291_v34 = vcombine.high %v511_v27, %v515_v28  ;;  %v5290_v44 = vcombine.low %v511_v27, %v515_v28  ;;  %v343_v19 = vld [vmem:[%s6296_s16 + $0x50] sm:$0xff] }
 0x14c   : > { %3769 = vmatpush2.bf16.msra.mxu1 %v5608_v30  ;;  %v5170_v30 = vcombine.low %v391_v16, %v395_v17  ;;  %v335_v28 = vld [vmem:[%s6296_s16 + $0x10] sm:$0xff] }
 0x14d   : > { %3770 = vmatprep.subr.bf16.mxu1 %v5601_v29  ;;  %v5163_v29 = vcombine.high %v383_v25, %v387_v26 }
 0x14e   : > { %3730 = vmatpush2.bf16.msra.mxu0 %v5472_v38  ;;  %v503_v38 = vld [vmem:[%s6296_s16 + $0x550] sm:$0xff] }
 0x14f   : > { %3731 = vmatprep.subr.bf16.mxu0 %v5465_v54 }
 0x150   : > { %3771 = vmatpush2.bf16.msra.mxu1 %v5600_v39  ;;  %v507_v39 = vld [vmem:[%s6296_s16 + $0x570] sm:$0xff] }
 0x151   : > { %3772 = vmatprep.subr.bf16.mxu1 %v5593_v40  ;;  %v5162_v40 = vcombine.low %v383_v25, %v387_v26 }
 0x152   : > { %3732 = vmatpush2.bf16.msra.mxu0 %v5464_v47 }
 0x153   : > { %3733 = vmatprep.subr.bf16.mxu0 %v5457_v49  ;;  %v367_v49 = vld [vmem:[%s6296_s16 + $0x110] sm:$0xff] }
 0x154   : > { %3773 = vmatpush2.bf16.msra.mxu1 %v5592_v48  ;;  %v5283_v48 = vcombine.high %v503_v38, %v507_v39 }
 0x155   : > { %3774 = vmatprep.subr.bf16.mxu1 %v5585_v50  ;;  %v371_v50 = vld [vmem:[%s6296_s16 + $0x130] sm:$0xff] }
 0x156   : > { %3734 = vmatpush2.bf16.msra.mxu0 %v5456_v57  ;;  %v5147_v61 = vcombine.high %v367_v49, %v371_v50 }
 0x157   : > { %3735 = vmatprep.subr.bf16.mxu0 %v5449_v59 }
 0x158   : > { %3775 = vmatpush2.bf16.msra.mxu1 %v5584_v58  ;;  %v5154_v58 = vcombine.low %v375_v35, %v379_v36 }
 0x159   : > { %3776 = vmatprep.subr.bf16.mxu1 %v5577_v60  ;;  %v5282_v60 = vcombine.low %v503_v38, %v507_v39  ;;  %v455_v38 = vld [vmem:[%s6296_s16 + $0x3d0] sm:$0xff] }
 0x15a   : > { %3736 = vmatpush2.bf16.msra.mxu0 %v5448_v2  ;;  %v363_v2 = vld [vmem:[%s6296_s16 + $0xf0] sm:$0xff] }
 0x15b   : > { %3737 = vmatprep.subr.bf16.mxu0 %v5441_v4  ;;  %v491_v4 = vld [vmem:[%s6296_s16 + $0x4f0] sm:$0xff]  ;;  %v5139_v7 = vcombine.high %v359_v1, %v363_v2 }
 0x15c   : > { %3777 = vmatpush2.bf16.msra.mxu1 %v5576_v3  ;;  %v487_v3 = vld [vmem:[%s6296_s16 + $0x4d0] sm:$0xff] }
 0x15d   : > { %3778 = vmatprep.subr.bf16.mxu1 %v5569_v5  ;;  %v5146_v5 = vcombine.low %v367_v49, %v371_v50  ;;  %v5267_v8 = vcombine.high %v487_v3, %v491_v4  ;;  %v5266_v16 = vcombine.low %v487_v3, %v491_v4  ;;  %v459_v39 = vld [vmem:[%s6296_s16 + $0x3f0] sm:$0xff] }
 0x15e   : > { %3738 = vmatpush2.bf16.msra.mxu0 %v5440_v11  ;;  %v355_v11 = vld [vmem:[%s6296_s16 + $0xb0] sm:$0xff]  ;;  %v5234_v55 = vcombine.low %v455_v38, %v459_v39 }
 0x15f   : > { %3739 = vmatprep.subr.bf16.mxu0 %v5433_v13  ;;  %v483_v13 = vld [vmem:[%s6296_s16 + $0x4b0] sm:$0xff]  ;;  %v5131_v17 = vcombine.high %v351_v9, %v355_v11 }
 0x160   : > { %3779 = vmatpush2.bf16.msra.mxu1 %v5568_v12  ;;  %v479_v12 = vld [vmem:[%s6296_s16 + $0x490] sm:$0xff] }
 0x161   : > { %3780 = vmatprep.subr.bf16.mxu1 %v5561_v15  ;;  %v5138_v15 = vcombine.low %v359_v1, %v363_v2  ;;  %v5259_v18 = vcombine.high %v479_v12, %v483_v13  ;;  %v5258_v25 = vcombine.low %v479_v12, %v483_v13  ;;  %v451_v49 = vld [vmem:[%s6296_s16 + $0x3b0] sm:$0xff] }
 0x162   : > { %3740 = vmatpush2.bf16.msra.mxu0 %v5432_v20  ;;  %v347_v20 = vld [vmem:[%s6296_s16 + $0x70] sm:$0xff] }
 0x163   : > { %3791 = vmatprep.subr.bf16.mxu0 %v5171_v22  ;;  %v475_v22 = vld [vmem:[%s6296_s16 + $0x470] sm:$0xff]  ;;  %v5123_v26 = vcombine.high %v343_v19, %v347_v20 }
 0x164   : > { %3781 = vmatpush2.bf16.msra.mxu1 %v5560_v21  ;;  %v471_v21 = vld [vmem:[%s6296_s16 + $0x450] sm:$0xff] }
 0x165   : > { %3832 = vmatprep.subr.bf16.mxu1 %v5299_v23  ;;  %v3497_v37 = vpop.f32.mrf.mxu0  ;;  %3742 = vmatmul.mubr.bf16.vlgmr.msra.gmra.mxu0 %v6391_v33  ;;  %v5130_v23 = vcombine.low %v351_v9, %v355_v11  ;;  %v5251_v27 = vcombine.high %v471_v21, %v475_v22  ;;  %v5250_v35 = vcombine.low %v471_v21, %v475_v22  ;;  %v575_v50 = vld [vmem:[%s6296_s16 + $0x790] sm:$0xff] }
 0x166   : > { %3792 = vmatpush1.bf16.msra.mxu0 %v5170_v30  ;;  %3823 = vmatprep.mubr.bf16.mxu0 %v6368_v10  ;;  %v339_v30 = vld [vmem:[%s6296_s16 + $0x30] sm:$0xff] }
 0x167   : > { %v3538_v54 = vpop.f32.mrf.mxu1  ;;  %3783 = vmatmul.mubr.bf16.vlgmr.msra.gmra.mxu1 %v6508_v51  ;;  %v3499_v43 = vpop.f32.mrf.mxu0  ;;  %3793 = vmatprep.subr.bf16.mxu0 %v5163_v29  ;;  %v467_v29 = vld [vmem:[%s6296_s16 + $0x430] sm:$0xff]  ;;  %v5115_v36 = vcombine.high %v335_v28, %v339_v30 }
 0x168   : > { %v6652_v42 = vadd.f32 %v3538_v54, %v3497_v37  ;;  %3833 = vmatpush1.bf16.msra.mxu1 %v5298_v31  ;;  %3864 = vmatprep.mubr.bf16.mxu1 %v6375_v14  ;;  %v463_v31 = vld [vmem:[%s6296_s16 + $0x410] sm:$0xff] }
 0x169   : > { %v3540_v47 = vpop.f32.mrf.mxu1  ;;  %3834 = vmatprep.subr.bf16.mxu1 %v5291_v34  ;;  %v3501_v53 = vpop.f32.mrf.mxu0  ;;  %v5122_v34 = vcombine.low %v343_v19, %v347_v20  ;;  %v5243_v37 = vcombine.high %v463_v31, %v467_v29  ;;  %v583_v54 = vld [vmem:[%s6296_s16 + $0x7d0] sm:$0xff] }
 0x16a   : > { %v6657_v52 = vadd.f32 %v3540_v47, %v3499_v43  ;;  %3794 = vmatpush1.bf16.msra.mxu0 %v5162_v40  ;;  %v587_v40 = vld [vmem:[%s6296_s16 + $0x7f0] sm:$0xff]  ;;  %v5114_v43 = vcombine.low %v335_v28, %v339_v30 }
 0x16b   : > { %v3542_v57 = vpop.f32.mrf.mxu1  ;;  %v3502_v59 = vpop.f32.mrf.mxu0  ;;  %3795 = vmatprep.subr.bf16.mxu0 %v5155_v46  ;;  %v5235_v46 = vcombine.high %v455_v38, %v459_v39  ;;  %v5363_v47 = vcombine.high %v583_v54, %v587_v40  ;;  %v579_v53 = vld [vmem:[%s6296_s16 + $0x7b0] sm:$0xff]  ;;  %v5362_v56 = vcombine.low %v583_v54, %v587_v40 }
 0x16c   : > { %3835 = vmatpush1.bf16.msra.mxu1 %v5290_v44  ;;  %v5242_v44 = vcombine.low %v463_v31, %v467_v29  ;;  %v439_v59 = vld [vmem:[%s6296_s16 + $0x350] sm:$0xff]  ;;  %v5354_v1 = vcombine.low %v575_v50, %v579_v53 }
 0x16d   : > { %v3543_v62 = vpop.f32.mrf.mxu1  ;;  %3836 = vmatprep.subr.bf16.mxu1 %v5283_v48  ;;  %v447_v48 = vld [vmem:[%s6296_s16 + $0x390] sm:$0xff] }
 0x16e   : > { %3796 = vmatpush1.bf16.msra.mxu0 %v5154_v58  ;;  %v5227_v57 = vcombine.high %v447_v48, %v451_v49  ;;  %v5355_v58 = vcombine.high %v575_v50, %v579_v53  ;;  %v571_v62 = vld [vmem:[%s6296_s16 + $0x770] sm:$0xff] }
 0x16f   : > { %3797 = vmatprep.subr.bf16.mxu0 %v5147_v61  ;;  %v567_v61 = vld [vmem:[%s6296_s16 + $0x750] sm:$0xff] }
 0x170   : > { %3837 = vmatpush1.bf16.msra.mxu1 %v5282_v60  ;;  %v443_v60 = vld [vmem:[%s6296_s16 + $0x370] sm:$0xff]  ;;  %v5347_v3 = vcombine.high %v567_v61, %v571_v62  ;;  %v5346_v9 = vcombine.low %v567_v61, %v571_v62 }
 0x171   : > { %3838 = vmatprep.subr.bf16.mxu1 %v5275_v63  ;;  %v5226_v63 = vcombine.low %v447_v48, %v451_v49  ;;  %v5219_v2 = vcombine.high %v439_v59, %v443_v60  ;;  %v431_v4 = vld [vmem:[%s6296_s16 + $0x310] sm:$0xff] }
 0x172   : > { %3798 = vmatpush1.bf16.msra.mxu0 %v5146_v5  ;;  %v435_v5 = vld [vmem:[%s6296_s16 + $0x330] sm:$0xff] }
 0x173   : > { %3799 = vmatprep.subr.bf16.mxu0 %v5139_v7  ;;  %v563_v7 = vld [vmem:[%s6296_s16 + $0x730] sm:$0xff]  ;;  %v5211_v11 = vcombine.high %v431_v4, %v435_v5 }
 0x174   : > { %3839 = vmatpush1.bf16.msra.mxu1 %v5274_v6  ;;  %v559_v6 = vld [vmem:[%s6296_s16 + $0x710] sm:$0xff] }
 0x175   : > { %3840 = vmatprep.subr.bf16.mxu1 %v5267_v8  ;;  %v5218_v8 = vcombine.low %v439_v59, %v443_v60  ;;  %v5339_v12 = vcombine.high %v559_v6, %v563_v7  ;;  %v423_v13 = vld [vmem:[%s6296_s16 + $0x2d0] sm:$0xff]  ;;  %v5338_v19 = vcombine.low %v559_v6, %v563_v7 }
 0x176   : > { %3800 = vmatpush1.bf16.msra.mxu0 %v5138_v15  ;;  %v427_v15 = vld [vmem:[%s6296_s16 + $0x2f0] sm:$0xff] }
 0x177   : > { %3801 = vmatprep.subr.bf16.mxu0 %v5131_v17  ;;  %v555_v17 = vld [vmem:[%s6296_s16 + $0x6f0] sm:$0xff]  ;;  %v5203_v20 = vcombine.high %v423_v13, %v427_v15 }
 0x178   : > { %3841 = vmatpush1.bf16.msra.mxu1 %v5266_v16  ;;  %v551_v16 = vld [vmem:[%s6296_s16 + $0x6d0] sm:$0xff] }
 0x179   : > { %3842 = vmatprep.subr.bf16.mxu1 %v5259_v18  ;;  %v5210_v18 = vcombine.low %v431_v4, %v435_v5  ;;  %v5331_v21 = vcombine.high %v551_v16, %v555_v17  ;;  %v415_v22 = vld [vmem:[%s6296_s16 + $0x290] sm:$0xff]  ;;  %v5330_v28 = vcombine.low %v551_v16, %v555_v17 }
 0x17a   : > { %3802 = vmatpush1.bf16.msra.mxu0 %v5130_v23  ;;  %v419_v23 = vld [vmem:[%s6296_s16 + $0x2b0] sm:$0xff] }
 0x17b   : > { %3803 = vmatprep.subr.bf16.mxu0 %v5123_v26  ;;  %v547_v26 = vld [vmem:[%s6296_s16 + $0x6b0] sm:$0xff]  ;;  %v5195_v30 = vcombine.high %v415_v22, %v419_v23 }
 0x17c   : > { %3843 = vmatpush1.bf16.msra.mxu1 %v5258_v25  ;;  %v543_v25 = vld [vmem:[%s6296_s16 + $0x690] sm:$0xff] }
 0x17d   : > { %3844 = vmatprep.subr.bf16.mxu1 %v5251_v27  ;;  %v5202_v27 = vcombine.low %v423_v13, %v427_v15  ;;  %v5323_v31 = vcombine.high %v543_v25, %v547_v26  ;;  %v407_v29 = vld [vmem:[%s6296_s16 + $0x250] sm:$0xff]  ;;  %v5322_v38 = vcombine.low %v543_v25, %v547_v26 }
 0x17e   : > { %3804 = vmatpush1.bf16.msra.mxu0 %v5122_v34  ;;  %v411_v34 = vld [vmem:[%s6296_s16 + $0x270] sm:$0xff] }
 0x17f   : > { %3805 = vmatprep.subr.bf16.mxu0 %v5115_v36  ;;  %v539_v36 = vld [vmem:[%s6296_s16 + $0x670] sm:$0xff]  ;;  %v5187_v39 = vcombine.high %v407_v29, %v411_v34 }
 0x180   : > { %3845 = vmatpush1.bf16.msra.mxu1 %v5250_v35  ;;  %v535_v35 = vld [vmem:[%s6296_s16 + $0x650] sm:$0xff] }
 0x181   : > { %3846 = vmatprep.subr.bf16.mxu1 %v5243_v37  ;;  %v5194_v37 = vcombine.low %v415_v22, %v419_v23  ;;  %v5315_v54 = vcombine.high %v535_v35, %v539_v36  ;;  %v399_v40 = vld [vmem:[%s6296_s16 + $0x210] sm:$0xff]  ;;  %v5314_v48 = vcombine.low %v535_v35, %v539_v36 }
 0x182   : > { %3806 = vmatpush1.bf16.msra.mxu0 %v5114_v43  ;;  %v403_v43 = vld [vmem:[%s6296_s16 + $0x230] sm:$0xff] }
 0x183   : > { %3807 = vmatprep.subr.bf16.mxu0 %v5235_v46  ;;  %v531_v46 = vld [vmem:[%s6296_s16 + $0x630] sm:$0xff]  ;;  %v5179_v49 = vcombine.high %v399_v40, %v403_v43 }
 0x184   : > { %3847 = vmatpush1.bf16.msra.mxu1 %v5242_v44  ;;  %v527_v44 = vld [vmem:[%s6296_s16 + $0x610] sm:$0xff] }
 0x185   : > { %3848 = vmatprep.subr.bf16.mxu1 %v5363_v47  ;;  %v5186_v47 = vcombine.low %v407_v29, %v411_v34  ;;  %v5307_v50 = vcombine.high %v527_v44, %v531_v46  ;;  %v647_v53 = vld [vmem:[%s6296_s16 + $0x9d0] sm:$0xff]  ;;  %v5306_v59 = vcombine.low %v527_v44, %v531_v46 }
 0x186   : > { %3808 = vmatpush2.bf16.msra.mxu0 %v5234_v55  ;;  %v651_v55 = vld [vmem:[%s6296_s16 + $0x9f0] sm:$0xff] }
 0x187   : > { %3809 = vmatprep.subr.bf16.mxu0 %v5227_v57  ;;  %v779_v57 = vld [vmem:[%s6296_s16 + $0xdf0] sm:$0xff]  ;;  %v5427_v60 = vcombine.high %v647_v53, %v651_v55 }
 0x188   : > { %3849 = vmatpush2.bf16.msra.mxu1 %v5362_v56  ;;  %v775_v56 = vld [vmem:[%s6296_s16 + $0xdd0] sm:$0xff] }
 0x189   : > { %3850 = vmatprep.subr.bf16.mxu1 %v5355_v58  ;;  %v5178_v58 = vcombine.low %v399_v40, %v403_v43  ;;  %v5555_v61 = vcombine.high %v775_v56, %v779_v57  ;;  %v639_v62 = vld [vmem:[%s6296_s16 + $0x990] sm:$0xff]  ;;  %v5554_v4 = vcombine.low %v775_v56, %v779_v57 }
 0x18a   : > { %3810 = vmatpush2.bf16.msra.mxu0 %v5226_v63  ;;  %v643_v63 = vld [vmem:[%s6296_s16 + $0x9b0] sm:$0xff] }
 0x18b   : > { %3811 = vmatprep.subr.bf16.mxu0 %v5219_v2  ;;  %v771_v2 = vld [vmem:[%s6296_s16 + $0xdb0] sm:$0xff]  ;;  %v5419_v5 = vcombine.high %v639_v62, %v643_v63  ;;  %v5418_v16 = vcombine.low %v639_v62, %v643_v63 }
 0x18c   : > { %3851 = vmatpush2.bf16.msra.mxu1 %v5354_v1  ;;  %v767_v1 = vld [vmem:[%s6296_s16 + $0xd90] sm:$0xff] }
 0x18d   : > { %3852 = vmatprep.subr.bf16.mxu1 %v5347_v3  ;;  %v5426_v3 = vcombine.low %v647_v53, %v651_v55  ;;  %v5547_v6 = vcombine.high %v767_v1, %v771_v2  ;;  %v631_v7 = vld [vmem:[%s6296_s16 + $0x950] sm:$0xff] }
 0x18e   : > { %3812 = vmatpush2.bf16.msra.mxu0 %v5218_v8  ;;  %v635_v8 = vld [vmem:[%s6296_s16 + $0x970] sm:$0xff] }
 0x18f   : > { %3813 = vmatprep.subr.bf16.mxu0 %v5211_v11  ;;  %v759_v11 = vld [vmem:[%s6296_s16 + $0xd50] sm:$0xff] }
 0x190   : > { %3853 = vmatpush2.bf16.msra.mxu1 %v5346_v9  ;;  %v623_v23 = vld [vmem:[%s6296_s16 + $0x910] sm:$0xff] }
 0x191   : > { %3854 = vmatprep.subr.bf16.mxu1 %v5339_v12  ;;  %v763_v12 = vld [vmem:[%s6296_s16 + $0xd70] sm:$0xff] }
 0x192   : > { %3814 = vmatpush2.bf16.msra.mxu0 %v5210_v18  ;;  %v5546_v18 = vcombine.low %v767_v1, %v771_v2  ;;  %v627_v25 = vld [vmem:[%s6296_s16 + $0x930] sm:$0xff]  ;;  %v5538_v34 = vcombine.low %v759_v11, %v763_v12 }
 0x193   : > { %3815 = vmatprep.subr.bf16.mxu0 %v5203_v20  ;;  %v5403_v35 = vcombine.high %v623_v23, %v627_v25  ;;  %v743_v40 = vld [vmem:[%s6296_s16 + $0xcd0] sm:$0xff]  ;;  %v5402_v44 = vcombine.low %v623_v23, %v627_v25 }
 0x194   : > { %3855 = vmatpush2.bf16.msra.mxu1 %v5338_v19  ;;  %v5411_v19 = vcombine.high %v631_v7, %v635_v8  ;;  %v747_v43 = vld [vmem:[%s6296_s16 + $0xcf0] sm:$0xff] }
 0x195   : > { %3856 = vmatprep.subr.bf16.mxu1 %v5331_v21  ;;  %v735_v53 = vld [vmem:[%s6296_s16 + $0xc90] sm:$0xff]  ;;  %v5522_v57 = vcombine.low %v743_v40, %v747_v43 }
 0x196   : > { %3816 = vmatpush2.bf16.msra.mxu0 %v5202_v27  ;;  %v751_v27 = vld [vmem:[%s6296_s16 + $0xd10] sm:$0xff] }
 0x197   : > { %3817 = vmatprep.subr.bf16.mxu0 %v5195_v30  ;;  %v739_v55 = vld [vmem:[%s6296_s16 + $0xcb0] sm:$0xff] }
 0x198   : > { %3857 = vmatpush2.bf16.msra.mxu1 %v5330_v28  ;;  %v755_v28 = vld [vmem:[%s6296_s16 + $0xd30] sm:$0xff]  ;;  %v5514_v2 = vcombine.low %v735_v53, %v739_v55 }
 0x199   : > { %3858 = vmatprep.subr.bf16.mxu1 %v5323_v31  ;;  %v5530_v46 = vcombine.low %v751_v27, %v755_v28  ;;  %v727_v62 = vld [vmem:[%s6296_s16 + $0xc50] sm:$0xff] }
 0x19a   : > { %3818 = vmatpush2.bf16.msra.mxu0 %v5194_v37  ;;  %v731_v63 = vld [vmem:[%s6296_s16 + $0xc70] sm:$0xff] }
 0x19b   : > { %3819 = vmatprep.subr.bf16.mxu0 %v5187_v39  ;;  %v615_v39 = vld [vmem:[%s6296_s16 + $0x8d0] sm:$0xff] }
 0x19c   : > { %3859 = vmatpush2.bf16.msra.mxu1 %v5322_v38  ;;  %v5531_v38 = vcombine.high %v751_v27, %v755_v28  ;;  %v703_v23 = vld [vmem:[%s6296_s16 + $0xb90] sm:$0xff] }
 0x19d   : > { %3860 = vmatprep.subr.bf16.mxu1 %v5315_v54  ;;  %v619_v54 = vld [vmem:[%s6296_s16 + $0x8f0] sm:$0xff] }
 0x19e   : > { %3820 = vmatpush2.bf16.msra.mxu0 %v5186_v47  ;;  %v5395_v47 = vcombine.high %v615_v39, %v619_v54  ;;  %v5394_v56 = vcombine.low %v615_v39, %v619_v54  ;;  %v707_v25 = vld [vmem:[%s6296_s16 + $0xbb0] sm:$0xff] }
 0x19f   : > { %3821 = vmatprep.subr.bf16.mxu0 %v5179_v49  ;;  %v607_v49 = vld [vmem:[%s6296_s16 + $0x890] sm:$0xff]  ;;  %v5482_v39 = vcombine.low %v703_v23, %v707_v25 }
 0x1a0   : > { %3861 = vmatpush2.bf16.msra.mxu1 %v5314_v48  ;;  %v5523_v48 = vcombine.high %v743_v40, %v747_v43  ;;  %v835_v27 = vld [vmem:[%s6296_s16 + $0xfb0] sm:$0xff] }
 0x1a1   : > { %3862 = vmatprep.subr.bf16.mxu1 %v5307_v50  ;;  %v611_v50 = vld [vmem:[%s6296_s16 + $0x8b0] sm:$0xff] }
 0x1a2   : > { %3822 = vmatpush2.bf16.msra.mxu0 %v5178_v58  ;;  %v5387_v58 = vcombine.high %v607_v49, %v611_v50  ;;  %v5386_v1 = vcombine.low %v607_v49, %v611_v50 }
 0x1a3   : > { %3873 = vmatprep.subr.bf16.mxu0 %v5427_v60  ;;  %v599_v60 = vld [vmem:[%s6296_s16 + $0x850] sm:$0xff] }
 0x1a4   : > { %3863 = vmatpush2.bf16.msra.mxu1 %v5306_v59  ;;  %v5515_v59 = vcombine.high %v735_v53, %v739_v55 }
 0x1a5   : > { %3914 = vmatprep.subr.bf16.mxu1 %v5555_v61  ;;  %v3579_v9 = vpop.f32.mrf.mxu0  ;;  %3824 = vmatmul.mubr.bf16.vlgmr.msra.gmra.mxu0 %v6421_v24  ;;  %v603_v61 = vld [vmem:[%s6296_s16 + $0x870] sm:$0xff] }
 0x1a6   : > { %v3580_v13 = vadd.f32 %v3579_v9, %v6652_v42  ;;  %3874 = vmatpush1.bf16.msra.mxu0 %v5426_v3  ;;  %v5539_v42 = vcombine.high %v759_v11, %v763_v12  ;;  %3905 = vmatprep.mubr.bf16.mxu0 %v6428_v32  ;;  %v5379_v3 = vcombine.high %v599_v60, %v603_v61 }
 0x1a7   : > { %v3620_v15 = vpop.f32.mrf.mxu1  ;;  %3865 = vmatmul.mubr.bf16.vlgmr.msra.gmra.mxu1 %v6432_v0  ;;  %v3581_v17 = vpop.f32.mrf.mxu0  ;;  %3875 = vmatprep.subr.bf16.mxu0 %v5419_v5  ;;  %v591_v5 = vld [vmem:[%s6296_s16 + $0x810] sm:$0xff]  ;;  %v5378_v9 = vcombine.low %v599_v60, %v603_v61  ;;  %v5506_v11 = vcombine.low %v727_v62, %v731_v63 }
 0x1a8   : > { %3915 = vmatpush1.bf16.msra.mxu1 %v5554_v4  ;;  %v6725_v20 = vadd.f32 %v3620_v15, %v3580_v13  ;;  %v3582_v21 = vadd.f32 %v3581_v17, %v6657_v52  ;;  %3946 = vmatprep.mubr.bf16.mxu1 %v6441_v41  ;;  %v5410_v52 = vcombine.low %v631_v7, %v635_v8  ;;  %v719_v7 = vld [vmem:[%s6296_s16 + $0xc10] sm:$0xff] }
 0x1a9   : > { %v3622_v22 = vpop.f32.mrf.mxu1  ;;  %3916 = vmatprep.subr.bf16.mxu1 %v5547_v6  ;;  %v3583_v26 = vpop.f32.mrf.mxu0  ;;  %v5507_v4 = vcombine.high %v727_v62, %v731_v63  ;;  %v595_v6 = vld [vmem:[%s6296_s16 + $0x830] sm:$0xff] }
 0x1aa   : > { %v6734_v30 = vadd.f32 %v3622_v22, %v3582_v21  ;;  %3876 = vmatpush1.bf16.msra.mxu0 %v5418_v16  ;;  %v723_v8 = vld [vmem:[%s6296_s16 + $0xc30] sm:$0xff]  ;;  %v5371_v12 = vcombine.high %v591_v5, %v595_v6 }
 0x1ab   : > { %v3624_v31 = vpop.f32.mrf.mxu1  ;;  %v3584_v29 = vpop.f32.mrf.mxu0  ;;  %3877 = vmatprep.subr.bf16.mxu0 %v5411_v19  ;;  %v5499_v13 = vcombine.high %v719_v7, %v723_v8  ;;  %v711_v15 = vld [vmem:[%s6296_s16 + $0xbd0] sm:$0xff]  ;;  %v5370_v19 = vcombine.low %v591_v5, %v595_v6  ;;  %v5498_v21 = vcombine.low %v719_v7, %v723_v8 }
 0x1ac   : > { %3917 = vmatpush1.bf16.msra.mxu1 %v5546_v18  ;;  %v4127_v36 = vcombine.low %v6725_v20, %v6734_v30  ;;  %v715_v16 = vld [vmem:[%s6296_s16 + $0xbf0] sm:$0xff]  ;;  %v736_v20 = vld [vmem:[%s6296_s16 + $0xc98] sm:$0xff] }
 0x1ad   : > { %v3625_v37 = vpop.f32.mrf.mxu1  ;;  %3918 = vmatprep.subr.bf16.mxu1 %v5539_v42  ;;  %v839_v17 = vld [vmem:[%s6296_s16 + $0xfd0] sm:$0xff]  ;;  %v5491_v22 = vcombine.high %v711_v15, %v715_v16  ;;  %v5490_v28 = vcombine.low %v711_v15, %v715_v16  ;;  %v740_v30 = vld [vmem:[%s6296_s16 + $0xcb8] sm:$0xff] }
 0x1ae   : > { %3878 = vmatpush1.bf16.msra.mxu0 %v5410_v52  ;;  %v843_v18 = vld [vmem:[%s6296_s16 + $0xff0] sm:$0xff]  ;;  %v5483_v52 = vcombine.high %v703_v23, %v707_v25 }
 0x1af   : > { %3879 = vmatprep.subr.bf16.mxu0 %v5403_v35  ;;  %v5619_v42 = vcombine.high %v839_v17, %v843_v18  ;;  %v831_v26 = vld [vmem:[%s6296_s16 + $0xf90] sm:$0xff]  ;;  %v5618_v31 = vcombine.low %v839_v17, %v843_v18 }
 0x1b0   : > { %3919 = vmatpush1.bf16.msra.mxu1 %v5538_v34  ;;  %v5611_v29 = vcombine.high %v831_v26, %v835_v27  ;;  %v695_v34 = vld [vmem:[%s6296_s16 + $0xb50] sm:$0xff]  ;;  %v5610_v54 = vcombine.low %v831_v26, %v835_v27 }
 0x1b1   : > { %3920 = vmatprep.subr.bf16.mxu1 %v5531_v38  ;;  %v699_v35 = vld [vmem:[%s6296_s16 + $0xb70] sm:$0xff] }
 0x1b2   : > { %3880 = vmatpush1.bf16.msra.mxu0 %v5402_v44  ;;  %v823_v37 = vld [vmem:[%s6296_s16 + $0xf50] sm:$0xff]  ;;  %v5475_v40 = vcombine.high %v695_v34, %v699_v35  ;;  %v5474_v49 = vcombine.low %v695_v34, %v699_v35 }
 0x1b3   : > { %3881 = vmatprep.subr.bf16.mxu0 %v5395_v47  ;;  %v827_v38 = vld [vmem:[%s6296_s16 + $0xf70] sm:$0xff] }
 0x1b4   : > { %3921 = vmatpush1.bf16.msra.mxu1 %v5530_v46  ;;  %v5603_v43 = vcombine.high %v823_v37, %v827_v38  ;;  %v687_v44 = vld [vmem:[%s6296_s16 + $0xb10] sm:$0xff]  ;;  %v5602_v50 = vcombine.low %v823_v37, %v827_v38 }
 0x1b5   : > { %3922 = vmatprep.subr.bf16.mxu1 %v5523_v48  ;;  %v691_v46 = vld [vmem:[%s6296_s16 + $0xb30] sm:$0xff] }
 0x1b6   : > { %3882 = vmatpush1.bf16.msra.mxu0 %v5394_v56  ;;  %v815_v47 = vld [vmem:[%s6296_s16 + $0xf10] sm:$0xff]  ;;  %v5467_v53 = vcombine.high %v687_v44, %v691_v46  ;;  %v5466_v60 = vcombine.low %v687_v44, %v691_v46 }
 0x1b7   : > { %3883 = vmatprep.subr.bf16.mxu0 %v5387_v58  ;;  %v819_v48 = vld [vmem:[%s6296_s16 + $0xf30] sm:$0xff] }
 0x1b8   : > { %3923 = vmatpush1.bf16.msra.mxu1 %v5522_v57  ;;  %v5595_v55 = vcombine.high %v815_v47, %v819_v48  ;;  %v679_v56 = vld [vmem:[%s6296_s16 + $0xad0] sm:$0xff]  ;;  %v5594_v61 = vcombine.low %v815_v47, %v819_v48 }
 0x1b9   : > { %3924 = vmatprep.subr.bf16.mxu1 %v5515_v59  ;;  %v683_v57 = vld [vmem:[%s6296_s16 + $0xaf0] sm:$0xff] }
 0x1ba   : > { %3884 = vmatpush1.bf16.msra.mxu0 %v5386_v1  ;;  %v807_v58 = vld [vmem:[%s6296_s16 + $0xed0] sm:$0xff]  ;;  %v5459_v62 = vcombine.high %v679_v56, %v683_v57  ;;  %v5458_v5 = vcombine.low %v679_v56, %v683_v57  ;;  %v508_v56 = vld [vmem:[%s6296_s16 + $0x578] sm:$0xff] }
 0x1bb   : > { %3885 = vmatprep.subr.bf16.mxu0 %v5379_v3  ;;  %v811_v59 = vld [vmem:[%s6296_s16 + $0xef0] sm:$0xff] }
 0x1bc   : > { %3925 = vmatpush1.bf16.msra.mxu1 %v5514_v2  ;;  %v5587_v63 = vcombine.high %v807_v58, %v811_v59  ;;  %v671_v1 = vld [vmem:[%s6296_s16 + $0xa90] sm:$0xff]  ;;  %v5586_v6 = vcombine.low %v807_v58, %v811_v59 }
 0x1bd   : > { %3926 = vmatprep.subr.bf16.mxu1 %v5507_v4  ;;  %v675_v2 = vld [vmem:[%s6296_s16 + $0xab0] sm:$0xff] }
 0x1be   : > { %3886 = vmatpush1.bf16.msra.mxu0 %v5378_v9  ;;  %v799_v3 = vld [vmem:[%s6296_s16 + $0xe90] sm:$0xff]  ;;  %v5451_v7 = vcombine.high %v671_v1, %v675_v2  ;;  %v5450_v15 = vcombine.low %v671_v1, %v675_v2  ;;  %v368_v1 = vld [vmem:[%s6296_s16 + $0x118] sm:$0xff] }
 0x1bf   : > { %3887 = vmatprep.subr.bf16.mxu0 %v5371_v12  ;;  %v803_v4 = vld [vmem:[%s6296_s16 + $0xeb0] sm:$0xff]  ;;  %v372_v2 = vld [vmem:[%s6296_s16 + $0x138] sm:$0xff] }
 0x1c0   : > { %3927 = vmatpush1.bf16.msra.mxu1 %v5506_v11  ;;  %v5579_v8 = vcombine.high %v799_v3, %v803_v4  ;;  %v663_v9 = vld [vmem:[%s6296_s16 + $0xa50] sm:$0xff]  ;;  %v5578_v16 = vcombine.low %v799_v3, %v803_v4  ;;  %v496_v4 = vld [vmem:[%s6296_s16 + $0x518] sm:$0xff] }
 0x1c1   : > { %3928 = vmatprep.subr.bf16.mxu1 %v5499_v13  ;;  %v667_v11 = vld [vmem:[%s6296_s16 + $0xa70] sm:$0xff] }
 0x1c2   : > { %3888 = vmatpush1.bf16.msra.mxu0 %v5370_v19  ;;  %v791_v12 = vld [vmem:[%s6296_s16 + $0xe50] sm:$0xff]  ;;  %v5443_v17 = vcombine.high %v663_v9, %v667_v11  ;;  %v5442_v23 = vcombine.low %v663_v9, %v667_v11  ;;  %v5149_v11 = vcombine.high %v368_v1, %v372_v2 }
 0x1c3   : > { %3889 = vmatprep.subr.bf16.mxu0 %v5491_v22  ;;  %v795_v13 = vld [vmem:[%s6296_s16 + $0xe70] sm:$0xff] }
 0x1c4   : > { %3929 = vmatpush1.bf16.msra.mxu1 %v5498_v21  ;;  %v5571_v18 = vcombine.high %v791_v12, %v795_v13  ;;  %v655_v19 = vld [vmem:[%s6296_s16 + $0xa10] sm:$0xff]  ;;  %v5570_v25 = vcombine.low %v791_v12, %v795_v13  ;;  %v360_v13 = vld [vmem:[%s6296_s16 + $0xd8] sm:$0xff] }
 0x1c5   : > { %3930 = vmatprep.subr.bf16.mxu1 %v5619_v42  ;;  %v659_v21 = vld [vmem:[%s6296_s16 + $0xa30] sm:$0xff] }
 0x1c6   : > { %3890 = vmatpush2.bf16.msra.mxu0 %v5490_v28  ;;  %v783_v22 = vld [vmem:[%s6296_s16 + $0xe10] sm:$0xff]  ;;  %v5435_v26 = vcombine.high %v655_v19, %v659_v21  ;;  %v392_v28 = vld [vmem:[%s6296_s16 + $0x1d8] sm:$0xff]  ;;  %v5434_v34 = vcombine.low %v655_v19, %v659_v21 }
 0x1c7   : > { %3891 = vmatprep.subr.bf16.mxu0 %v5483_v52  ;;  %v787_v42 = vld [vmem:[%s6296_s16 + $0xe30] sm:$0xff]  ;;  %v520_v52 = vld [vmem:[%s6296_s16 + $0x5d8] sm:$0xff] }
 0x1c8   : > { %3931 = vmatpush2.bf16.msra.mxu1 %v5618_v31  ;;  %v5563_v27 = vcombine.high %v783_v22, %v787_v42  ;;  %v396_v31 = vld [vmem:[%s6296_s16 + $0x1f8] sm:$0xff]  ;;  %v5562_v35 = vcombine.low %v783_v22, %v787_v42 }
 0x1c9   : > { %3932 = vmatprep.subr.bf16.mxu1 %v5611_v29  ;;  %v524_v29 = vld [vmem:[%s6296_s16 + $0x5f8] sm:$0xff]  ;;  %v5173_v37 = vcombine.high %v392_v28, %v396_v31  ;;  %v5172_v44 = vcombine.low %v392_v28, %v396_v31 }
 0x1ca   : > { %3892 = vmatpush2.bf16.msra.mxu0 %v5482_v39  ;;  %v5301_v38 = vcombine.high %v520_v52, %v524_v29  ;;  %v384_v39 = vld [vmem:[%s6296_s16 + $0x198] sm:$0xff]  ;;  %v5300_v46 = vcombine.low %v520_v52, %v524_v29 }
 0x1cb   : > { %3893 = vmatprep.subr.bf16.mxu0 %v5475_v40  ;;  %v512_v40 = vld [vmem:[%s6296_s16 + $0x598] sm:$0xff] }
 0x1cc   : > { %3933 = vmatpush2.bf16.msra.mxu1 %v5610_v54  ;;  %v388_v54 = vld [vmem:[%s6296_s16 + $0x1b8] sm:$0xff] }
 0x1cd   : > { %3934 = vmatprep.subr.bf16.mxu1 %v5603_v43  ;;  %v516_v43 = vld [vmem:[%s6296_s16 + $0x5b8] sm:$0xff]  ;;  %v5165_v47 = vcombine.high %v384_v39, %v388_v54  ;;  %v5164_v58 = vcombine.low %v384_v39, %v388_v54 }
 0x1ce   : > { %3894 = vmatpush2.bf16.msra.mxu0 %v5474_v49  ;;  %v5293_v48 = vcombine.high %v512_v40, %v516_v43  ;;  %v376_v49 = vld [vmem:[%s6296_s16 + $0x158] sm:$0xff] }
 0x1cf   : > { %3895 = vmatprep.subr.bf16.mxu0 %v5467_v53  ;;  %v352_v22 = vld [vmem:[%s6296_s16 + $0x98] sm:$0xff] }
 0x1d0   : > { %3935 = vmatpush2.bf16.msra.mxu1 %v5602_v50  ;;  %v380_v50 = vld [vmem:[%s6296_s16 + $0x178] sm:$0xff] }
 0x1d1   : > { %3936 = vmatprep.subr.bf16.mxu1 %v5595_v55  ;;  %v504_v55 = vld [vmem:[%s6296_s16 + $0x558] sm:$0xff] }
 0x1d2   : > { %3896 = vmatpush2.bf16.msra.mxu0 %v5466_v60  ;;  %v5292_v60 = vcombine.low %v512_v40, %v516_v43  ;;  %v5284_v9 = vcombine.low %v504_v55, %v508_v56  ;;  %v356_v42 = vld [vmem:[%s6296_s16 + $0xb8] sm:$0xff] }
 0x1d3   : > { %3897 = vmatprep.subr.bf16.mxu0 %v5459_v62  ;;  %v5133_v28 = vcombine.high %v352_v22, %v356_v42  ;;  %v344_v52 = vld [vmem:[%s6296_s16 + $0x58] sm:$0xff] }
 0x1d4   : > { %3937 = vmatpush2.bf16.msra.mxu1 %v5594_v61  ;;  %v5157_v61 = vcombine.high %v376_v49, %v380_v50  ;;  %v348_v29 = vld [vmem:[%s6296_s16 + $0x78] sm:$0xff] }
 0x1d5   : > { %3938 = vmatprep.subr.bf16.mxu1 %v5587_v63  ;;  %v5285_v63 = vcombine.high %v504_v55, %v508_v56  ;;  %v5125_v39 = vcombine.high %v344_v52, %v348_v29  ;;  %v336_v40 = vld [vmem:[%s6296_s16 + $0x18] sm:$0xff] }
 0x1d6   : > { %3898 = vmatpush2.bf16.msra.mxu0 %v5458_v5  ;;  %v500_v5 = vld [vmem:[%s6296_s16 + $0x538] sm:$0xff] }
 0x1d7   : > { %3899 = vmatprep.subr.bf16.mxu0 %v5451_v7  ;;  %v5156_v7 = vcombine.low %v376_v49, %v380_v50  ;;  %v340_v43 = vld [vmem:[%s6296_s16 + $0x38] sm:$0xff] }
 0x1d8   : > { %3939 = vmatpush2.bf16.msra.mxu1 %v5586_v6  ;;  %v5117_v49 = vcombine.high %v336_v40, %v340_v43  ;;  %v456_v55 = vld [vmem:[%s6296_s16 + $0x3d8] sm:$0xff] }
 0x1d9   : > { %3940 = vmatprep.subr.bf16.mxu1 %v5579_v8  ;;  %v460_v56 = vld [vmem:[%s6296_s16 + $0x3f8] sm:$0xff] }
 0x1da   : > { %3900 = vmatpush2.bf16.msra.mxu0 %v5450_v15  ;;  %v364_v15 = vld [vmem:[%s6296_s16 + $0xf8] sm:$0xff] }
 0x1db   : > { %3901 = vmatprep.subr.bf16.mxu0 %v5443_v17  ;;  %v492_v17 = vld [vmem:[%s6296_s16 + $0x4f8] sm:$0xff]  ;;  %v5141_v19 = vcombine.high %v360_v13, %v364_v15 }
 0x1dc   : > { %3941 = vmatpush2.bf16.msra.mxu1 %v5578_v16  ;;  %v488_v16 = vld [vmem:[%s6296_s16 + $0x4d8] sm:$0xff] }
 0x1dd   : > { %3942 = vmatprep.subr.bf16.mxu1 %v5571_v18  ;;  %v5276_v18 = vcombine.low %v496_v4, %v500_v5  ;;  %v5269_v21 = vcombine.high %v488_v16, %v492_v17 }
 0x1de   : > { %3902 = vmatpush2.bf16.msra.mxu0 %v5442_v23  ;;  %v480_v23 = vld [vmem:[%s6296_s16 + $0x498] sm:$0xff] }
 0x1df   : > { %3903 = vmatprep.subr.bf16.mxu0 %v5435_v26  ;;  %v5140_v26 = vcombine.low %v360_v13, %v364_v15  ;;  %v568_v13 = vld [vmem:[%s6296_s16 + $0x758] sm:$0xff] }
 0x1e0   : > { %3943 = vmatpush2.bf16.msra.mxu1 %v5570_v25  ;;  %v484_v25 = vld [vmem:[%s6296_s16 + $0x4b8] sm:$0xff] }
 0x1e1   : > { %3944 = vmatprep.subr.bf16.mxu1 %v5563_v27  ;;  %v5268_v27 = vcombine.low %v488_v16, %v492_v17  ;;  %v5261_v31 = vcombine.high %v480_v23, %v484_v25  ;;  %v572_v15 = vld [vmem:[%s6296_s16 + $0x778] sm:$0xff] }
 0x1e2   : > { %3904 = vmatpush2.bf16.msra.mxu0 %v5434_v34  ;;  %v472_v34 = vld [vmem:[%s6296_s16 + $0x458] sm:$0xff] }
 0x1e3   : > { %3955 = vmatprep.subr.bf16.mxu0 %v5173_v37  ;;  %v5132_v37 = vcombine.low %v352_v22, %v356_v42  ;;  %v560_v22 = vld [vmem:[%s6296_s16 + $0x718] sm:$0xff] }
 0x1e4   : > { %3945 = vmatpush2.bf16.msra.mxu1 %v5562_v35  ;;  %v476_v35 = vld [vmem:[%s6296_s16 + $0x478] sm:$0xff] }
 0x1e5   : > { %3996 = vmatprep.subr.bf16.mxu1 %v5301_v38  ;;  %v6796_v53 = vpop.f32.mrf.mxu0  ;;  %3906 = vmatmul.mubr.bf16.vlgmr.msra.gmra.mxu0 %v6391_v33  ;;  %v5260_v38 = vcombine.low %v480_v23, %v484_v25  ;;  %v5253_v54 = vcombine.high %v472_v34, %v476_v35  ;;  %v564_v42 = vld [vmem:[%s6296_s16 + $0x738] sm:$0xff]  ;;  %v5348_v25 = vcombine.low %v568_v13, %v572_v15 }
 0x1e6   : > { %3956 = vmatpush1.bf16.msra.mxu0 %v5172_v44  ;;  %3987 = vmatprep.mubr.bf16.mxu0 %v6368_v10  ;;  %v5277_v10 = vcombine.high %v496_v4, %v500_v5  ;;  %v464_v44 = vld [vmem:[%s6296_s16 + $0x418] sm:$0xff] }
 0x1e7   : > { %v6801_v57 = vpop.f32.mrf.mxu1  ;;  %3947 = vmatmul.mubr.bf16.vlgmr.msra.gmra.mxu1 %v6508_v51  ;;  %v6804_v59 = vpop.f32.mrf.mxu0  ;;  %3957 = vmatprep.subr.bf16.mxu0 %v5165_v47  ;;  %v5124_v47 = vcombine.low %v344_v52, %v348_v29  ;;  %v452_v4 = vld [vmem:[%s6296_s16 + $0x3b8] sm:$0xff] }
 0x1e8   : > { %3997 = vmatpush1.bf16.msra.mxu1 %v5300_v46  ;;  %4028 = vmatprep.mubr.bf16.mxu1 %v6375_v14  ;;  %v5148_v14 = vcombine.low %v368_v1, %v372_v2  ;;  %v468_v46 = vld [vmem:[%s6296_s16 + $0x438] sm:$0xff]  ;;  %v5237_v1 = vcombine.high %v456_v55, %v460_v56 }
 0x1e9   : > { %v6806_v62 = vpop.f32.mrf.mxu1  ;;  %3998 = vmatprep.subr.bf16.mxu1 %v5293_v48  ;;  %v3665_v3 = vpop.f32.mrf.mxu0  ;;  %v5252_v48 = vcombine.low %v472_v34, %v476_v35  ;;  %v5245_v50 = vcombine.high %v464_v44, %v468_v46  ;;  %v576_v5 = vld [vmem:[%s6296_s16 + $0x798] sm:$0xff]  ;;  %v5340_v35 = vcombine.low %v560_v22, %v564_v42 }
 0x1ea   : > { %3958 = vmatpush1.bf16.msra.mxu0 %v5164_v58  ;;  %v584_v58 = vld [vmem:[%s6296_s16 + $0x7d8] sm:$0xff] }
 0x1eb   : > { %v3706_v6 = vpop.f32.mrf.mxu1  ;;  %v3666_v8 = vpop.f32.mrf.mxu0  ;;  %3959 = vmatprep.subr.bf16.mxu0 %v5157_v61  ;;  %v5116_v61 = vcombine.low %v336_v40, %v340_v43  ;;  %v448_v3 = vld [vmem:[%s6296_s16 + $0x398] sm:$0xff] }
 0x1ec   : > { %3999 = vmatpush1.bf16.msra.mxu1 %v5292_v60  ;;  %v588_v60 = vld [vmem:[%s6296_s16 + $0x7f8] sm:$0xff]  ;;  %v5228_v16 = vcombine.low %v448_v3, %v452_v4 }
 0x1ed   : > { %v3707_v12 = vpop.f32.mrf.mxu1  ;;  %4000 = vmatprep.subr.bf16.mxu1 %v5285_v63  ;;  %v5244_v63 = vcombine.low %v464_v44, %v468_v46  ;;  %v5365_v2 = vcombine.high %v584_v58, %v588_v60  ;;  %v580_v6 = vld [vmem:[%s6296_s16 + $0x7b8] sm:$0xff]  ;;  %v5364_v8 = vcombine.low %v584_v58, %v588_v60 }
 0x1ee   : > { %3960 = vmatpush1.bf16.msra.mxu0 %v5156_v7  ;;  %v5236_v7 = vcombine.low %v456_v55, %v460_v56  ;;  %v440_v12 = vld [vmem:[%s6296_s16 + $0x358] sm:$0xff]  ;;  %v5356_v17 = vcombine.low %v576_v5, %v580_v6 }
 0x1ef   : > { %3961 = vmatprep.subr.bf16.mxu0 %v5149_v11  ;;  %v5357_v11 = vcombine.high %v576_v5, %v580_v6  ;;  %v552_v52 = vld [vmem:[%s6296_s16 + $0x6d8] sm:$0xff] }
 0x1f0   : > { %4001 = vmatpush1.bf16.msra.mxu1 %v5284_v9  ;;  %v5229_v9 = vcombine.high %v448_v3, %v452_v4  ;;  %v556_v29 = vld [vmem:[%s6296_s16 + $0x6f8] sm:$0xff] }
 0x1f1   : > { %4002 = vmatprep.subr.bf16.mxu1 %v5277_v10  ;;  %v444_v10 = vld [vmem:[%s6296_s16 + $0x378] sm:$0xff]  ;;  %v5332_v46 = vcombine.low %v552_v52, %v556_v29 }
 0x1f2   : > { %3962 = vmatpush1.bf16.msra.mxu0 %v5148_v14  ;;  %v5221_v14 = vcombine.high %v440_v12, %v444_v10  ;;  %v5220_v23 = vcombine.low %v440_v12, %v444_v10  ;;  %v544_v40 = vld [vmem:[%s6296_s16 + $0x698] sm:$0xff] }
 0x1f3   : > { %3963 = vmatprep.subr.bf16.mxu0 %v5141_v19  ;;  %v432_v19 = vld [vmem:[%s6296_s16 + $0x318] sm:$0xff] }
 0x1f4   : > { %4003 = vmatpush1.bf16.msra.mxu1 %v5276_v18  ;;  %v5349_v18 = vcombine.high %v568_v13, %v572_v15  ;;  %v548_v43 = vld [vmem:[%s6296_s16 + $0x6b8] sm:$0xff] }
 0x1f5   : > { %4004 = vmatprep.subr.bf16.mxu1 %v5269_v21  ;;  %v436_v21 = vld [vmem:[%s6296_s16 + $0x338] sm:$0xff]  ;;  %v5324_v60 = vcombine.low %v544_v40, %v548_v43 }
 0x1f6   : > { %3964 = vmatpush1.bf16.msra.mxu0 %v5140_v26  ;;  %v5213_v26 = vcombine.high %v432_v19, %v436_v21  ;;  %v5212_v34 = vcombine.low %v432_v19, %v436_v21  ;;  %v536_v55 = vld [vmem:[%s6296_s16 + $0x658] sm:$0xff] }
 0x1f7   : > { %3965 = vmatprep.subr.bf16.mxu0 %v5133_v28  ;;  %v424_v28 = vld [vmem:[%s6296_s16 + $0x2d8] sm:$0xff] }
 0x1f8   : > { %4005 = vmatpush1.bf16.msra.mxu1 %v5268_v27  ;;  %v5341_v27 = vcombine.high %v560_v22, %v564_v42  ;;  %v540_v56 = vld [vmem:[%s6296_s16 + $0x678] sm:$0xff]  ;;  %v6151_v22 = vmov 1983009808  }
 0x1f9   : > { %4006 = vmatprep.subr.bf16.mxu1 %v5261_v31  ;;  %v428_v31 = vld [vmem:[%s6296_s16 + $0x2f8] sm:$0xff]  ;;  %v5316_v6 = vcombine.low %v536_v55, %v540_v56  ;;  %v4130_v42 = vunpack.c.l.s4 %v6151_v22 }
 0x1fa   : > { %3966 = vmatpush1.bf16.msra.mxu0 %v5132_v37  ;;  %v5205_v37 = vcombine.high %v424_v28, %v428_v31  ;;  %v5204_v44 = vcombine.low %v424_v28, %v428_v31  ;;  %v528_v3 = vld [vmem:[%s6296_s16 + $0x618] sm:$0xff] }
 0x1fb   : > { %3967 = vmatprep.subr.bf16.mxu0 %v5125_v39  ;;  %v416_v39 = vld [vmem:[%s6296_s16 + $0x298] sm:$0xff] }
 0x1fc   : > { %4007 = vmatpush1.bf16.msra.mxu1 %v5260_v38  ;;  %v5333_v38 = vcombine.high %v552_v52, %v556_v29  ;;  %v532_v4 = vld [vmem:[%s6296_s16 + $0x638] sm:$0xff] }
 0x1fd   : > { %4008 = vmatprep.subr.bf16.mxu1 %v5253_v54  ;;  %v420_v54 = vld [vmem:[%s6296_s16 + $0x2b8] sm:$0xff]  ;;  %v5308_v15 = vcombine.low %v528_v3, %v532_v4 }
 0x1fe   : > { %3968 = vmatpush1.bf16.msra.mxu0 %v5124_v47  ;;  %v5197_v47 = vcombine.high %v416_v39, %v420_v54  ;;  %v5196_v58 = vcombine.low %v416_v39, %v420_v54  ;;  %v776_v12 = vld [vmem:[%s6296_s16 + $0xdd8] sm:$0xff] }
 0x1ff   : > { %3969 = vmatprep.subr.bf16.mxu0 %v5117_v49  ;;  %v408_v49 = vld [vmem:[%s6296_s16 + $0x258] sm:$0xff] }
 0x200   : > { %4009 = vmatpush1.bf16.msra.mxu1 %v5252_v48  ;;  %v5325_v48 = vcombine.high %v544_v40, %v548_v43  ;;  %v780_v10 = vld [vmem:[%s6296_s16 + $0xdf8] sm:$0xff] }
 0x201   : > { %4010 = vmatprep.subr.bf16.mxu1 %v5245_v50  ;;  %v412_v50 = vld [vmem:[%s6296_s16 + $0x278] sm:$0xff] }
 0x202   : > { %3970 = vmatpush1.bf16.msra.mxu0 %v5116_v61  ;;  %v5189_v61 = vcombine.high %v408_v49, %v412_v50  ;;  %v5188_v5 = vcombine.low %v408_v49, %v412_v50  ;;  %v768_v19 = vld [vmem:[%s6296_s16 + $0xd98] sm:$0xff] }
 0x203   : > { %3971 = vmatprep.subr.bf16.mxu0 %v5237_v1  ;;  %v400_v1 = vld [vmem:[%s6296_s16 + $0x218] sm:$0xff] }
 0x204   : > { %4011 = vmatpush1.bf16.msra.mxu1 %v5244_v63  ;;  %v5317_v63 = vcombine.high %v536_v55, %v540_v56  ;;  %v772_v21 = vld [vmem:[%s6296_s16 + $0xdb8] sm:$0xff] }
 0x205   : > { %4012 = vmatprep.subr.bf16.mxu1 %v5365_v2  ;;  %v404_v2 = vld [vmem:[%s6296_s16 + $0x238] sm:$0xff]  ;;  %v5549_v28 = vcombine.high %v768_v19, %v772_v21 }
 0x206   : > { %3972 = vmatpush2.bf16.msra.mxu0 %v5236_v7  ;;  %v5181_v7 = vcombine.high %v400_v1, %v404_v2  ;;  %v5180_v13 = vcombine.low %v400_v1, %v404_v2  ;;  %v632_v31 = vld [vmem:[%s6296_s16 + $0x958] sm:$0xff] }
 0x207   : > { %3973 = vmatprep.subr.bf16.mxu0 %v5229_v9  ;;  %v648_v9 = vld [vmem:[%s6296_s16 + $0x9d8] sm:$0xff] }
 0x208   : > { %4013 = vmatpush2.bf16.msra.mxu1 %v5364_v8  ;;  %v5309_v8 = vcombine.high %v528_v3, %v532_v4  ;;  %v636_v52 = vld [vmem:[%s6296_s16 + $0x978] sm:$0xff] }
 0x209   : > { %4014 = vmatprep.subr.bf16.mxu1 %v5357_v11  ;;  %v652_v11 = vld [vmem:[%s6296_s16 + $0x9f8] sm:$0xff]  ;;  %v5413_v40 = vcombine.high %v632_v31, %v636_v52 }
 0x20a   : > { %3974 = vmatpush2.bf16.msra.mxu0 %v5228_v16  ;;  %v5429_v16 = vcombine.high %v648_v9, %v652_v11  ;;  %v616_v2 = vld [vmem:[%s6296_s16 + $0x8d8] sm:$0xff] }
 0x20b   : > { %3975 = vmatprep.subr.bf16.mxu0 %v5221_v14  ;;  %v640_v14 = vld [vmem:[%s6296_s16 + $0x998] sm:$0xff] }
 0x20c   : > { %4015 = vmatpush2.bf16.msra.mxu1 %v5356_v17  ;;  %v5557_v17 = vcombine.high %v776_v12, %v780_v10  ;;  %v620_v3 = vld [vmem:[%s6296_s16 + $0x8f8] sm:$0xff] }
 0x20d   : > { %4016 = vmatprep.subr.bf16.mxu1 %v5349_v18  ;;  %v644_v18 = vld [vmem:[%s6296_s16 + $0x9b8] sm:$0xff] }
 0x20e   : > { %3976 = vmatpush2.bf16.msra.mxu0 %v5220_v23  ;;  %v5428_v23 = vcombine.low %v648_v9, %v652_v11  ;;  %v744_v4 = vld [vmem:[%s6296_s16 + $0xcd8] sm:$0xff]  ;;  %v330_v9 = vld [vmem:[#allocation2] sm:$0xff] }
 0x20f   : > { %3977 = vmatprep.subr.bf16.mxu0 %v5213_v26  ;;  %v5421_v26 = vcombine.high %v640_v14, %v644_v18  ;;  %v604_v22 = vld [vmem:[%s6296_s16 + $0x878] sm:$0xff] }
 0x210   : > { %4017 = vmatpush2.bf16.msra.mxu1 %v5348_v25  ;;  %v5556_v25 = vcombine.low %v776_v12, %v780_v10  ;;  %v5397_v12 = vcombine.high %v616_v2, %v620_v3 }
 0x211   : > { %4018 = vmatprep.subr.bf16.mxu1 %v5341_v27  ;;  %v3703_v27 = vadd.f32 %v6801_v57, %v6796_v53  ;;  %v5420_v53 = vcombine.low %v640_v14, %v644_v18 }
 0x212   : > { %3978 = vmatpush2.bf16.msra.mxu0 %v5212_v34  ;;  %v760_v34 = vld [vmem:[%s6296_s16 + $0xd58] sm:$0xff] }
 0x213   : > { %3979 = vmatprep.subr.bf16.mxu0 %v5205_v37  ;;  %v4131_v37 = vunpack.c.0.s8 %v4130_v42  ;;  %v728_v42 = vld [vmem:[%s6296_s16 + $0xc58] sm:$0xff] }
 0x214   : > { %4019 = vmatpush2.bf16.msra.mxu1 %v5340_v35  ;;  %v764_v35 = vld [vmem:[%s6296_s16 + $0xd78] sm:$0xff] }
 0x215   : > { %4020 = vmatprep.subr.bf16.mxu1 %v5333_v38  ;;  %v3705_v38 = vadd.f32 %v6806_v62, %v6804_v59  ;;  %v628_v59 = vld [vmem:[%s6296_s16 + $0x938] sm:$0xff]  ;;  %v6887_v49 = vsub.s32 %v4131_v37, %v6340_v45 }
 0x216   : > { %3980 = vmatpush2.bf16.msra.mxu0 %v5204_v44 }
 0x217   : > { %3981 = vmatprep.subr.bf16.mxu0 %v5197_v47  ;;  %v624_v47 = vld [vmem:[%s6296_s16 + $0x918] sm:$0xff] }
 0x218   : > { %4021 = vmatpush2.bf16.msra.mxu1 %v5332_v46  ;;  %v5541_v46 = vcombine.high %v760_v34, %v764_v35 }
 0x219   : > { %4022 = vmatprep.subr.bf16.mxu1 %v5325_v48  ;;  %v752_v48 = vld [vmem:[%s6296_s16 + $0xd18] sm:$0xff] }
 0x21a   : > { %3982 = vmatpush2.bf16.msra.mxu0 %v5196_v58  ;;  %v5412_v58 = vcombine.low %v632_v31, %v636_v52  ;;  %v592_v31 = vld [vmem:[%s6296_s16 + $0x818] sm:$0xff] }
 0x21b   : > { %3983 = vmatprep.subr.bf16.mxu0 %v5189_v61  ;;  %v5405_v61 = vcombine.high %v624_v47, %v628_v59  ;;  %v596_v52 = vld [vmem:[%s6296_s16 + $0x838] sm:$0xff] }
 0x21c   : > { %4023 = vmatpush2.bf16.msra.mxu1 %v5324_v60 }
 0x21d   : > { %4024 = vmatprep.subr.bf16.mxu1 %v5317_v63 }
 0x21e   : > { %3984 = vmatpush2.bf16.msra.mxu0 %v5188_v5  ;;  %v748_v5 = vld [vmem:[%s6296_s16 + $0xcf8] sm:$0xff] }
 0x21f   : > { %3985 = vmatprep.subr.bf16.mxu0 %v5181_v7  ;;  %v5524_v14 = vcombine.low %v744_v4, %v748_v5 }
 0x220   : > { %4025 = vmatpush2.bf16.msra.mxu1 %v5316_v6  ;;  %v4135_v6 = vrot.slane %v4127_v36, %v6887_v49 }
 0x221   : > { %4026 = vmatprep.subr.bf16.mxu1 %v5309_v8  ;;  %v5404_v8 = vcombine.low %v624_v47, %v628_v59  ;;  %v704_v47 = vld [vmem:[%s6296_s16 + $0xb98] sm:$0xff] }
 0x222   : > { %3986 = vmatpush2.bf16.msra.mxu0 %v5180_v13  ;;  %v5525_v13 = vcombine.high %v744_v4, %v748_v5  ;;  %v708_v59 = vld [vmem:[%s6296_s16 + $0xbb8] sm:$0xff] }
 0x223   : > { %4037 = vmatprep.subr.bf16.mxu0 %v5429_v16  ;;  %v612_v16 = vld [vmem:[%s6296_s16 + $0x8b8] sm:$0xff] }
 0x224   : > { %4027 = vmatpush2.bf16.msra.mxu1 %v5308_v15  ;;  %v608_v15 = vld [vmem:[%s6296_s16 + $0x898] sm:$0xff] }
 0x225   : > { %4078 = vmatprep.subr.bf16.mxu1 %v5557_v17  ;;  %v3743_v29 = vpop.f32.mrf.mxu0  ;;  %3988 = vmatmul.mubr.bf16.vlgmr.msra.gmra.mxu0 %v6421_v24  ;;  %v5548_v24 = vcombine.low %v768_v19, %v772_v21  ;;  %v5396_v17 = vcombine.low %v616_v2, %v620_v3  ;;  %v5389_v18 = vcombine.high %v608_v15, %v612_v16  ;;  %v600_v21 = vld [vmem:[%s6296_s16 + $0x858] sm:$0xff] }
 0x226   : > { %v3744_v39 = vadd.f32 %v3743_v29, %v3703_v27  ;;  %4038 = vmatpush1.bf16.msra.mxu0 %v5428_v23  ;;  %4069 = vmatprep.mubr.bf16.mxu0 %v6428_v32  ;;  %v5540_v32 = vcombine.low %v760_v34, %v764_v35  ;;  %v5517_v19 = vcombine.high %v736_v20, %v740_v30  ;;  %v732_v23 = vld [vmem:[%s6296_s16 + $0xc78] sm:$0xff] }
 0x227   : > { %v3784_v54 = vpop.f32.mrf.mxu1  ;;  %4029 = vmatmul.mubr.bf16.vlgmr.msra.gmra.mxu1 %v6432_v0  ;;  %v3745_v57 = vpop.f32.mrf.mxu0  ;;  %4039 = vmatprep.subr.bf16.mxu0 %v5421_v26  ;;  %v756_v0 = vld [vmem:[%s6296_s16 + $0xd38] sm:$0xff]  ;;  %v5516_v26 = vcombine.low %v736_v20, %v740_v30  ;;  %v5381_v27 = vcombine.high %v600_v21, %v604_v22  ;;  %v5380_v35 = vcombine.low %v600_v21, %v604_v22 }
 0x228   : > { %4079 = vmatpush1.bf16.msra.mxu1 %v5556_v25  ;;  %v3746_v43 = vadd.f32 %v3745_v57, %v3705_v38  ;;  %4110 = vmatprep.mubr.bf16.mxu1 %v6441_v41  ;;  %v3785_v50 = vadd.f32 %v3784_v54, %v3744_v39  ;;  %v5533_v41 = vcombine.high %v752_v48, %v756_v0  ;;  %v720_v29 = vld [vmem:[%s6296_s16 + $0xc18] sm:$0xff] }
 0x229   : > { %v3786_v44 = vpop.f32.mrf.mxu1  ;;  %4080 = vmatprep.subr.bf16.mxu1 %v5549_v28  ;;  %v3747_v62 = vpop.f32.mrf.mxu0  ;;  %v5532_v11 = vcombine.low %v752_v48, %v756_v0  ;;  %v5388_v25 = vcombine.low %v608_v15, %v612_v16  ;;  %v5509_v28 = vcombine.high %v728_v42, %v732_v23  ;;  %v724_v34 = vld [vmem:[%s6296_s16 + $0xc38] sm:$0xff]  ;;  %v5508_v37 = vcombine.low %v728_v42, %v732_v23 }
 0x22a   : > { %v3787_v55 = vadd.f32 %v3786_v44, %v3746_v43  ;;  %4040 = vmatpush1.bf16.msra.mxu0 %v5420_v53  ;;  %v5373_v38 = vcombine.high %v592_v31, %v596_v52  ;;  %v5501_v39 = vcombine.high %v720_v29, %v724_v34  ;;  %v712_v54 = vld [vmem:[%s6296_s16 + $0xbd8] sm:$0xff]  ;;  %v5500_v43 = vcombine.low %v720_v29, %v724_v34 }
 0x22b   : > { %v3788_v56 = vpop.f32.mrf.mxu1  ;;  %v3748_v60 = vpop.f32.mrf.mxu0  ;;  %4041 = vmatprep.subr.bf16.mxu0 %v5413_v40  ;;  %v716_v53 = vld [vmem:[%s6296_s16 + $0xbf8] sm:$0xff]  ;;  %v5372_v40 = vcombine.low %v592_v31, %v596_v52 }
 0x22c   : > { %4081 = vmatpush1.bf16.msra.mxu1 %v5548_v24  ;;  %v4128_v63 = vcombine.low %v3785_v50, %v3787_v55  ;;  %v840_v57 = vld [vmem:[%s6296_s16 + $0xfd8] sm:$0xff]  ;;  %v5493_v44 = vcombine.high %v712_v54, %v716_v53  ;;  %v5492_v0 = vcombine.low %v712_v54, %v716_v53  ;;  %v5485_v55 = vcombine.high %v704_v47, %v708_v59 }
 0x22d   : > { %v3789_v1 = vpop.f32.mrf.mxu1  ;;  %4082 = vmatprep.subr.bf16.mxu1 %v5541_v46  ;;  %v844_v24 = vld [vmem:[%s6296_s16 + $0xff8] sm:$0xff] }
 0x22e   : > { %v4142_v7 = vrot.slane %v4128_v63, %v6887_v49  ;;  %4042 = vmatpush1.bf16.msra.mxu0 %v5412_v58  ;;  %v5621_v46 = vcombine.high %v840_v57, %v844_v24  ;;  %v832_v62 = vld [vmem:[%s6296_s16 + $0xf98] sm:$0xff]  ;;  %v5620_v50 = vcombine.low %v840_v57, %v844_v24  ;;  %v5484_v63 = vcombine.low %v704_v47, %v708_v59 }
 0x22f   : > { %4043 = vmatprep.subr.bf16.mxu0 %v5405_v61  ;;  %v836_v48 = vld [vmem:[%s6296_s16 + $0xfb8] sm:$0xff] }
 0x230   : > { %4083 = vmatpush1.bf16.msra.mxu1 %v5540_v32  ;;  %v4143_v10 = vcombine.low %v4135_v6, %v4142_v7  ;;  %v5613_v56 = vcombine.high %v832_v62, %v836_v48  ;;  %v696_v58 = vld [vmem:[%s6296_s16 + $0xb58] sm:$0xff]  ;;  %v5612_v1 = vcombine.low %v832_v62, %v836_v48 }
 0x231   : > { %4084 = vmatprep.subr.bf16.mxu1 %v5533_v41  ;;  %v700_v60 = vld [vmem:[%s6296_s16 + $0xb78] sm:$0xff] }
 0x232   : > { %v4163_v36 = vadd.f32 %v4143_v10, %v330_v9  ;;  %4044 = vmatpush1.bf16.msra.mxu0 %v5404_v8  ;;  %v824_v32 = vld [vmem:[%s6296_s16 + $0xf58] sm:$0xff]  ;;  %v5477_v41 = vcombine.high %v696_v58, %v700_v60  ;;  %v5476_v7 = vcombine.low %v696_v58, %v700_v60 }
 0x233   : > { %4045 = vmatprep.subr.bf16.mxu0 %v5397_v12  ;;  %v828_v61 = vld [vmem:[%s6296_s16 + $0xf78] sm:$0xff] }
 0x234   : > { %4085 = vmatpush1.bf16.msra.mxu1 %v5532_v11  ;;  %4165 = vst [vmem:[#allocation2] sm:$0xff] %v4163_v36  ;;  %v5605_v2 = vcombine.high %v824_v32, %v828_v61  ;;  %v688_v3 = vld [vmem:[%s6296_s16 + $0xb18] sm:$0xff]  ;;  %v5604_v8 = vcombine.low %v824_v32, %v828_v61 }
 0x235   : > { %4086 = vmatprep.subr.bf16.mxu1 %v5525_v13  ;;  %v692_v4 = vld [vmem:[%s6296_s16 + $0xb38] sm:$0xff] }
 0x236   : > { %4046 = vmatpush1.bf16.msra.mxu0 %v5396_v17  ;;  %v816_v5 = vld [vmem:[%s6296_s16 + $0xf18] sm:$0xff]  ;;  %v5469_v9 = vcombine.high %v688_v3, %v692_v4  ;;  %v5468_v16 = vcombine.low %v688_v3, %v692_v4 }
 0x237   : > { %4047 = vmatprep.subr.bf16.mxu0 %v5389_v18  ;;  %v820_v6 = vld [vmem:[%s6296_s16 + $0xf38] sm:$0xff] }
 0x238   : > { %4087 = vmatpush1.bf16.msra.mxu1 %v5524_v14  ;;  %v5597_v11 = vcombine.high %v816_v5, %v820_v6  ;;  %v680_v12 = vld [vmem:[%s6296_s16 + $0xad8] sm:$0xff]  ;;  %v5596_v20 = vcombine.low %v816_v5, %v820_v6 }
 0x239   : > { %4088 = vmatprep.subr.bf16.mxu1 %v5517_v19  ;;  %v684_v10 = vld [vmem:[%s6296_s16 + $0xaf8] sm:$0xff] }
 0x23a   : > { %4048 = vmatpush1.bf16.msra.mxu0 %v5388_v25  ;;  %v808_v13 = vld [vmem:[%s6296_s16 + $0xed8] sm:$0xff]  ;;  %v5461_v30 = vcombine.high %v680_v12, %v684_v10  ;;  %v5460_v21 = vcombine.low %v680_v12, %v684_v10 }
 0x23b   : > { %4049 = vmatprep.subr.bf16.mxu0 %v5381_v27  ;;  %v812_v15 = vld [vmem:[%s6296_s16 + $0xef8] sm:$0xff] }
 0x23c   : > { %4089 = vmatpush1.bf16.msra.mxu1 %v5516_v26  ;;  %v5589_v36 = vcombine.high %v808_v13, %v812_v15  ;;  %v672_v17 = vld [vmem:[%s6296_s16 + $0xa98] sm:$0xff]  ;;  %v5588_v22 = vcombine.low %v808_v13, %v812_v15 }
 0x23d   : > { %4090 = vmatprep.subr.bf16.mxu1 %v5509_v28  ;;  %v676_v14 = vld [vmem:[%s6296_s16 + $0xab8] sm:$0xff] }
 0x23e   : > { %4050 = vmatpush1.bf16.msra.mxu0 %v5380_v35  ;;  %v800_v18 = vld [vmem:[%s6296_s16 + $0xe98] sm:$0xff]  ;;  %v5453_v42 = vcombine.high %v672_v17, %v676_v14  ;;  %v5452_v31 = vcombine.low %v672_v17, %v676_v14 }
 0x23f   : > { %4051 = vmatprep.subr.bf16.mxu0 %v5373_v38  ;;  %v804_v19 = vld [vmem:[%s6296_s16 + $0xeb8] sm:$0xff] }
 0x240   : > { %4091 = vmatpush1.bf16.msra.mxu1 %v5508_v37  ;;  %v5581_v23 = vcombine.high %v800_v18, %v804_v19  ;;  %v664_v25 = vld [vmem:[%s6296_s16 + $0xa58] sm:$0xff]  ;;  %v5580_v52 = vcombine.low %v800_v18, %v804_v19 }
 0x241   : > { %4092 = vmatprep.subr.bf16.mxu1 %v5501_v39  ;;  %v668_v26 = vld [vmem:[%s6296_s16 + $0xa78] sm:$0xff] }
 0x242   : > { %4052 = vmatpush1.bf16.msra.mxu0 %v5372_v40  ;;  %v792_v27 = vld [vmem:[%s6296_s16 + $0xe58] sm:$0xff]  ;;  %v5445_v29 = vcombine.high %v664_v25, %v668_v26  ;;  %v5444_v54 = vcombine.low %v664_v25, %v668_v26 }
 0x243   : > { %4053 = vmatprep.subr.bf16.mxu0 %v5493_v44  ;;  %v796_v28 = vld [vmem:[%s6296_s16 + $0xe78] sm:$0xff] }
 0x244   : > { %4093 = vmatpush1.bf16.msra.mxu1 %v5500_v43  ;;  %v5573_v34 = vcombine.high %v792_v27, %v796_v28  ;;  %v656_v35 = vld [vmem:[%s6296_s16 + $0xa18] sm:$0xff]  ;;  %v5572_v53 = vcombine.low %v792_v27, %v796_v28 }
 0x245   : > { %4094 = vmatprep.subr.bf16.mxu1 %v5621_v46  ;;  %v660_v37 = vld [vmem:[%s6296_s16 + $0xa38] sm:$0xff] }
 0x246   : > { %4054 = vmatpush2.bf16.msra.mxu0 %v5492_v0  ;;  %v784_v38 = vld [vmem:[%s6296_s16 + $0xe18] sm:$0xff]  ;;  %v5437_v57 = vcombine.high %v656_v35, %v660_v37  ;;  %v5436_v40 = vcombine.low %v656_v35, %v660_v37 }
 0x247   : > { %4055 = vmatprep.subr.bf16.mxu0 %v5485_v55  ;;  %v788_v39 = vld [vmem:[%s6296_s16 + $0xe38] sm:$0xff] }
 0x248   : > { %4095 = vmatpush2.bf16.msra.mxu1 %v5620_v50  ;;  %v5565_v24 = vcombine.high %v784_v38, %v788_v39  ;;  %v5564_v43 = vcombine.low %v784_v38, %v788_v39 }
 0x249   : > { %4096 = vmatprep.subr.bf16.mxu1 %v5613_v56 }
 0x24a   : > { %4056 = vmatpush2.bf16.msra.mxu0 %v5484_v63 }
 0x24b   : > { %4057 = vmatprep.subr.bf16.mxu0 %v5477_v41 }
 0x24c   : > { %4097 = vmatpush2.bf16.msra.mxu1 %v5612_v1 }
 0x24d   : > { %4098 = vmatprep.subr.bf16.mxu1 %v5605_v2 }
 0x24e   : > { %4058 = vmatpush2.bf16.msra.mxu0 %v5476_v7 }
 0x24f   : > { %4059 = vmatprep.subr.bf16.mxu0 %v5469_v9 }
 0x250   : > { %4099 = vmatpush2.bf16.msra.mxu1 %v5604_v8 }
 0x251   : > { %4100 = vmatprep.subr.bf16.mxu1 %v5597_v11 }
 0x252   : > { %4060 = vmatpush2.bf16.msra.mxu0 %v5468_v16 }
 0x253   : > { %4061 = vmatprep.subr.bf16.mxu0 %v5461_v30 }
 0x254   : > { %4101 = vmatpush2.bf16.msra.mxu1 %v5596_v20 }
 0x255   : > { %4102 = vmatprep.subr.bf16.mxu1 %v5589_v36 }
 0x256   : > { %4062 = vmatpush2.bf16.msra.mxu0 %v5460_v21 }
 0x257   : > { %4063 = vmatprep.subr.bf16.mxu0 %v5453_v42 }
 0x258   : > { %4103 = vmatpush2.bf16.msra.mxu1 %v5588_v22 }
 0x259   : > { %4104 = vmatprep.subr.bf16.mxu1 %v5581_v23 }
 0x25a   : > { %4064 = vmatpush2.bf16.msra.mxu0 %v5452_v31  ;;  %v331_v31 = vld [vmem:[#allocation2 + $0x8] sm:$0xff] }
 0x25b   : > { %4065 = vmatprep.subr.bf16.mxu0 %v5445_v29 }
 0x25c   : > { %4105 = vmatpush2.bf16.msra.mxu1 %v5580_v52 }
 0x25d   : > { %4106 = vmatprep.subr.bf16.mxu1 %v5573_v34 }
 0x25e   : > { %4066 = vmatpush2.bf16.msra.mxu0 %v5444_v54 }
 0x25f   : > { %4067 = vmatprep.subr.bf16.mxu0 %v5437_v57 }
 0x260   : > { %4107 = vmatpush2.bf16.msra.mxu1 %v5572_v53 }
 0x261   : > { %4108 = vmatprep.subr.bf16.mxu1 %v5565_v24 }
 0x262   : > { %4068 = vmatpush2.bf16.msra.mxu0 %v5436_v40 }
 0x264   : > { %4109 = vmatpush2.bf16.msra.mxu1 %v5564_v43 }
 0x265   : > { %v3825_v44 = vpop.f32.mrf.mxu0  ;;  %4070 = vmatmul.mubr.bf16.vlgmr.msra.gmra.mxu0 %v6391_v33 }
 0x267   : > { %v3866_v46 = vpop.f32.mrf.mxu1  ;;  %4111 = vmatmul.mubr.bf16.vlgmr.msra.gmra.mxu1 %v6508_v51  ;;  %v3827_v59 = vpop.f32.mrf.mxu0 }
 0x268   : > { %v3867_v47 = vadd.f32 %v3866_v46, %v3825_v44 }
 0x269   : > { %v3868_v62 = vpop.f32.mrf.mxu1  ;;  %v3829_v0 = vpop.f32.mrf.mxu0 }
 0x26a   : > { %v3869_v48 = vadd.f32 %v3868_v62, %v3827_v59 }
 0x26b   : > { %v3870_v50 = vpop.f32.mrf.mxu1  ;;  %v3830_v55 = vpop.f32.mrf.mxu0 }
 0x26d   : > { %v3871_v56 = vpop.f32.mrf.mxu1 }
 0x2a5   : > { %v3907_v58 = vpop.f32.mrf.mxu0 }
 0x2a6   : > { %v3908_v60 = vadd.f32 %v3907_v58, %v3867_v47 }
 0x2a7   : > { %v3948_v32 = vpop.f32.mrf.mxu1  ;;  %v3909_v61 = vpop.f32.mrf.mxu0 }
 0x2a8   : > { %v3949_v63 = vadd.f32 %v3948_v32, %v3908_v60  ;;  %v3910_v1 = vadd.f32 %v3909_v61, %v3869_v48 }
 0x2a9   : > { %v3950_v41 = vpop.f32.mrf.mxu1  ;;  %v3911_v2 = vpop.f32.mrf.mxu0 }
 0x2aa   : > { %v3951_v33 = vadd.f32 %v3950_v41, %v3910_v1 }
 0x2ab   : > { %v3952_v3 = vpop.f32.mrf.mxu1  ;;  %v3912_v4 = vpop.f32.mrf.mxu0 }
 0x2ac   : > { %v4144_v51 = vcombine.low %v3949_v63, %v3951_v33 }
 0x2ad   : > { %v3953_v5 = vpop.f32.mrf.mxu1 }
 0x2ae   : > { %v4152_v27 = vrot.slane %v4144_v51, %v6887_v49 }
 0x2e5   : > { %v3989_v6 = vpop.f32.mrf.mxu0 }
 0x2e7   : > { %v4030_v7 = vpop.f32.mrf.mxu1  ;;  %v3991_v8 = vpop.f32.mrf.mxu0 }
 0x2e8   : > { %v4031_v15 = vadd.f32 %v4030_v7, %v3989_v6 }
 0x2e9   : > { %v4032_v9 = vpop.f32.mrf.mxu1  ;;  %v3993_v11 = vpop.f32.mrf.mxu0 }
 0x2ea   : > { %v4033_v20 = vadd.f32 %v4032_v9, %v3991_v8 }
 0x2eb   : > { %v4034_v12 = vpop.f32.mrf.mxu1  ;;  %v3994_v10 = vpop.f32.mrf.mxu0 }
 0x2ed   : > { %v4035_v13 = vpop.f32.mrf.mxu1 }
 0x325   : > { %v4071_v16 = vpop.f32.mrf.mxu0 }
 0x326   : > { %v4072_v30 = vadd.f32 %v4071_v16, %v4031_v15 }
 0x327   : > { %v4112_v36 = vpop.f32.mrf.mxu1  ;;  %v4073_v17 = vpop.f32.mrf.mxu0 }
 0x328   : > { %v4074_v14 = vadd.f32 %v4073_v17, %v4033_v20  ;;  %v4113_v21 = vadd.f32 %v4112_v36, %v4072_v30 }
 0x329   : > { %v4114_v18 = vpop.f32.mrf.mxu1  ;;  %v4075_v19 = vpop.f32.mrf.mxu0 }
 0x32a   : > { %v4115_v22 = vadd.f32 %v4114_v18, %v4074_v14 }
 0x32b   : > { %v4116_v42 = vpop.f32.mrf.mxu1  ;;  %v4076_v23 = vpop.f32.mrf.mxu0 }
 0x32c   : > { %v4145_v25 = vcombine.low %v4113_v21, %v4115_v22 }
 0x32d   : > { %v4117_v26 = vpop.f32.mrf.mxu1 }
 0x32e   : > { %v4159_v28 = vrot.slane %v4145_v25, %v6887_v49 }
 0x330   : > { %v4160_v52 = vcombine.low %v4152_v27, %v4159_v28  ;;  %4170 = sbr.rel (%p5622_p7) target bundleno = 1089 (0x441), region = 64 }
 0x332   : > { %v4164_v29 = vadd.f32 %v4160_v52, %v331_v31 }
 0x334   : > { %4166 = vst [vmem:[#allocation2 + $0x8] sm:$0xff] %v4164_v29 }
 0x335   : > { %v5883_v34 = vld [vmem:[#allocation8 + $0x78] sm:$0xff]   ;;  %v5887_v39 = vld [vmem:[#allocation8 + $0x70] sm:$0xff]   ;;  %v5891_v24 = vld [vmem:[#allocation8 + $0x68] sm:$0xff]   ;;  %v4177_v41 = vsub.s32 0, %v6340_v45  ;;  %v4181_v33 = vsub.s32 1, %v6340_v45  ;;  %v4185_v4 = vsub.s32 2, %v6340_v45 }
 0x336   : > { %v5884_v35 = vld [vmem:[#allocation8 + $0xf8] sm:$0xff]   ;;  %5694 = vmatprep.subr.bf16.mxu0 %v5883_v34  ;;  %v5888_v54 = vld [vmem:[#allocation8 + $0xf0] sm:$0xff]   ;;  %v5892_v40 = vld [vmem:[#allocation8 + $0xe8] sm:$0xff]   ;;  %v4189_v5 = vsub.s32 3, %v6340_v45  ;;  %v4193_v21 = vsub.s32 4, %v6340_v45  ;;  %v4197_v22 = vsub.s32 5, %v6340_v45 }
 0x337   : > { %v5885_v37 = vld [vmem:[#allocation8 + $0x38] sm:$0xff]   ;;  %5716 = vmatprep.subr.bf16.mxu1 %v5884_v35  ;;  %v5889_v53 = vld [vmem:[#allocation8 + $0x30] sm:$0xff]   ;;  %v5893_v43 = vld [vmem:[#allocation8 + $0x28] sm:$0xff]   ;;  %v4201_v25 = vsub.s32 6, %v6340_v45  ;;  %v4205_v26 = vsub.s32 7, %v6340_v45 }
 0x338   : > { %v5886_v38 = vld [vmem:[#allocation8 + $0xb8] sm:$0xff]   ;;  %5695 = vmatpush3.bf16.msra.mxu0 %v5885_v37  ;;  %v5890_v57 = vld [vmem:[#allocation8 + $0xb0] sm:$0xff]   ;;  %v5894_v44 = vld [vmem:[#allocation8 + $0xa8] sm:$0xff]  }
 0x339   : > { %5717 = vmatpush3.bf16.msra.mxu1 %v5886_v38  ;;  %5696 = vmatprep.subr.bf16.mxu0 %v5887_v39  ;;  %v5895_v46 = vld [vmem:[#allocation8 + $0x60] sm:$0xff]   ;;  %v5899_v48 = vld [vmem:[#allocation8 + $0x58] sm:$0xff]   ;;  %v5903_v56 = vld [vmem:[#allocation8 + $0x50] sm:$0xff]  }
 0x33a   : > { %5718 = vmatprep.subr.bf16.mxu1 %v5888_v54  ;;  %v5896_v47 = vld [vmem:[#allocation8 + $0xe0] sm:$0xff]   ;;  %v5900_v0 = vld [vmem:[#allocation8 + $0xd8] sm:$0xff]   ;;  %v5904_v58 = vld [vmem:[#allocation8 + $0xd0] sm:$0xff]  }
 0x33b   : > { %v5897_v59 = vld [vmem:[#allocation8 + $0x20] sm:$0xff]   ;;  %v5901_v50 = vld [vmem:[#allocation8 + $0x18] sm:$0xff]   ;;  %v5905_v60 = vld [vmem:[#allocation8 + $0x10] sm:$0xff]  }
 0x33c   : > { %5697 = vmatpush3.bf16.msra.mxu0 %v5889_v53  ;;  %v5898_v62 = vld [vmem:[#allocation8 + $0xa0] sm:$0xff]   ;;  %v5902_v55 = vld [vmem:[#allocation8 + $0x98] sm:$0xff]   ;;  %v5906_v32 = vld [vmem:[#allocation8 + $0x90] sm:$0xff]  }
 0x33d   : > { %5719 = vmatpush3.bf16.msra.mxu1 %v5890_v57  ;;  %5698 = vmatprep.subr.bf16.mxu0 %v5891_v24  ;;  %v5907_v61 = vld [vmem:[#allocation8 + $0x48] sm:$0xff]   ;;  %v5911_v3 = vld [vmem:[#allocation8 + $0x40] sm:$0xff]   ;;  %v4173_v8 = vld [vmem:[#allocation6] sm:$0xff] }
 0x33e   : > { %5720 = vmatprep.subr.bf16.mxu1 %v5892_v40  ;;  %v5908_v63 = vld [vmem:[#allocation8 + $0xc8] sm:$0xff]   ;;  %v5912_v51 = vld [vmem:[#allocation8 + $0xc0] sm:$0xff]   ;;  %v4178_v9 = vrot.slane %v4173_v8, %v4177_v41  ;;  %v4182_v11 = vrot.slane %v4173_v8, %v4181_v33  ;;  %v4186_v12 = vrot.slane %v4173_v8, %v4185_v4  ;;  %v4190_v10 = vrot.slane %v4173_v8, %v4189_v5  ;;  %v5915_v13 = vld [vmem:[#allocation8 + $0x178] sm:$0xff]  }
 0x33f   : > { %v5909_v1 = vld [vmem:[#allocation8 + $0x8] sm:$0xff]   ;;  %v5913_v6 = vld [vmem:[#allocation8] sm:$0xff]   ;;  %v5916_v15 = vld [vmem:[#allocation8 + $0x1f8] sm:$0xff]   ;;  %v4194_v52 = vrot.slane %v4173_v8, %v4193_v21  ;;  %v4198_v29 = vrot.slane %v4173_v8, %v4197_v22  ;;  %v4202_v38 = vrot.slane %v4173_v8, %v4201_v25  ;;  %v4206_v39 = vrot.slane %v4173_v8, %v4205_v26 }
 0x340   : > { %5699 = vmatpush3.bf16.msra.mxu0 %v5893_v43  ;;  %v5910_v2 = vld [vmem:[#allocation8 + $0x88] sm:$0xff]   ;;  %v5914_v7 = vld [vmem:[#allocation8 + $0x80] sm:$0xff]   ;;  %v4207_v16 = vcombine.low %v4178_v9, %v4182_v11  ;;  %v4208_v20 = vcombine.low %v4186_v12, %v4190_v10  ;;  %v5917_v37 = vld [vmem:[#allocation8 + $0x138] sm:$0xff]  }
 0x341   : > { %5721 = vmatpush3.bf16.msra.mxu1 %v5894_v44  ;;  %5700 = vmatprep.subr.bf16.mxu0 %v5895_v46  ;;  %v4171_v17 = vld [vmem:[#allocation2] sm:$0xff]  ;;  %v5919_v53 = vld [vmem:[#allocation8 + $0x170] sm:$0xff]   ;;  %v5918_v24 = vld [vmem:[#allocation8 + $0x1b8] sm:$0xff]   ;;  %v4224_v43 = vcombine.low %v4194_v52, %v4198_v29  ;;  %v4225_v44 = vcombine.low %v4202_v38, %v4206_v39 }
 0x342   : > { %5722 = vmatprep.subr.bf16.mxu1 %v5896_v47  ;;  %v4215_v30 = vrot.slane %v4207_v16, %v6887_v49  ;;  %v4222_v36 = vrot.slane %v4208_v20, %v6887_v49  ;;  %v5920_v40 = vld [vmem:[#allocation8 + $0x1f0] sm:$0xff]   ;;  %v5923_v46 = vld [vmem:[#allocation8 + $0x168] sm:$0xff]   ;;  %v5933_v41 = vld [vmem:[#allocation8 + $0x118] sm:$0xff]  }
 0x343   : > { %v5921_v45 = vld [vmem:[#allocation8 + $0x130] sm:$0xff]   ;;  %v5939_v8 = vld [vmem:[#allocation8 + $0x148] sm:$0xff]   ;;  %v5943_v20 = vld [vmem:[#allocation8 + $0x140] sm:$0xff]  }
 0x344   : > { %5701 = vmatpush3.bf16.msra.mxu0 %v5897_v59  ;;  %v4223_v14 = vcombine.low %v4215_v30, %v4222_v36  ;;  %v5922_v47 = vld [vmem:[#allocation8 + $0x1b0] sm:$0xff]   ;;  %v5924_v59 = vld [vmem:[#allocation8 + $0x1e8] sm:$0xff]   ;;  %v5623_v52 = vld [vmem:[#allocation9] ss:$0 sm:$0xff] }
 0x345   : > { %5723 = vmatpush3.bf16.msra.mxu1 %v5898_v62  ;;  %5702 = vmatprep.subr.bf16.mxu0 %v5899_v48  ;;  %v5925_v62 = vld [vmem:[#allocation8 + $0x128] sm:$0xff]   ;;  %v4232_v48 = vrot.slane %v4224_v43, %v6887_v49  ;;  %v5935_v33 = vld [vmem:[#allocation8 + $0x150] sm:$0xff]  }
 0x346   : > { %5724 = vmatprep.subr.bf16.mxu1 %v5900_v0  ;;  %v4243_v18 = vadd.f32 %v4223_v14, %v4171_v17  ;;  %v4239_v0 = vrot.slane %v4225_v44, %v6887_v49  ;;  %v5937_v5 = vld [vmem:[#allocation8 + $0x110] sm:$0xff]   ;;  %v5940_v10 = vld [vmem:[#allocation8 + $0x1c8] sm:$0xff]   ;;  %v5944_v17 = vld [vmem:[#allocation8 + $0x1c0] sm:$0xff]  }
 0x347   : > { %v5938_v9 = vld [vmem:[#allocation8 + $0x190] sm:$0xff]   ;;  %v5942_v30 = vld [vmem:[#allocation8 + $0x188] sm:$0xff]   ;;  %v5945_v14 = vld [vmem:[#allocation8 + $0x100] sm:$0xff]  }
 0x348   : > { %5703 = vmatpush3.bf16.msra.mxu0 %v5901_v50  ;;  %v4245_v19 = vmax.f32 %v4243_v18, 0.0  ;;  %v5927_v50 = vld [vmem:[#allocation8 + $0x160] sm:$0xff]  }
 0x349   : > { %5725 = vmatpush3.bf16.msra.mxu1 %v5902_v55  ;;  %5704 = vmatprep.subr.bf16.mxu0 %v5903_v56  ;;  %v5926_v55 = vld [vmem:[#allocation8 + $0x1a8] sm:$0xff]   ;;  %v5928_v56 = vld [vmem:[#allocation8 + $0x1e0] sm:$0xff]  }
 0x34a   : > { %5726 = vmatprep.subr.bf16.mxu1 %v5904_v58  ;;  %v4256_v42 = vrot.slane %v4245_v19, %v6887_v49  ;;  %v4249_v23 = vcombine.high %v4245_v19, %v4245_v19  ;;  %v5929_v58 = vld [vmem:[#allocation8 + $0x120] sm:$0xff]  }
 0x34c   : > { %5705 = vmatpush3.bf16.msra.mxu0 %v5905_v60  ;;  %v4264_v27 = vcombine.high %v4256_v42, %v4256_v42  ;;  %v4263_v28 = vrot.slane %v4249_v23, %v6887_v49  ;;  %v4291_v31 = vpack.c.bf16 %v4256_v42, %v4256_v42  ;;  %v4240_v60 = vcombine.low %v4232_v48, %v4239_v0 }
 0x34d   : > { %5727 = vmatpush3.bf16.msra.mxu1 %v5906_v32  ;;  %5706 = vmatprep.subr.bf16.mxu0 %v5907_v61  ;;  %v5931_v32 = vld [vmem:[#allocation8 + $0x158] sm:$0xff]   ;;  %v5930_v61 = vld [vmem:[#allocation8 + $0x1a0] sm:$0xff]  }
 0x34e   : > { %5728 = vmatprep.subr.bf16.mxu1 %v5908_v63  ;;  %v4292_v34 = vpack.c.bf16 %v4264_v27, %v4264_v27  ;;  %v4265_v35 = vcombine.high %v4263_v28, %v4263_v28  ;;  %v4293_v54 = vpack.c.bf16 %v4263_v28, %v4263_v28  ;;  %v5932_v63 = vld [vmem:[#allocation8 + $0x1d8] sm:$0xff]  }
 0x350   : > { %5707 = vmatpush3.bf16.msra.mxu0 %v5909_v1  ;;  %4850 = vmatprep.mubr.bf16.mxu0 %v4292_v34  ;;  %v4294_v57 = vpack.c.bf16 %v4265_v35, %v4265_v35  ;;  %v4172_v1 = vld [vmem:[#allocation2 + $0x8] sm:$0xff] }
 0x351   : > { %5729 = vmatpush3.bf16.msra.mxu1 %v5910_v2  ;;  %5708 = vmatprep.subr.bf16.mxu0 %v5911_v3  ;;  %v4244_v2 = vadd.f32 %v4240_v60, %v4172_v1  ;;  %v5934_v3 = vld [vmem:[#allocation8 + $0x198] sm:$0xff]  }
 0x352   : > { %5730 = vmatprep.subr.bf16.mxu1 %v5912_v51  ;;  %4890 = vmatprep.mubr.bf16.mxu1 %v4294_v57  ;;  %v5936_v51 = vld [vmem:[#allocation8 + $0x1d0] sm:$0xff]  }
 0x353   : > { %v4246_v4 = vmax.f32 %v4244_v2, 0.0 }
 0x354   : > { %5709 = vmatpush3.bf16.msra.mxu0 %v5913_v6 }
 0x355   : > { %5731 = vmatpush3.bf16.msra.mxu1 %v5914_v7  ;;  %5738 = vmatprep.subr.bf16.mxu0 %v5915_v13  ;;  %v4273_v6 = vrot.slane %v4246_v4, %v6887_v49  ;;  %v4266_v7 = vcombine.high %v4246_v4, %v4246_v4  ;;  %v5941_v13 = vld [vmem:[#allocation8 + $0x108] sm:$0xff]  }
 0x356   : > { %5760 = vmatprep.subr.bf16.mxu1 %v5916_v15 }
 0x357   : > { %4851 = vmatmul.mubr.bf16.vlgmr.msra.gmra.mxu0 %v4291_v31  ;;  %v4281_v11 = vcombine.high %v4273_v6, %v4273_v6  ;;  %v4280_v12 = vrot.slane %v4266_v7, %v6887_v49  ;;  %v5946_v49 = vld [vmem:[#allocation8 + $0x180] sm:$0xff]   ;;  %v4295_v18 = vpack.c.bf16 %v4273_v6, %v4273_v6 }
 0x358   : > { %5739 = vmatpush3.bf16.msra.mxu0 %v5917_v37  ;;  %4891 = vmatmul.mubr.bf16.vlgmr.msra.gmra.mxu1 %v4293_v54 }
 0x359   : > { %5740 = vmatprep.subr.bf16.mxu0 %v5919_v53  ;;  %5761 = vmatpush3.bf16.msra.mxu1 %v5918_v24  ;;  %v4296_v15 = vpack.c.bf16 %v4281_v11, %v4281_v11  ;;  %v4282_v16 = vcombine.high %v4280_v12, %v4280_v12  ;;  %v4297_v19 = vpack.c.bf16 %v4280_v12, %v4280_v12 }
 0x35a   : > { %5762 = vmatprep.subr.bf16.mxu1 %v5920_v40 }
 0x35b   : > { %4930 = vmatprep.mubr.bf16.mxu0 %v4296_v15  ;;  %v4298_v36 = vpack.c.bf16 %v4282_v16, %v4282_v16 }
 0x35c   : > { %5741 = vmatpush3.bf16.msra.mxu0 %v5921_v45 }
 0x35d   : > { %5742 = vmatprep.subr.bf16.mxu0 %v5923_v46  ;;  %5763 = vmatpush3.bf16.msra.mxu1 %v5922_v47 }
 0x35e   : > { %5764 = vmatprep.subr.bf16.mxu1 %v5924_v59  ;;  %4970 = vmatprep.mubr.bf16.mxu1 %v4298_v36 }
 0x360   : > { %5743 = vmatpush3.bf16.msra.mxu0 %v5925_v62 }
 0x361   : > { %5744 = vmatprep.subr.bf16.mxu0 %v5927_v50  ;;  %5765 = vmatpush3.bf16.msra.mxu1 %v5926_v55 }
 0x362   : > { %5766 = vmatprep.subr.bf16.mxu1 %v5928_v56 }
 0x364   : > { %5745 = vmatpush3.bf16.msra.mxu0 %v5929_v58 }
 0x365   : > { %5746 = vmatprep.subr.bf16.mxu0 %v5931_v32  ;;  %5767 = vmatpush3.bf16.msra.mxu1 %v5930_v61 }
 0x366   : > { %5768 = vmatprep.subr.bf16.mxu1 %v5932_v63 }
 0x368   : > { %5747 = vmatpush3.bf16.msra.mxu0 %v5933_v41 }
 0x369   : > { %5748 = vmatprep.subr.bf16.mxu0 %v5935_v33  ;;  %5769 = vmatpush3.bf16.msra.mxu1 %v5934_v3 }
 0x36a   : > { %5770 = vmatprep.subr.bf16.mxu1 %v5936_v51 }
 0x36c   : > { %5749 = vmatpush3.bf16.msra.mxu0 %v5937_v5 }
 0x36d   : > { %5750 = vmatprep.subr.bf16.mxu0 %v5939_v8  ;;  %5771 = vmatpush3.bf16.msra.mxu1 %v5938_v9 }
 0x36e   : > { %5772 = vmatprep.subr.bf16.mxu1 %v5940_v10 }
 0x370   : > { %5751 = vmatpush3.bf16.msra.mxu0 %v5941_v13 }
 0x371   : > { %5752 = vmatprep.subr.bf16.mxu0 %v5943_v20  ;;  %5773 = vmatpush3.bf16.msra.mxu1 %v5942_v30 }
 0x372   : > { %5774 = vmatprep.subr.bf16.mxu1 %v5944_v17 }
 0x374   : > { %5753 = vmatpush3.bf16.msra.mxu0 %v5945_v14 }
 0x375   : > { %5775 = vmatpush3.bf16.msra.mxu1 %v5946_v49 }
 0x377   : > { %4931 = vmatmul.mubr.bf16.vlgmr.msra.gmra.mxu0 %v4295_v18 }
 0x378   : > { %4971 = vmatmul.mubr.bf16.vlgmr.msra.gmra.mxu1 %v4297_v19 }
 0x417   : > { %v5710_v21 = vpop.f32.mrf.mxu0 }
 0x418   : > { %v5732_v22 = vpop.f32.mrf.mxu1 }
 0x419   : > { %v5711_v42 = vpop.f32.mrf.mxu0 }
 0x41a   : > { %v5733_v23 = vpop.f32.mrf.mxu1  ;;  %v5712_v31 = vadd.f32 %v5711_v42, %v5710_v21 }
 0x41b   : > { %v5713_v25 = vpop.f32.mrf.mxu0  ;;  %v5734_v34 = vadd.f32 %v5733_v23, %v5732_v22 }
 0x41c   : > { %v5735_v26 = vpop.f32.mrf.mxu1  ;;  %v4853_v29 = vadd.f32 %v5712_v31, %v5623_v52 }
 0x41d   : > { %v5714_v27 = vpop.f32.mrf.mxu0 }
 0x41e   : > { %v5736_v28 = vpop.f32.mrf.mxu1  ;;  %v4893_v39 = vadd.f32 %v5734_v34, %v4853_v29 }
 0x437   : > { %v5754_v35 = vpop.f32.mrf.mxu0 }
 0x438   : > { %v5776_v37 = vpop.f32.mrf.mxu1 }
 0x439   : > { %v5755_v38 = vpop.f32.mrf.mxu0 }
 0x43a   : > { %v5756_v54 = vadd.f32 %v5755_v38, %v5754_v35  ;;  %v5777_v53 = vpop.f32.mrf.mxu1 }
 0x43b   : > { %v5757_v57 = vpop.f32.mrf.mxu0  ;;  %v5778_v40 = vadd.f32 %v5777_v53, %v5776_v37 }
 0x43c   : > { %v4933_v24 = vadd.f32 %v5756_v54, %v4893_v39  ;;  %v5779_v45 = vpop.f32.mrf.mxu1 }
 0x43d   : > { %v5758_v43 = vpop.f32.mrf.mxu0 }
 0x43e   : > { %v4973_v44 = vadd.f32 %v5778_v40, %v4933_v24  ;;  %v5780_v46 = vpop.f32.mrf.mxu1 }
 0x440   : > { %4978 = vst [vmem:[#allocation11] sm:$0x3] %v4973_v44 }
 0x441 PF: > { %p6965_p11 = scmp.eq.s32.totalorder %s5093_s24, 6  ;;  %s6152_s28 = smov [#allocation11]  }
 0x442   : > { %s4988_s29 = sshll.u32 %s6152_s28, 4  ;;  %s4989_s29 = int_to_ptr.vmem [resolvable:$true] %s4988_s29 }
 0x443   : > { %s6053_s30 = scalar_lea.vmem %s4989_s29, 32  ;;  %p6060_p1 = scmp.lt.s32.totalorder %s4989_s29, %s4989_s29 }
 0x444   : > { %p6054_p12 = scmp.ne.s32.totalorder %s4989_s29, %s6053_s30  ;;  %p6061_p4 = scmp.lt.s32.totalorder %s6053_s30, %s6053_s30 }
 0x446   : > { %p6055_p13 = pnand %p6054_p12, %p6965_p11  ;;  %p6062_p5 = por %p6061_p4, %p6060_p1 }
 0x448   : > { %p6056_p0 = pneg %p6055_p13 }
 0x44a   : > { %p6063_p8 = pnand %p6062_p5, %p6056_p0 }
 0x44c   : > { %6066 = shalt.err (!%p6063_p8)
}
 0x44d   : > { %5797 = dma.vmem_to_hbm [thread:$0]  (%p6965_p11), %s4989_s29, 32, %s7003_s5, [#allocation5]  }
 0x44e   : > { %6114 = dma.done.wait (%p6965_p11), [#allocation5], 32  }
 0x44f   : > { %6116 = vsyncadd (%p6965_p11), [#allocation5], 4294967264 }
 0x450 PF: > { %s21_s23 = sadd.s32 1, %s6139_s23   ;;  %s7017_s18 = smov %s6123_s19 }
 0x451   : > { %p18_p2 = scmp.ge.s32.totalorder %s21_s23, 9   ;;  %s7018_s19 = smov %s6127_s20 }
 0x452   : > { %s7019_s20 = smov %s6278_s9  ;;  %s7020_s21 = smov %s6135_s22 }
 0x453   : > { %s7021_s22 = smov %s7023_s8  ;;  %20 = sbr.rel (!%p18_p2) target bundleno = 7 (0x7), region = 101 }
 0x458   :  { %5001 = vsyncpa [#allocation4], 1 }
 0x459   :  { %5003 = vsyncpa [#allocation4 + $0x1], 1 }
 0x45a   :  { %5004 = vsyncpa [#allocation7], 1 }
 0x45b   :  { %5005 = vsyncpa [#allocation10], 1 }
 0x45c   :  { %5006 = vsyncpa [#allocation5], 1 }
 0x45d   :  { %5008 = vsyncpa [#allocation5 + $0x1], 1 }

</bundles_post_ra>
